<compile_context>
chip_gen: v7x
topology: tpu7x:2x2x1
jax: 0.10.0
libtpu: 0.0.40
codegen_flags: <defaults>
</compile_context>

<pallas_src>
import jax
import jax.numpy as jnp
from jax import lax
from jax.experimental import pallas as pl
from jax.experimental.pallas import tpu as pltpu


def _round_up(x, m):
    return (x + m - 1) // m * m


# ---------------------------------------------------------------------------
# Fused Pallas kernel
# ---------------------------------------------------------------------------

def _make_fused_kernel(heads, hd_pad, dqp, lkv, lkv_pad, compute_dtype):
    f32 = jnp.float32

    def kernel(q_ref, kv_ref, wq_ref, wkv_ref, wo_ref, bo_ref, o_ref,
               kvp_s, qp_s, att_s):
        # q_ref:   (tq, din_q)       per-(batch, q-tile) query block
        # kv_ref:  (Lkv_pad, dim_kv) per-batch context block (zero padded)
        # wq_ref:  (din_q, dqp)      pre-transposed, head-padded, scale folded
        # wkv_ref: (dim_kv, 2*dqp)   [Wk^T | Wv^T], head-padded
        # wo_ref:  (dqp, dim_q)      pre-transposed, head-padded rows
        # bo_ref:  (1, dim_q)        f32 bias
        # o_ref:   (tq, dim_q)
        # kvp_s:   (Lkv_pad, 2*dqp)  bf16, persists across q-tiles of a batch
        # qp_s:    (tq, dqp)         bf16
        # att_s:   (tq, dqp)         bf16 lane-dense attention slab

        # K/V projection only on the first q-tile of each batch; the result
        # lives in persistent VMEM scratch for the remaining q-tiles.
        @pl.when(pl.program_id(1) == 0)
        def _():
            kvp_s[...] = jnp.dot(
                kv_ref[...].astype(compute_dtype), wkv_ref[...],
                preferred_element_type=f32).astype(compute_dtype)

        # Q projection (softmax scale pre-folded into Wq).
        qp_s[...] = jnp.dot(
            q_ref[...].astype(compute_dtype), wq_ref[...],
            preferred_element_type=f32).astype(compute_dtype)

        tq = qp_s.shape[0]
        if lkv < lkv_pad:
            # Hoisted out of the head loop (JAX does not CSE broadcasts).
            col_ids = lax.broadcasted_iota(jnp.int32, (tq, lkv_pad), 1)
        neg_big = jnp.float32(-1e30)

        # Per-head attention.  Every slice below is a static, 128-lane-aligned
        # block of width hd_pad (a multiple of 128) -> lane-dense, no copies.
        for h in range(heads):
            lo = h * hd_pad
            qh = qp_s[:, lo:lo + hd_pad]                      # (tq, hd_pad)
            kh = kvp_s[:, lo:lo + hd_pad]                     # (Lkv_pad, hd_pad)
            vh = kvp_s[:, dqp + lo:dqp + lo + hd_pad]         # (Lkv_pad, hd_pad)

            # Scores: contract the last dims (no in-kernel transpose).
            s = lax.dot_general(qh, kh, (((1,), (1,)), ((), ())),
                                preferred_element_type=f32)   # (tq, Lkv_pad) f32
            if lkv < lkv_pad:
                s = jnp.where(col_ids < lkv, s, neg_big)      # mask padded keys

            # Softmax strictly in f32 (v5e VPU/EUP have no bf16).
            s = s - jnp.max(s, axis=-1, keepdims=True)
            p = jnp.exp(s)
            p = p * pl.reciprocal(jnp.sum(p, axis=-1, keepdims=True),
                                  approx=True)

            att_s[:, lo:lo + hd_pad] = jnp.dot(
                p.astype(compute_dtype), vh,
                preferred_element_type=f32).astype(compute_dtype)

        # Output projection + bias on the lane-dense (tq, dqp) bf16 slab.
        y = jnp.dot(att_s[...], wo_ref[...], preferred_element_type=f32)
        o_ref[...] = (y + bo_ref[...]).astype(o_ref.dtype)

    return kernel


# ---------------------------------------------------------------------------
# Parameter prep (one-time, at init)
# ---------------------------------------------------------------------------

def prepare_params(params, heads, param_dtype=jnp.bfloat16):
    """Pre-transpose weights, fold the softmax scale into Wq, fuse Wk/Wv, and
    zero-pad every head to a 128-lane-aligned block."""
    wq, wk, wv, wo, bo = (params["wq"], params["wk"], params["wv"],
                          params["wo"], params["bo"])
    dim_q = wq.shape[0]                 # output feature dim
    hd = dim_q // heads
    hd_pad = _round_up(hd, 128)
    dqp = heads * hd_pad
    scale = float(hd) ** (-0.5)

    def pad_head_cols(w_t):             # (in, dim_q) -> (in, dqp)
        w3 = w_t.reshape(w_t.shape[0], heads, hd)
        w3 = jnp.pad(w3, ((0, 0), (0, 0), (0, hd_pad - hd)))
        return w3.reshape(w_t.shape[0], dqp)

    wq_t = pad_head_cols((wq * scale).T)                       # (din_q, dqp)
    wkv_t = jnp.concatenate(
        [pad_head_cols(wk.T), pad_head_cols(wv.T)], axis=1)    # (dim_kv, 2*dqp)

    wo_t = wo.T.reshape(heads, hd, dim_q)
    wo_t = jnp.pad(wo_t, ((0, 0), (0, hd_pad - hd), (0, 0)))
    wo_t = wo_t.reshape(dqp, dim_q)                            # (dqp, dim_q)

    return {
        "wq_t": wq_t.astype(param_dtype),
        "wkv_t": wkv_t.astype(param_dtype),
        "wo_t": wo_t.astype(param_dtype),
        "bo": bo.reshape(1, -1).astype(jnp.float32),
        "heads": heads, "hd": hd, "hd_pad": hd_pad, "dim_q": dim_q,
    }


# ---------------------------------------------------------------------------
# Forward wrapper
# ---------------------------------------------------------------------------

def cross_attention_forward(prepared, q, kv, *, tq=256,
                            compute_dtype=jnp.bfloat16):
    """q: (B, Lq, dim_q), kv: (B, Lkv, dim_kv) -> (B, Lq, dim_q).

    tq: Lq tile size — sweep 256-512 per generation (v7x: keep the budget
    2*q + qp + att + 2*out + kvp + weights under ~48 MiB of its 64 MiB VMEM).
    """
    B, Lq, din_q = q.shape
    _, Lkv, dim_kv = kv.shape
    heads = prepared["heads"]
    hd_pad = prepared["hd_pad"]
    dqp = heads * hd_pad
    dim_q = prepared["wo_t"].shape[1]

    # Lq tiling (pad to a multiple of the tile); Lkv padded to the MXU width.
    tq_eff = _round_up(min(tq, _round_up(Lq, 8)), 8)
    lq_pad = _round_up(Lq, tq_eff)
    lkv_pad = _round_up(Lkv, 128)
    if lq_pad != Lq:
        q = jnp.pad(q, ((0, 0), (0, lq_pad - Lq), (0, 0)))
    if lkv_pad != Lkv:
        kv = jnp.pad(kv, ((0, 0), (0, lkv_pad - Lkv), (0, 0)))
    nq = lq_pad // tq_eff

    kernel = _make_fused_kernel(heads, hd_pad, dqp, Lkv, lkv_pad, compute_dtype)

    out = pl.pallas_call(
        kernel,
        out_shape=jax.ShapeDtypeStruct((B, lq_pad, dim_q), q.dtype),
        grid=(B, nq),
        in_specs=[
            pl.BlockSpec((None, tq_eff, din_q), lambda b, i: (b, i, 0)),
            pl.BlockSpec((None, lkv_pad, dim_kv), lambda b, i: (b, 0, 0)),
            pl.BlockSpec((din_q, dqp), lambda b, i: (0, 0)),
            pl.BlockSpec((dim_kv, 2 * dqp), lambda b, i: (0, 0)),
            pl.BlockSpec((dqp, dim_q), lambda b, i: (0, 0)),
            pl.BlockSpec((1, dim_q), lambda b, i: (0, 0)),
        ],
        out_specs=pl.BlockSpec((None, tq_eff, dim_q), lambda b, i: (b, i, 0)),
        scratch_shapes=[
            pltpu.VMEM((lkv_pad, 2 * dqp), compute_dtype),   # kvp (per batch)
            pltpu.VMEM((tq_eff, dqp), compute_dtype),        # q projection
            pltpu.VMEM((tq_eff, dqp), compute_dtype),        # attention slab
        ],
        compiler_params=pltpu.CompilerParams(
            # Batch axis parallel (megacore); Lq axis must stay "arbitrary"
            # because later q-tiles reuse the kvp scratch written at q-tile 0.
            dimension_semantics=("parallel", "arbitrary"),
            vmem_limit_bytes=64 * 1024 * 1024),
    )(q, kv, prepared["wq_t"], prepared["wkv_t"], prepared["wo_t"],
      prepared["bo"])

    return out[:, :Lq, :] if lq_pad != Lq else out


# ---------------------------------------------------------------------------
# Pure-JAX reference (mirrors the PyTorch module exactly)
# ---------------------------------------------------------------------------

def _multihead_reshape(x, heads):
    b, lens, dim = x.shape
    x = x.reshape(b, lens, heads, dim // heads)
    x = jnp.transpose(x, (0, 2, 1, 3))
    return x.reshape(b * heads, lens, dim // heads)


def _multihead_reshape_inverse(x, heads):
    bh, lens, dim = x.shape
    x = x.reshape(bh // heads, heads, lens, dim)
    x = jnp.transpose(x, (0, 2, 1, 3))
    return x.reshape(bh // heads, lens, dim * heads)


def cross_attention_ref(params, q, kv, heads, dim_q):
    q_p = q @ params["wq"].T
    k_p = kv @ params["wk"].T
    v_p = kv @ params["wv"].T
    qh = _multihead_reshape(q_p, heads)
    kh = _multihead_reshape(k_p, heads)
    vh = _multihead_reshape(v_p, heads)
    scale = (dim_q // heads) ** (-0.5)
    s = jnp.einsum("bqd,bkd->bqk", qh, kh) * scale
    p = jax.nn.softmax(s, axis=-1)
    att = jnp.einsum("bqk,bkd->bqd", p, vh)
    att = _multihead_reshape_inverse(att, heads)
    return att @ params["wo"].T + params["bo"]


# ---------------------------------------------------------------------------
# Demo / correctness check
# ---------------------------------------------------------------------------

if __name__ == "__main__":
    # Small, forward-consistent shapes (scaled-down dim_q=320/dim_kv=768).
    # TODO(synk): benchmark/tune tq & buffering at production shapes
    # (Lq 1024-4096, dim_q 320-1280, Lkv 77->128), not these demo shapes.
    B, Lq, Lkv = 2, 16, 8
    dim_q, dim_kv, heads = 64, 32, 8  # head_dim = 8 -> padded to 128 lanes

    key = jax.random.PRNGKey(0)
    k_wq, k_wk, k_wv, k_wo, k_bo, k_q, k_kv = jax.random.split(key, 7)

    # PyTorch Linear weight layout: (out, in)
    params = {
        "wq": jax.random.normal(k_wq, (dim_q, dim_q), jnp.float32) * 0.05,
        "wk": jax.random.normal(k_wk, (dim_q, dim_kv), jnp.float32) * 0.05,
        "wv": jax.random.normal(k_wv, (dim_q, dim_kv), jnp.float32) * 0.05,
        "wo": jax.random.normal(k_wo, (dim_q, dim_q), jnp.float32) * 0.05,
        "bo": jax.random.normal(k_bo, (dim_q,), jnp.float32) * 0.05,
    }

    q = jax.random.normal(k_q, (B, Lq, dim_q), jnp.float32)
    kv = jax.random.normal(k_kv, (B, Lkv, dim_kv), jnp.float32)

    prepared = prepare_params(params, heads)          # one-time weight prep
    out = cross_attention_forward(prepared, q, kv)
    out = jax.block_until_ready(out)

    ref = cross_attention_ref(params, q, kv, heads, dim_q)
    assert out.shape == (B, Lq, dim_q), out.shape
    # bf16 MXU operands + approx-reciprocal softmax loosen the match vs the
    # f32 reference; observed error is ~1e-3 at these magnitudes.
    assert jnp.allclose(out, ref, atol=3e-2, rtol=3e-2), "mismatch vs reference"

    print("KERNEL_OK")
</pallas_src>

<mosaic_0001>
module attributes {stable_mosaic.version = 11 : i64} {
  func.func @kernel(%arg0: i32, %arg1: i32, %arg2: memref<1x16x64xf32, #tpu.memory_space<vmem>>, %arg3: memref<1x128x32xf32, #tpu.memory_space<vmem>>, %arg4: memref<64x1024xbf16, #tpu.memory_space<vmem>>, %arg5: memref<32x2048xbf16, #tpu.memory_space<vmem>>, %arg6: memref<1024x64xbf16, #tpu.memory_space<vmem>>, %arg7: memref<1x64xf32, #tpu.memory_space<vmem>>, %arg8: memref<1x16x64xf32, #tpu.memory_space<vmem>>, %arg9: memref<128x2048xbf16, #tpu.memory_space<vmem>>, %arg10: memref<16x1024xbf16, #tpu.memory_space<vmem>>, %arg11: memref<16x1024xbf16, #tpu.memory_space<vmem>>) attributes {dimension_semantics = [#tpu.dimension_semantics<parallel>, #tpu.dimension_semantics<arbitrary>], iteration_bounds = array<i64: 2, 1>, scalar_prefetch = 0 : i64, scratch_operands = 3 : i64, tpu.core_type = #tpu.core_type<tc>, window_params = [{transform_indices = @transform_0, window_bounds = array<i64: 1, 16, 64>}, {transform_indices = @transform_1, window_bounds = array<i64: 1, 128, 32>}, {pipeline_mode = #tpu.pipeline_mode<synchronous>, transform_indices = @transform_2, window_bounds = array<i64: 64, 1024>}, {pipeline_mode = #tpu.pipeline_mode<synchronous>, transform_indices = @transform_3, window_bounds = array<i64: 32, 2048>}, {pipeline_mode = #tpu.pipeline_mode<synchronous>, transform_indices = @transform_4, window_bounds = array<i64: 1024, 64>}, {pipeline_mode = #tpu.pipeline_mode<synchronous>, transform_indices = @transform_5, window_bounds = array<i64: 1, 64>}, {transform_indices = @transform_6, window_bounds = array<i64: 1, 16, 64>}]} {
    %c0_i32 = arith.constant 0 : i32
    %0 = arith.cmpi eq, %arg1, %c0_i32 : i32
    %1 = arith.extui %0 : i1 to i32
    %c0_i32_0 = arith.constant 0 : i32
    %2 = arith.cmpi ne, %1, %c0_i32_0 : i32
    scf.if %2 {
      %c0_113 = arith.constant 0 : index
      %c0_114 = arith.constant 0 : index
      %c0_115 = arith.constant 0 : index
      %196 = vector.load %arg3[%c0_113, %c0_114, %c0_115] : memref<1x128x32xf32, #tpu.memory_space<vmem>>, vector<1x128x32xf32>
      %197 = vector.shape_cast %196 : vector<1x128x32xf32> to vector<128x32xf32>
      %198 = arith.truncf %197 : vector<128x32xf32> to vector<128x32xbf16>
      %c0_116 = arith.constant 0 : index
      %c0_117 = arith.constant 0 : index
      %199 = vector.load %arg5[%c0_116, %c0_117] : memref<32x2048xbf16, #tpu.memory_space<vmem>>, vector<32x2048xbf16>
      %cst_118 = arith.constant dense<0.000000e+00> : vector<128x2048xf32>
      %200 = tpu.matmul %198, %199, %cst_118 {dimension_numbers = #tpu.dot_dimension_numbers<[1], [0], [0], [1], [0, 0, 1, 1], [], []>} : vector<128x32xbf16>, vector<32x2048xbf16>, vector<128x2048xf32> -> vector<128x2048xf32>
      %201 = arith.truncf %200 : vector<128x2048xf32> to vector<128x2048xbf16>
      %c0_119 = arith.constant 0 : index
      %c0_120 = arith.constant 0 : index
      %202 = vector.load %arg9[%c0_119, %c0_120] : memref<128x2048xbf16, #tpu.memory_space<vmem>>, vector<128x2048xbf16>
      tpu.vector_store %arg9[%c0_119, %c0_120], %201 {strides = array<i32>} : memref<128x2048xbf16, #tpu.memory_space<vmem>>, vector<128x2048xbf16>,
    } else {
    }
    %c0 = arith.constant 0 : index
    %c0_1 = arith.constant 0 : index
    %c0_2 = arith.constant 0 : index
    %3 = vector.load %arg2[%c0, %c0_1, %c0_2] : memref<1x16x64xf32, #tpu.memory_space<vmem>>, vector<1x16x64xf32>
    %4 = vector.shape_cast %3 : vector<1x16x64xf32> to vector<16x64xf32>
    %5 = arith.truncf %4 : vector<16x64xf32> to vector<16x64xbf16>
    %c0_3 = arith.constant 0 : index
    %c0_4 = arith.constant 0 : index
    %6 = vector.load %arg4[%c0_3, %c0_4] : memref<64x1024xbf16, #tpu.memory_space<vmem>>, vector<64x1024xbf16>
    %cst = arith.constant dense<0.000000e+00> : vector<16x1024xf32>
    %7 = tpu.matmul %5, %6, %cst {dimension_numbers = #tpu.dot_dimension_numbers<[1], [0], [0], [1], [0, 0, 1, 1], [], []>} : vector<16x64xbf16>, vector<64x1024xbf16>, vector<16x1024xf32> -> vector<16x1024xf32>
    %8 = arith.truncf %7 : vector<16x1024xf32> to vector<16x1024xbf16>
    %c0_5 = arith.constant 0 : index
    %c0_6 = arith.constant 0 : index
    %9 = vector.load %arg10[%c0_5, %c0_6] : memref<16x1024xbf16, #tpu.memory_space<vmem>>, vector<16x1024xbf16>
    tpu.vector_store %arg10[%c0_5, %c0_6], %8 {strides = array<i32>} : memref<16x1024xbf16, #tpu.memory_space<vmem>>, vector<16x1024xbf16>,
    %10 = tpu.iota {dimensions = array<i32: 1>} : vector<16x128xi32>
    %c0_7 = arith.constant 0 : index
    %c0_8 = arith.constant 0 : index
    %11 = vector.load %arg10[%c0_7, %c0_8] : memref<16x1024xbf16, #tpu.memory_space<vmem>>, vector<16x128xbf16>
    %c0_9 = arith.constant 0 : index
    %c0_10 = arith.constant 0 : index
    %12 = vector.load %arg9[%c0_9, %c0_10] : memref<128x2048xbf16, #tpu.memory_space<vmem>>, vector<128x128xbf16>
    %c0_11 = arith.constant 0 : index
    %c1024 = arith.constant 1024 : index
    %13 = vector.load %arg9[%c0_11, %c1024] : memref<128x2048xbf16, #tpu.memory_space<vmem>>, vector<128x128xbf16>
    %cst_12 = arith.constant dense<0.000000e+00> : vector<16x128xf32>
    %14 = tpu.matmul %11, %12, %cst_12 {dimension_numbers = #tpu.dot_dimension_numbers<[1], [1], [0], [0], [0, 0, 1, 0], [], []>} : vector<16x128xbf16>, vector<128x128xbf16>, vector<16x128xf32> -> vector<16x128xf32>
    %c8_i32 = arith.constant 8 : i32
    %15 = vector.broadcast %c8_i32 : i32 to vector<16x128xi32>
    %16 = arith.cmpi slt, %10, %15 : vector<16x128xi32>
    %cst_13 = arith.constant -1.000000e+30 : f32
    %17 = vector.broadcast %cst_13 : f32 to vector<16x128xf32>
    %18 = arith.select %16, %14, %17 : vector<16x128xi1>, vector<16x128xf32>
    %cst_14 = arith.constant dense<0xFF800000> : vector<16xf32>
    %19 = vector.multi_reduction <maximumf>, %18, %cst_14 [1] : vector<16x128xf32> to vector<16xf32>
    %20 = vector.shape_cast %19 : vector<16xf32> to vector<16x1xf32>
    %21 = vector.broadcast %20 : vector<16x1xf32> to vector<16x128xf32>
    %22 = arith.subf %18, %21 : vector<16x128xf32>
    %23 = math.exp %22 : vector<16x128xf32>
    %cst_15 = arith.constant dense<0.000000e+00> : vector<16xf32>
    %24 = vector.multi_reduction <add>, %23, %cst_15 [1] : vector<16x128xf32> to vector<16xf32>
    %25 = vector.shape_cast %24 : vector<16xf32> to vector<16x1xf32>
    %26 = tpu.reciprocal %25 {approx = true} : vector<16x1xf32> -> vector<16x1xf32>
    %27 = vector.broadcast %26 : vector<16x1xf32> to vector<16x128xf32>
    %28 = arith.mulf %23, %27 : vector<16x128xf32>
    %29 = arith.truncf %28 : vector<16x128xf32> to vector<16x128xbf16>
    %cst_16 = arith.constant dense<0.000000e+00> : vector<16x128xf32>
    %30 = tpu.matmul %29, %13, %cst_16 {dimension_numbers = #tpu.dot_dimension_numbers<[1], [0], [0], [1], [0, 0, 1, 1], [], []>} : vector<16x128xbf16>, vector<128x128xbf16>, vector<16x128xf32> -> vector<16x128xf32>
    %31 = arith.truncf %30 : vector<16x128xf32> to vector<16x128xbf16>
    %c0_17 = arith.constant 0 : index
    %c0_18 = arith.constant 0 : index
    %32 = vector.load %arg11[%c0_17, %c0_18] : memref<16x1024xbf16, #tpu.memory_space<vmem>>, vector<16x128xbf16>
    tpu.vector_store %arg11[%c0_17, %c0_18], %31 {strides = array<i32>} : memref<16x1024xbf16, #tpu.memory_space<vmem>>, vector<16x128xbf16>,
    %c0_19 = arith.constant 0 : index
    %c128 = arith.constant 128 : index
    %33 = vector.load %arg10[%c0_19, %c128] : memref<16x1024xbf16, #tpu.memory_space<vmem>>, vector<16x128xbf16>
    %c0_20 = arith.constant 0 : index
    %c128_21 = arith.constant 128 : index
    %34 = vector.load %arg9[%c0_20, %c128_21] : memref<128x2048xbf16, #tpu.memory_space<vmem>>, vector<128x128xbf16>
    %c0_22 = arith.constant 0 : index
    %c1152 = arith.constant 1152 : index
    %35 = vector.load %arg9[%c0_22, %c1152] : memref<128x2048xbf16, #tpu.memory_space<vmem>>, vector<128x128xbf16>
    %cst_23 = arith.constant dense<0.000000e+00> : vector<16x128xf32>
    %36 = tpu.matmul %33, %34, %cst_23 {dimension_numbers = #tpu.dot_dimension_numbers<[1], [1], [0], [0], [0, 0, 1, 0], [], []>} : vector<16x128xbf16>, vector<128x128xbf16>, vector<16x128xf32> -> vector<16x128xf32>
    %c8_i32_24 = arith.constant 8 : i32
    %37 = vector.broadcast %c8_i32_24 : i32 to vector<16x128xi32>
    %38 = arith.cmpi slt, %10, %37 : vector<16x128xi32>
    %cst_25 = arith.constant -1.000000e+30 : f32
    %39 = vector.broadcast %cst_25 : f32 to vector<16x128xf32>
    %40 = arith.select %38, %36, %39 : vector<16x128xi1>, vector<16x128xf32>
    %cst_26 = arith.constant dense<0xFF800000> : vector<16xf32>
    %41 = vector.multi_reduction <maximumf>, %40, %cst_26 [1] : vector<16x128xf32> to vector<16xf32>
    %42 = vector.shape_cast %41 : vector<16xf32> to vector<16x1xf32>
    %43 = vector.broadcast %42 : vector<16x1xf32> to vector<16x128xf32>
    %44 = arith.subf %40, %43 : vector<16x128xf32>
    %45 = math.exp %44 : vector<16x128xf32>
    %cst_27 = arith.constant dense<0.000000e+00> : vector<16xf32>
    %46 = vector.multi_reduction <add>, %45, %cst_27 [1] : vector<16x128xf32> to vector<16xf32>
    %47 = vector.shape_cast %46 : vector<16xf32> to vector<16x1xf32>
    %48 = tpu.reciprocal %47 {approx = true} : vector<16x1xf32> -> vector<16x1xf32>
    %49 = vector.broadcast %48 : vector<16x1xf32> to vector<16x128xf32>
    %50 = arith.mulf %45, %49 : vector<16x128xf32>
    %51 = arith.truncf %50 : vector<16x128xf32> to vector<16x128xbf16>
    %cst_28 = arith.constant dense<0.000000e+00> : vector<16x128xf32>
    %52 = tpu.matmul %51, %35, %cst_28 {dimension_numbers = #tpu.dot_dimension_numbers<[1], [0], [0], [1], [0, 0, 1, 1], [], []>} : vector<16x128xbf16>, vector<128x128xbf16>, vector<16x128xf32> -> vector<16x128xf32>
    %53 = arith.truncf %52 : vector<16x128xf32> to vector<16x128xbf16>
    %c0_29 = arith.constant 0 : index
    %c128_30 = arith.constant 128 : index
    %54 = vector.load %arg11[%c0_29, %c128_30] : memref<16x1024xbf16, #tpu.memory_space<vmem>>, vector<16x128xbf16>
    tpu.vector_store %arg11[%c0_29, %c128_30], %53 {strides = array<i32>} : memref<16x1024xbf16, #tpu.memory_space<vmem>>, vector<16x128xbf16>,
    %c0_31 = arith.constant 0 : index
    %c256 = arith.constant 256 : index
    %55 = vector.load %arg10[%c0_31, %c256] : memref<16x1024xbf16, #tpu.memory_space<vmem>>, vector<16x128xbf16>
    %c0_32 = arith.constant 0 : index
    %c256_33 = arith.constant 256 : index
    %56 = vector.load %arg9[%c0_32, %c256_33] : memref<128x2048xbf16, #tpu.memory_space<vmem>>, vector<128x128xbf16>
    %c0_34 = arith.constant 0 : index
    %c1280 = arith.constant 1280 : index
    %57 = vector.load %arg9[%c0_34, %c1280] : memref<128x2048xbf16, #tpu.memory_space<vmem>>, vector<128x128xbf16>
    %cst_35 = arith.constant dense<0.000000e+00> : vector<16x128xf32>
    %58 = tpu.matmul %55, %56, %cst_35 {dimension_numbers = #tpu.dot_dimension_numbers<[1], [1], [0], [0], [0, 0, 1, 0], [], []>} : vector<16x128xbf16>, vector<128x128xbf16>, vector<16x128xf32> -> vector<16x128xf32>
    %c8_i32_36 = arith.constant 8 : i32
    %59 = vector.broadcast %c8_i32_36 : i32 to vector<16x128xi32>
    %60 = arith.cmpi slt, %10, %59 : vector<16x128xi32>
    %cst_37 = arith.constant -1.000000e+30 : f32
    %61 = vector.broadcast %cst_37 : f32 to vector<16x128xf32>
    %62 = arith.select %60, %58, %61 : vector<16x128xi1>, vector<16x128xf32>
    %cst_38 = arith.constant dense<0xFF800000> : vector<16xf32>
    %63 = vector.multi_reduction <maximumf>, %62, %cst_38 [1] : vector<16x128xf32> to vector<16xf32>
    %64 = vector.shape_cast %63 : vector<16xf32> to vector<16x1xf32>
    %65 = vector.broadcast %64 : vector<16x1xf32> to vector<16x128xf32>
    %66 = arith.subf %62, %65 : vector<16x128xf32>
    %67 = math.exp %66 : vector<16x128xf32>
    %cst_39 = arith.constant dense<0.000000e+00> : vector<16xf32>
    %68 = vector.multi_reduction <add>, %67, %cst_39 [1] : vector<16x128xf32> to vector<16xf32>
    %69 = vector.shape_cast %68 : vector<16xf32> to vector<16x1xf32>
    %70 = tpu.reciprocal %69 {approx = true} : vector<16x1xf32> -> vector<16x1xf32>
    %71 = vector.broadcast %70 : vector<16x1xf32> to vector<16x128xf32>
    %72 = arith.mulf %67, %71 : vector<16x128xf32>
    %73 = arith.truncf %72 : vector<16x128xf32> to vector<16x128xbf16>
    %cst_40 = arith.constant dense<0.000000e+00> : vector<16x128xf32>
    %74 = tpu.matmul %73, %57, %cst_40 {dimension_numbers = #tpu.dot_dimension_numbers<[1], [0], [0], [1], [0, 0, 1, 1], [], []>} : vector<16x128xbf16>, vector<128x128xbf16>, vector<16x128xf32> -> vector<16x128xf32>
    %75 = arith.truncf %74 : vector<16x128xf32> to vector<16x128xbf16>
    %c0_41 = arith.constant 0 : index
    %c256_42 = arith.constant 256 : index
    %76 = vector.load %arg11[%c0_41, %c256_42] : memref<16x1024xbf16, #tpu.memory_space<vmem>>, vector<16x128xbf16>
    tpu.vector_store %arg11[%c0_41, %c256_42], %75 {strides = array<i32>} : memref<16x1024xbf16, #tpu.memory_space<vmem>>, vector<16x128xbf16>,
    %c0_43 = arith.constant 0 : index
    %c384 = arith.constant 384 : index
    %77 = vector.load %arg10[%c0_43, %c384] : memref<16x1024xbf16, #tpu.memory_space<vmem>>, vector<16x128xbf16>
    %c0_44 = arith.constant 0 : index
    %c384_45 = arith.constant 384 : index
    %78 = vector.load %arg9[%c0_44, %c384_45] : memref<128x2048xbf16, #tpu.memory_space<vmem>>, vector<128x128xbf16>
    %c0_46 = arith.constant 0 : index
    %c1408 = arith.constant 1408 : index
    %79 = vector.load %arg9[%c0_46, %c1408] : memref<128x2048xbf16, #tpu.memory_space<vmem>>, vector<128x128xbf16>
    %cst_47 = arith.constant dense<0.000000e+00> : vector<16x128xf32>
    %80 = tpu.matmul %77, %78, %cst_47 {dimension_numbers = #tpu.dot_dimension_numbers<[1], [1], [0], [0], [0, 0, 1, 0], [], []>} : vector<16x128xbf16>, vector<128x128xbf16>, vector<16x128xf32> -> vector<16x128xf32>
    %c8_i32_48 = arith.constant 8 : i32
    %81 = vector.broadcast %c8_i32_48 : i32 to vector<16x128xi32>
    %82 = arith.cmpi slt, %10, %81 : vector<16x128xi32>
    %cst_49 = arith.constant -1.000000e+30 : f32
    %83 = vector.broadcast %cst_49 : f32 to vector<16x128xf32>
    %84 = arith.select %82, %80, %83 : vector<16x128xi1>, vector<16x128xf32>
    %cst_50 = arith.constant dense<0xFF800000> : vector<16xf32>
    %85 = vector.multi_reduction <maximumf>, %84, %cst_50 [1] : vector<16x128xf32> to vector<16xf32>
    %86 = vector.shape_cast %85 : vector<16xf32> to vector<16x1xf32>
    %87 = vector.broadcast %86 : vector<16x1xf32> to vector<16x128xf32>
    %88 = arith.subf %84, %87 : vector<16x128xf32>
    %89 = math.exp %88 : vector<16x128xf32>
    %cst_51 = arith.constant dense<0.000000e+00> : vector<16xf32>
    %90 = vector.multi_reduction <add>, %89, %cst_51 [1] : vector<16x128xf32> to vector<16xf32>
    %91 = vector.shape_cast %90 : vector<16xf32> to vector<16x1xf32>
    %92 = tpu.reciprocal %91 {approx = true} : vector<16x1xf32> -> vector<16x1xf32>
    %93 = vector.broadcast %92 : vector<16x1xf32> to vector<16x128xf32>
    %94 = arith.mulf %89, %93 : vector<16x128xf32>
    %95 = arith.truncf %94 : vector<16x128xf32> to vector<16x128xbf16>
    %cst_52 = arith.constant dense<0.000000e+00> : vector<16x128xf32>
    %96 = tpu.matmul %95, %79, %cst_52 {dimension_numbers = #tpu.dot_dimension_numbers<[1], [0], [0], [1], [0, 0, 1, 1], [], []>} : vector<16x128xbf16>, vector<128x128xbf16>, vector<16x128xf32> -> vector<16x128xf32>
    %97 = arith.truncf %96 : vector<16x128xf32> to vector<16x128xbf16>
    %c0_53 = arith.constant 0 : index
    %c384_54 = arith.constant 384 : index
    %98 = vector.load %arg11[%c0_53, %c384_54] : memref<16x1024xbf16, #tpu.memory_space<vmem>>, vector<16x128xbf16>
    tpu.vector_store %arg11[%c0_53, %c384_54], %97 {strides = array<i32>} : memref<16x1024xbf16, #tpu.memory_space<vmem>>, vector<16x128xbf16>,
    %c0_55 = arith.constant 0 : index
    %c512 = arith.constant 512 : index
    %99 = vector.load %arg10[%c0_55, %c512] : memref<16x1024xbf16, #tpu.memory_space<vmem>>, vector<16x128xbf16>
    %c0_56 = arith.constant 0 : index
    %c512_57 = arith.constant 512 : index
    %100 = vector.load %arg9[%c0_56, %c512_57] : memref<128x2048xbf16, #tpu.memory_space<vmem>>, vector<128x128xbf16>
    %c0_58 = arith.constant 0 : index
    %c1536 = arith.constant 1536 : index
    %101 = vector.load %arg9[%c0_58, %c1536] : memref<128x2048xbf16, #tpu.memory_space<vmem>>, vector<128x128xbf16>
    %cst_59 = arith.constant dense<0.000000e+00> : vector<16x128xf32>
    %102 = tpu.matmul %99, %100, %cst_59 {dimension_numbers = #tpu.dot_dimension_numbers<[1], [1], [0], [0], [0, 0, 1, 0], [], []>} : vector<16x128xbf16>, vector<128x128xbf16>, vector<16x128xf32> -> vector<16x128xf32>
    %c8_i32_60 = arith.constant 8 : i32
    %103 = vector.broadcast %c8_i32_60 : i32 to vector<16x128xi32>
    %104 = arith.cmpi slt, %10, %103 : vector<16x128xi32>
    %cst_61 = arith.constant -1.000000e+30 : f32
    %105 = vector.broadcast %cst_61 : f32 to vector<16x128xf32>
    %106 = arith.select %104, %102, %105 : vector<16x128xi1>, vector<16x128xf32>
    %cst_62 = arith.constant dense<0xFF800000> : vector<16xf32>
    %107 = vector.multi_reduction <maximumf>, %106, %cst_62 [1] : vector<16x128xf32> to vector<16xf32>
    %108 = vector.shape_cast %107 : vector<16xf32> to vector<16x1xf32>
    %109 = vector.broadcast %108 : vector<16x1xf32> to vector<16x128xf32>
    %110 = arith.subf %106, %109 : vector<16x128xf32>
    %111 = math.exp %110 : vector<16x128xf32>
    %cst_63 = arith.constant dense<0.000000e+00> : vector<16xf32>
    %112 = vector.multi_reduction <add>, %111, %cst_63 [1] : vector<16x128xf32> to vector<16xf32>
    %113 = vector.shape_cast %112 : vector<16xf32> to vector<16x1xf32>
    %114 = tpu.reciprocal %113 {approx = true} : vector<16x1xf32> -> vector<16x1xf32>
    %115 = vector.broadcast %114 : vector<16x1xf32> to vector<16x128xf32>
    %116 = arith.mulf %111, %115 : vector<16x128xf32>
    %117 = arith.truncf %116 : vector<16x128xf32> to vector<16x128xbf16>
    %cst_64 = arith.constant dense<0.000000e+00> : vector<16x128xf32>
    %118 = tpu.matmul %117, %101, %cst_64 {dimension_numbers = #tpu.dot_dimension_numbers<[1], [0], [0], [1], [0, 0, 1, 1], [], []>} : vector<16x128xbf16>, vector<128x128xbf16>, vector<16x128xf32> -> vector<16x128xf32>
    %119 = arith.truncf %118 : vector<16x128xf32> to vector<16x128xbf16>
    %c0_65 = arith.constant 0 : index
    %c512_66 = arith.constant 512 : index
    %120 = vector.load %arg11[%c0_65, %c512_66] : memref<16x1024xbf16, #tpu.memory_space<vmem>>, vector<16x128xbf16>
    tpu.vector_store %arg11[%c0_65, %c512_66], %119 {strides = array<i32>} : memref<16x1024xbf16, #tpu.memory_space<vmem>>, vector<16x128xbf16>,
    %c0_67 = arith.constant 0 : index
    %c640 = arith.constant 640 : index
    %121 = vector.load %arg10[%c0_67, %c640] : memref<16x1024xbf16, #tpu.memory_space<vmem>>, vector<16x128xbf16>
    %c0_68 = arith.constant 0 : index
    %c640_69 = arith.constant 640 : index
    %122 = vector.load %arg9[%c0_68, %c640_69] : memref<128x2048xbf16, #tpu.memory_space<vmem>>, vector<128x128xbf16>
    %c0_70 = arith.constant 0 : index
    %c1664 = arith.constant 1664 : index
    %123 = vector.load %arg9[%c0_70, %c1664] : memref<128x2048xbf16, #tpu.memory_space<vmem>>, vector<128x128xbf16>
    %cst_71 = arith.constant dense<0.000000e+00> : vector<16x128xf32>
    %124 = tpu.matmul %121, %122, %cst_71 {dimension_numbers = #tpu.dot_dimension_numbers<[1], [1], [0], [0], [0, 0, 1, 0], [], []>} : vector<16x128xbf16>, vector<128x128xbf16>, vector<16x128xf32> -> vector<16x128xf32>
    %c8_i32_72 = arith.constant 8 : i32
    %125 = vector.broadcast %c8_i32_72 : i32 to vector<16x128xi32>
    %126 = arith.cmpi slt, %10, %125 : vector<16x128xi32>
    %cst_73 = arith.constant -1.000000e+30 : f32
    %127 = vector.broadcast %cst_73 : f32 to vector<16x128xf32>
    %128 = arith.select %126, %124, %127 : vector<16x128xi1>, vector<16x128xf32>
    %cst_74 = arith.constant dense<0xFF800000> : vector<16xf32>
    %129 = vector.multi_reduction <maximumf>, %128, %cst_74 [1] : vector<16x128xf32> to vector<16xf32>
    %130 = vector.shape_cast %129 : vector<16xf32> to vector<16x1xf32>
    %131 = vector.broadcast %130 : vector<16x1xf32> to vector<16x128xf32>
    %132 = arith.subf %128, %131 : vector<16x128xf32>
    %133 = math.exp %132 : vector<16x128xf32>
    %cst_75 = arith.constant dense<0.000000e+00> : vector<16xf32>
    %134 = vector.multi_reduction <add>, %133, %cst_75 [1] : vector<16x128xf32> to vector<16xf32>
    %135 = vector.shape_cast %134 : vector<16xf32> to vector<16x1xf32>
    %136 = tpu.reciprocal %135 {approx = true} : vector<16x1xf32> -> vector<16x1xf32>
    %137 = vector.broadcast %136 : vector<16x1xf32> to vector<16x128xf32>
    %138 = arith.mulf %133, %137 : vector<16x128xf32>
    %139 = arith.truncf %138 : vector<16x128xf32> to vector<16x128xbf16>
    %cst_76 = arith.constant dense<0.000000e+00> : vector<16x128xf32>
    %140 = tpu.matmul %139, %123, %cst_76 {dimension_numbers = #tpu.dot_dimension_numbers<[1], [0], [0], [1], [0, 0, 1, 1], [], []>} : vector<16x128xbf16>, vector<128x128xbf16>, vector<16x128xf32> -> vector<16x128xf32>
    %141 = arith.truncf %140 : vector<16x128xf32> to vector<16x128xbf16>
    %c0_77 = arith.constant 0 : index
    %c640_78 = arith.constant 640 : index
    %142 = vector.load %arg11[%c0_77, %c640_78] : memref<16x1024xbf16, #tpu.memory_space<vmem>>, vector<16x128xbf16>
    tpu.vector_store %arg11[%c0_77, %c640_78], %141 {strides = array<i32>} : memref<16x1024xbf16, #tpu.memory_space<vmem>>, vector<16x128xbf16>,
    %c0_79 = arith.constant 0 : index
    %c768 = arith.constant 768 : index
    %143 = vector.load %arg10[%c0_79, %c768] : memref<16x1024xbf16, #tpu.memory_space<vmem>>, vector<16x128xbf16>
    %c0_80 = arith.constant 0 : index
    %c768_81 = arith.constant 768 : index
    %144 = vector.load %arg9[%c0_80, %c768_81] : memref<128x2048xbf16, #tpu.memory_space<vmem>>, vector<128x128xbf16>
    %c0_82 = arith.constant 0 : index
    %c1792 = arith.constant 1792 : index
    %145 = vector.load %arg9[%c0_82, %c1792] : memref<128x2048xbf16, #tpu.memory_space<vmem>>, vector<128x128xbf16>
    %cst_83 = arith.constant dense<0.000000e+00> : vector<16x128xf32>
    %146 = tpu.matmul %143, %144, %cst_83 {dimension_numbers = #tpu.dot_dimension_numbers<[1], [1], [0], [0], [0, 0, 1, 0], [], []>} : vector<16x128xbf16>, vector<128x128xbf16>, vector<16x128xf32> -> vector<16x128xf32>
    %c8_i32_84 = arith.constant 8 : i32
    %147 = vector.broadcast %c8_i32_84 : i32 to vector<16x128xi32>
    %148 = arith.cmpi slt, %10, %147 : vector<16x128xi32>
    %cst_85 = arith.constant -1.000000e+30 : f32
    %149 = vector.broadcast %cst_85 : f32 to vector<16x128xf32>
    %150 = arith.select %148, %146, %149 : vector<16x128xi1>, vector<16x128xf32>
    %cst_86 = arith.constant dense<0xFF800000> : vector<16xf32>
    %151 = vector.multi_reduction <maximumf>, %150, %cst_86 [1] : vector<16x128xf32> to vector<16xf32>
    %152 = vector.shape_cast %151 : vector<16xf32> to vector<16x1xf32>
    %153 = vector.broadcast %152 : vector<16x1xf32> to vector<16x128xf32>
    %154 = arith.subf %150, %153 : vector<16x128xf32>
    %155 = math.exp %154 : vector<16x128xf32>
    %cst_87 = arith.constant dense<0.000000e+00> : vector<16xf32>
    %156 = vector.multi_reduction <add>, %155, %cst_87 [1] : vector<16x128xf32> to vector<16xf32>
    %157 = vector.shape_cast %156 : vector<16xf32> to vector<16x1xf32>
    %158 = tpu.reciprocal %157 {approx = true} : vector<16x1xf32> -> vector<16x1xf32>
    %159 = vector.broadcast %158 : vector<16x1xf32> to vector<16x128xf32>
    %160 = arith.mulf %155, %159 : vector<16x128xf32>
    %161 = arith.truncf %160 : vector<16x128xf32> to vector<16x128xbf16>
    %cst_88 = arith.constant dense<0.000000e+00> : vector<16x128xf32>
    %162 = tpu.matmul %161, %145, %cst_88 {dimension_numbers = #tpu.dot_dimension_numbers<[1], [0], [0], [1], [0, 0, 1, 1], [], []>} : vector<16x128xbf16>, vector<128x128xbf16>, vector<16x128xf32> -> vector<16x128xf32>
    %163 = arith.truncf %162 : vector<16x128xf32> to vector<16x128xbf16>
    %c0_89 = arith.constant 0 : index
    %c768_90 = arith.constant 768 : index
    %164 = vector.load %arg11[%c0_89, %c768_90] : memref<16x1024xbf16, #tpu.memory_space<vmem>>, vector<16x128xbf16>
    tpu.vector_store %arg11[%c0_89, %c768_90], %163 {strides = array<i32>} : memref<16x1024xbf16, #tpu.memory_space<vmem>>, vector<16x128xbf16>,
    %c0_91 = arith.constant 0 : index
    %c896 = arith.constant 896 : index
    %165 = vector.load %arg10[%c0_91, %c896] : memref<16x1024xbf16, #tpu.memory_space<vmem>>, vector<16x128xbf16>
    %c0_92 = arith.constant 0 : index
    %c896_93 = arith.constant 896 : index
    %166 = vector.load %arg9[%c0_92, %c896_93] : memref<128x2048xbf16, #tpu.memory_space<vmem>>, vector<128x128xbf16>
    %c0_94 = arith.constant 0 : index
    %c1920 = arith.constant 1920 : index
    %167 = vector.load %arg9[%c0_94, %c1920] : memref<128x2048xbf16, #tpu.memory_space<vmem>>, vector<128x128xbf16>
    %cst_95 = arith.constant dense<0.000000e+00> : vector<16x128xf32>
    %168 = tpu.matmul %165, %166, %cst_95 {dimension_numbers = #tpu.dot_dimension_numbers<[1], [1], [0], [0], [0, 0, 1, 0], [], []>} : vector<16x128xbf16>, vector<128x128xbf16>, vector<16x128xf32> -> vector<16x128xf32>
    %c8_i32_96 = arith.constant 8 : i32
    %169 = vector.broadcast %c8_i32_96 : i32 to vector<16x128xi32>
    %170 = arith.cmpi slt, %10, %169 : vector<16x128xi32>
    %cst_97 = arith.constant -1.000000e+30 : f32
    %171 = vector.broadcast %cst_97 : f32 to vector<16x128xf32>
    %172 = arith.select %170, %168, %171 : vector<16x128xi1>, vector<16x128xf32>
    %cst_98 = arith.constant dense<0xFF800000> : vector<16xf32>
    %173 = vector.multi_reduction <maximumf>, %172, %cst_98 [1] : vector<16x128xf32> to vector<16xf32>
    %174 = vector.shape_cast %173 : vector<16xf32> to vector<16x1xf32>
    %175 = vector.broadcast %174 : vector<16x1xf32> to vector<16x128xf32>
    %176 = arith.subf %172, %175 : vector<16x128xf32>
    %177 = math.exp %176 : vector<16x128xf32>
    %cst_99 = arith.constant dense<0.000000e+00> : vector<16xf32>
    %178 = vector.multi_reduction <add>, %177, %cst_99 [1] : vector<16x128xf32> to vector<16xf32>
    %179 = vector.shape_cast %178 : vector<16xf32> to vector<16x1xf32>
    %180 = tpu.reciprocal %179 {approx = true} : vector<16x1xf32> -> vector<16x1xf32>
    %181 = vector.broadcast %180 : vector<16x1xf32> to vector<16x128xf32>
    %182 = arith.mulf %177, %181 : vector<16x128xf32>
    %183 = arith.truncf %182 : vector<16x128xf32> to vector<16x128xbf16>
    %cst_100 = arith.constant dense<0.000000e+00> : vector<16x128xf32>
    %184 = tpu.matmul %183, %167, %cst_100 {dimension_numbers = #tpu.dot_dimension_numbers<[1], [0], [0], [1], [0, 0, 1, 1], [], []>} : vector<16x128xbf16>, vector<128x128xbf16>, vector<16x128xf32> -> vector<16x128xf32>
    %185 = arith.truncf %184 : vector<16x128xf32> to vector<16x128xbf16>
    %c0_101 = arith.constant 0 : index
    %c896_102 = arith.constant 896 : index
    %186 = vector.load %arg11[%c0_101, %c896_102] : memref<16x1024xbf16, #tpu.memory_space<vmem>>, vector<16x128xbf16>
    tpu.vector_store %arg11[%c0_101, %c896_102], %185 {strides = array<i32>} : memref<16x1024xbf16, #tpu.memory_space<vmem>>, vector<16x128xbf16>,
    %c0_103 = arith.constant 0 : index
    %c0_104 = arith.constant 0 : index
    %187 = vector.load %arg11[%c0_103, %c0_104] : memref<16x1024xbf16, #tpu.memory_space<vmem>>, vector<16x1024xbf16>
    %c0_105 = arith.constant 0 : index
    %c0_106 = arith.constant 0 : index
    %188 = vector.load %arg6[%c0_105, %c0_106] : memref<1024x64xbf16, #tpu.memory_space<vmem>>, vector<1024x64xbf16>
    %cst_107 = arith.constant dense<0.000000e+00> : vector<16x64xf32>
    %189 = tpu.matmul %187, %188, %cst_107 {dimension_numbers = #tpu.dot_dimension_numbers<[1], [0], [0], [1], [0, 0, 1, 1], [], []>} : vector<16x1024xbf16>, vector<1024x64xbf16>, vector<16x64xf32> -> vector<16x64xf32>
    %c0_108 = arith.constant 0 : index
    %c0_109 = arith.constant 0 : index
    %190 = vector.load %arg7[%c0_108, %c0_109] : memref<1x64xf32, #tpu.memory_space<vmem>>, vector<1x64xf32>
    %191 = vector.broadcast %190 : vector<1x64xf32> to vector<16x64xf32>
    %192 = arith.addf %189, %191 : vector<16x64xf32>
    %c0_110 = arith.constant 0 : index
    %c0_111 = arith.constant 0 : index
    %c0_112 = arith.constant 0 : index
    %193 = vector.load %arg8[%c0_110, %c0_111, %c0_112] : memref<1x16x64xf32, #tpu.memory_space<vmem>>, vector<1x16x64xf32>
    %194 = vector.shape_cast %193 : vector<1x16x64xf32> to vector<16x64xf32>
    %195 = vector.shape_cast %192 : vector<16x64xf32> to vector<1x16x64xf32>
    tpu.vector_store %arg8[%c0_110, %c0_111, %c0_112], %195 {strides = array<i32>} : memref<1x16x64xf32, #tpu.memory_space<vmem>>, vector<1x16x64xf32>,
    return
  }
  func.func @transform_0(%arg0: i32, %arg1: i32) -> (i32, i32, i32) {
    %c0_i32 = arith.constant 0 : i32
    %c0_i32_0 = arith.constant 0 : i32
    return %arg0, %arg1, %c0_i32 : i32, i32, i32
  }
  func.func @transform_1(%arg0: i32, %arg1: i32) -> (i32, i32, i32) {
    %c0_i32 = arith.constant 0 : i32
    %c0_i32_0 = arith.constant 0 : i32
    %c0_i32_1 = arith.constant 0 : i32
    return %arg0, %c0_i32, %c0_i32_0 : i32, i32, i32
  }
  func.func @transform_2(%arg0: i32, %arg1: i32) -> (i32, i32) {
    %c0_i32 = arith.constant 0 : i32
    %c0_i32_0 = arith.constant 0 : i32
    %c0_i32_1 = arith.constant 0 : i32
    return %c0_i32, %c0_i32_0 : i32, i32
  }
  func.func @transform_3(%arg0: i32, %arg1: i32) -> (i32, i32) {
    %c0_i32 = arith.constant 0 : i32
    %c0_i32_0 = arith.constant 0 : i32
    %c0_i32_1 = arith.constant 0 : i32
    return %c0_i32, %c0_i32_0 : i32, i32
  }
  func.func @transform_4(%arg0: i32, %arg1: i32) -> (i32, i32) {
    %c0_i32 = arith.constant 0 : i32
    %c0_i32_0 = arith.constant 0 : i32
    %c0_i32_1 = arith.constant 0 : i32
    return %c0_i32, %c0_i32_0 : i32, i32
  }
  func.func @transform_5(%arg0: i32, %arg1: i32) -> (i32, i32) {
    %c0_i32 = arith.constant 0 : i32
    %c0_i32_0 = arith.constant 0 : i32
    %c0_i32_1 = arith.constant 0 : i32
    return %c0_i32, %c0_i32_0 : i32, i32
  }
  func.func @transform_6(%arg0: i32, %arg1: i32) -> (i32, i32, i32) {
    %c0_i32 = arith.constant 0 : i32
    %c0_i32_0 = arith.constant 0 : i32
    return %arg0, %arg1, %c0_i32 : i32, i32, i32
  }
}

</mosaic_0001>

<bundles_post_ra>
// kernel: tpu_custom_call.1
= control target key start
LH: loop header
LB: loop body
LE: loop exit
PB: predicated region body
PF: predicated region fallthrough
CT: control target
= control target key end

     0   :  { %s7413_s0 = inlined_call_operand.hbm [shape: f32[2,16,64], index: 0, kind: input, shape index: {}]   ;;  %s7414_s1 = inlined_call_operand.hbm [shape: f32[2,128,32], index: 1, kind: input, shape index: {}]   ;;  %s7415_s2 = inlined_call_operand.hbm [shape: bf16[64,1024], index: 2, kind: input, shape index: {}]   ;;  %s7416_s3 = inlined_call_operand.hbm [shape: bf16[32,2048], index: 3, kind: input, shape index: {}]   ;;  %s7417_s4 = inlined_call_operand.hbm [shape: bf16[1024,64], index: 4, kind: input, shape index: {}]   ;;  %s7418_s5 = inlined_call_operand.hbm [shape: f32[1,64], index: 5, kind: input, shape index: {}]   ;;  %s7419_s6 = inlined_call_operand.hbm [shape: f32[2,16,64], index: 6, kind: output, shape index: {}]  }
   0x1   :  { %7593 = sst [smem:[#allocation190_spill]] %s7413_s0 }
   0x2   :  { %7594 = sst [smem:[#allocation191_spill]] %s7415_s2 }
   0x3   :  { %7595 = sst [smem:[#allocation192_spill]] %s7416_s3 }
   0x4   :  { %7596 = sst [smem:[#allocation193_spill]] %s7419_s6 }
   0x5   :  { %11 = vsyncpa [#allocation6], 0 }
   0x6   :  { %13 = vsyncpa [#allocation6 + $0x1], 0 }
   0x7   :  { %14 = vsyncpa [#allocation9], 0 }
   0x8   :  { %16 = vsyncpa [#allocation9 + $0x1], 0 }
   0x9   :  { %17 = vsyncpa [#allocation12], 0 }
   0xa   :  { %18 = vsyncpa [#allocation15], 0 }
   0xb   :  { %19 = vsyncpa [#allocation7], 0 }
   0xc   :  { %21 = vsyncpa [#allocation7 + $0x1], 0  ;;  %s5368_s21 = smov 0   ;;  %s5370_s22 = smov 0  }
   0xd   :  { %s5372_s23 = smov 0   ;;  %s5374_s24 = smov 0  }
   0xe   :  { %s5376_s25 = smov 0   ;;  %s5378_s26 = smov 0  }
   0xf LB: > { %7597 = sst [smem:[#allocation23_spill]] %s5292_s21  ;;  %s5399_s27 = sadd.s32 4294967295, %s5312_s26   ;;  %s5312_s26 = sphi %s5378_s26, %s27_s26   ;;  %s5308_s25 = sphi %s5376_s25, %s8074_s25   ;;  %s5304_s24 = sphi %s5374_s24, %s8073_s24   ;;  %s5300_s23 = sphi %s5372_s23, %s8072_s23   ;;  %s5296_s22 = sphi %s5370_s22, %s8071_s22   ;;  %s5292_s21 = sphi %s5368_s21, %s8070_s21  }
  0x10   : > { %s4016_s28 = sadd.s32 4294967294, %s5312_s26   ;;  %p61_p0 = scmp.ne.s32.totalorder %s5296_s22, %s5292_s21 }
  0x11   : > { %p7420_p1 = scmp.eq.s32.totalorder %s5399_s27, 0  ;;  %p203_p3 = scmp.eq.s32.totalorder %s4016_s28, 1 }
  0x12   : > { %p4017_p5 = scmp.ge.s32.totalorder %s5312_s26, 1  ;;  %p210_p7 = scmp.lt.s32.totalorder %s5312_s26, 3 }
  0x13   : > { %p5408_p4 = por %p7420_p1, %p61_p0  ;;  %p5413_p6 = por %p203_p3, %p61_p0 }
  0x14   : > { %p5418_p8 = pnand %p4017_p5, %p210_p7  ;;  %s5314_s8 = smov [#allocation10]  }
  0x15   : > { %s7598_s29 = scalar_select %p5408_p4, 1, 0 }
  0x16   : > { %s7599_s30 = scalar_select %p5413_p6, 1, 0 }
  0x17   : > { %s7601_s7 = scalar_select %p5418_p8, 1, 0 }
  0x18   : > { %7600 = sst [smem:[#allocation24_spill]] %s7599_s30  ;;  %s222_s9 = sshll.u32 %s5314_s8, 4  ;;  %s5422_s9 = int_to_ptr.vmem [resolvable:$true] %s222_s9 }
  0x19   : > { %p4816_p9 = pneg %p5418_p8  ;;  %s5315_s11 = smov [#allocation11]  }
  0x1a   : > { %s235_s12 = sshll.u32 %s5315_s11, 4  ;;  %s7603_s2 = sld [smem:[#allocation191_spill]]  ;;  %s5433_s12 = int_to_ptr.vmem [resolvable:$true] %s235_s12 }
  0x1b   : > { %p5429_p11 = pnand %p4816_p9, %p7420_p1 }
  0x1d   : > { %p5443_p13 = pneg %p5429_p11 }
  0x20   : > { %s5042_s15 = scalar_lea.hbm %s7603_s2, 4096 }
  0x21   : > { %p5043_p12 = scmp.ne.s32.totalorder %s7603_s2, %s5042_s15  ;;  %p5049_p5 = scmp.lt.u32.totalorder %s5042_s15, %s7603_s2 }
  0x23   : > { %p5045_p0 = pnand %p5443_p13, %p5043_p12 }
  0x25   : > { %p5046_p3 = pneg %p5045_p0 }
  0x27   : > { %p5051_p7 = pnand %p5049_p5, %p5046_p3 }
  0x29   : > { %5054 = shalt.err (!%p5051_p7)
}
  0x2a   : > { %s5055_s28 = scalar_lea.vmem %s5422_s9, 4096  ;;  %p5063_p2 = scmp.lt.s32.totalorder %s5422_s9, %s5422_s9 }
  0x2b   : > { %p5056_p9 = scmp.ne.s32.totalorder %s5422_s9, %s5055_s28  ;;  %p5064_p6 = scmp.lt.s32.totalorder %s5055_s28, %s5055_s28 }
  0x2d   : > { %p5058_p10 = pnand %p5056_p9, %p5443_p13  ;;  %p5065_p12 = por %p5064_p6, %p5063_p2 }
  0x2f   : > { %p5059_p1 = pneg %p5058_p10 }
  0x31   : > { %p5066_p0 = pnand %p5065_p12, %p5059_p1 }
  0x33   : > { %5069 = shalt.err (!%p5066_p0)
}
  0x34   : > { %s5316_s8 = smov 512   ;;  %s5317_s11 = smov 32  }
  0x35   : > { %4819 = dma.hbm_to_vmem [thread:$0]  (!%p5429_p11), %s7603_s2, 4096, %s5422_s9, [#allocation9], %s5316_s8, %s5316_s8, %s5317_s11  }
  0x36   : > { %s7605_s3 = sld [smem:[#allocation192_spill]] }
  0x3c   : > { %s5070_s17 = scalar_lea.hbm %s7605_s3, 4096 }
  0x3d   : > { %p5071_p2 = scmp.ne.s32.totalorder %s7605_s3, %s5070_s17  ;;  %p5077_p10 = scmp.lt.u32.totalorder %s5070_s17, %s7605_s3 }
  0x3f   : > { %p5073_p1 = pnand %p5071_p2, %p5443_p13 }
  0x41   : > { %p5074_p6 = pneg %p5073_p1 }
  0x43   : > { %p5079_p3 = pnand %p5077_p10, %p5074_p6 }
  0x45   : > { %5082 = shalt.err (!%p5079_p3)
}
  0x46   : > { %s5083_s9 = scalar_lea.vmem %s5433_s12, 4096  ;;  %p5091_p12 = scmp.lt.s32.totalorder %s5433_s12, %s5433_s12 }
  0x47   : > { %p5084_p5 = scmp.ne.s32.totalorder %s5433_s12, %s5083_s9  ;;  %p5092_p0 = scmp.lt.s32.totalorder %s5083_s9, %s5083_s9 }
  0x49   : > { %p5086_p7 = pnand %p5084_p5, %p5443_p13  ;;  %p5093_p2 = por %p5092_p0, %p5091_p12 }
  0x4b   : > { %p5087_p9 = pneg %p5086_p7 }
  0x4d   : > { %p5094_p1 = pnand %p5093_p2, %p5087_p9 }
  0x4f   : > { %5097 = shalt.err (!%p5094_p1)
}
  0x50   : > { %s5318_s8 = smov 1024   ;;  %s5319_s30 = smov 64  }
  0x51   : > { %4822 = dma.hbm_to_vmem [thread:$0]  (!%p5429_p11), %s7605_s3, 4096, %s5433_s12, [#allocation12], %s5318_s8, %s5318_s8, %s5319_s30  }
  0x52   : > { %s5320_s14 = smov [#allocation13]   ;;  %s5321_s16 = smov [#allocation14]  }
  0x53   : > { %s248_s15 = sshll.u32 %s5320_s14, 4  ;;  %s262_s17 = sshll.u32 %s5321_s16, 4  ;;  %s249_s15 = int_to_ptr.vmem [resolvable:$true] %s248_s15  ;;  %s263_s17 = int_to_ptr.vmem [resolvable:$true] %s262_s17 }
  0x54   : > { %s5098_s28 = scalar_lea.hbm %s7417_s4, 8192 }
  0x55   : > { %p5099_p6 = scmp.ne.s32.totalorder %s7417_s4, %s5098_s28  ;;  %p5105_p5 = scmp.lt.u32.totalorder %s5098_s28, %s7417_s4 }
  0x57   : > { %p5101_p10 = pnand %p5099_p6, %p5443_p13 }
  0x59   : > { %p5102_p3 = pneg %p5101_p10 }
  0x5b   : > { %p5107_p7 = pnand %p5105_p5, %p5102_p3 }
  0x5d   : > { %5110 = shalt.err (!%p5107_p7)
}
  0x5e   : > { %s5111_s12 = scalar_lea.vmem %s249_s15, 8192  ;;  %p5119_p2 = scmp.lt.s32.totalorder %s249_s15, %s249_s15 }
  0x5f   : > { %p5112_p9 = scmp.ne.s32.totalorder %s249_s15, %s5111_s12  ;;  %p5120_p1 = scmp.lt.s32.totalorder %s5111_s12, %s5111_s12 }
  0x61   : > { %p5114_p12 = pnand %p5112_p9, %p5443_p13  ;;  %p5121_p4 = por %p5120_p1, %p5119_p2 }
  0x63   : > { %p5115_p0 = pneg %p5114_p12 }
  0x65   : > { %p5122_p8 = pnand %p5121_p4, %p5115_p0 }
  0x67   : > { %5125 = shalt.err (!%p5122_p8)
}
  0x68   : > { %s5322_s2 = smov 4   ;;  %s5126_s13 = scalar_lea.hbm %s7418_s5, 16 }
  0x69   : > { %4825 = dma.hbm_to_vmem [thread:$0]  (!%p5429_p11), %s7417_s4, 8192, %s249_s15, [#allocation12], %s5319_s30, %s5319_s30, %s5322_s2  }
  0x6a   : > { %p5127_p6 = scmp.ne.s32.totalorder %s7418_s5, %s5126_s13  ;;  %p5133_p10 = scmp.lt.u32.totalorder %s5126_s13, %s7418_s5 }
  0x6c   : > { %p5129_p4 = pnand %p5127_p6, %p5443_p13 }
  0x6e   : > { %p5130_p8 = pneg %p5129_p4 }
  0x70   : > { %p5135_p3 = pnand %p5133_p10, %p5130_p8 }
  0x72   : > { %5138 = shalt.err (!%p5135_p3)
}
  0x73   : > { %s5139_s28 = scalar_lea.vmem %s263_s17, 16  ;;  %s5146_s30 = scalar_lea.vmem %s263_s17, 32 }
  0x74   : > { %p5140_p5 = scmp.ne.s32.totalorder %s263_s17, %s5139_s28  ;;  %p5147_p12 = scmp.lt.s32.totalorder %s263_s17, %s263_s17 }
  0x75   : > { %p5148_p0 = scmp.lt.s32.totalorder %s5146_s30, %s5139_s28 }
  0x76   : > { %p5142_p7 = pnand %p5140_p5, %p5443_p13 }
  0x77   : > { %p5149_p2 = por %p5148_p0, %p5147_p12 }
  0x78   : > { %p5143_p9 = pneg %p5142_p7 }
  0x7a   : > { %p5150_p1 = pnand %p5149_p2, %p5143_p9 }
  0x7c   : > { %5153 = shalt.err (!%p5150_p1)
}
  0x7d   : > { %4828 = dma.hbm_to_vmem [thread:$0]  (!%p5429_p11), %s7418_s5, 16, %s263_s17, [#allocation15]  }
  0x7e   : > { %s48_s18 = sadd.s32 1, %s5300_s23  ;;  %s39_s12 = sadd.s32 1, %s5308_s25 }
  0x7f   : > { %p55_p13 = scmp.ne.s32.totalorder %s5300_s23, %s5296_s22  ;;  %p41_p6 = scmp.ge.s32.totalorder %s39_s12, 2 }
  0x80   : > { %p56_p4 = scmp.eq.s32.totalorder %s5312_s26, 0  ;;  %p7606_p8 = scmp.eq.s32.totalorder %s5399_s27, 1 }
  0x81   : > { %p4844_p3 = scmp.lt.s32.totalorder %s5312_s26, 2  ;;  %s8076_s12 = smov (%p41_p6, %s39_s12), 0 }
  0x82   : > { %p5530_p10 = por %p7606_p8, %p55_p13  ;;  %p57_p5 = por %p56_p4, %p55_p13 }
  0x83   : > { %s5538_s2 = sand.u32 1, %s5300_s23   ;;  %s43_s17 = ssub.s32 %s5308_s25, %s8076_s12 }
  0x84   : > { %p46_p11 = scmp.eq.s32.totalorder %s43_s17, 0  ;;  %s4023_s8 = sshll.u32 %s5538_s2, 4 }
  0x85   : > { %s4239_s11 = sshll.u32 %s5308_s25, 8  ;;  %s7608_s0 = sld [smem:[#allocation190_spill]] }
  0x86   : > { %s5545_s6 = scalar_select %p46_p11, %s5300_s23, %s48_s18  }
  0x87   : > { %s277_s16 = scalar_lea.vmem [#allocation5], %s4023_s8  ;;  %p5556_p7 = pnand %p4844_p3, %p57_p5 }
  0x88   : > { %s286_s19 = sshll.u32 %s277_s16, 4  ;;  %s296_s28 = sand.u32 1, %s5312_s26   ;;  %s5552_s19 = int_to_ptr.vmem [resolvable:$true] %s286_s19 }
  0x89   : > { %s274_s30 = scalar_lea.sflag [#allocation6], %s5538_s2  ;;  %p5156_p12 = pneg %p5556_p7 }
  0x8b   : > { %s5550_s14 = scalar_lea.hbm %s7608_s0, %s4239_s11  ;;  %s5159_s17 = scalar_lea.hbm %s7608_s0, 512 }
  0x8c   : > { %s5154_s15 = scalar_lea.hbm %s5550_s14, 256  ;;  %p5160_p1 = scmp.lt.u32.totalorder %s5550_s14, %s7608_s0 }
  0x8d   : > { %p5155_p9 = scmp.ne.s32.totalorder %s5550_s14, %s5154_s15  ;;  %p5161_p13 = scmp.lt.u32.totalorder %s5159_s17, %s5154_s15 }
  0x8e   : > { %p5163_p4 = scmp.lt.u32.totalorder %s5154_s15, %s5550_s14 }
  0x8f   : > { %p5157_p0 = pnand %p5156_p12, %p5155_p9  ;;  %p5162_p6 = por %p5161_p13, %p5160_p1 }
  0x91   : > { %p5158_p2 = pneg %p5157_p0  ;;  %p5164_p8 = por %p5163_p4, %p5162_p6 }
  0x93   : > { %p5165_p3 = pnand %p5164_p8, %p5158_p2 }
  0x95   : > { %5168 = shalt.err (!%p5165_p3)
}
  0x96   : > { %s5169_s21 = scalar_lea.vmem %s5552_s19, 256  ;;  %s5323_s13 = smov [#allocation5]  }
  0x97   : > { %p5170_p5 = scmp.ne.s32.totalorder %s5552_s19, %s5169_s21  ;;  %s5174_s16 = sshll.u32 %s5323_s13, 4  ;;  %s5175_s16 = int_to_ptr.vmem [resolvable:$false] %s5174_s16 }
  0x98   : > { %s5176_s9 = scalar_lea.vmem %s5175_s16, 512  ;;  %p5177_p0 = scmp.lt.s32.totalorder %s5552_s19, %s5175_s16 }
  0x99   : > { %p5172_p11 = pnand %p5170_p5, %p5156_p12  ;;  %p5178_p1 = scmp.lt.s32.totalorder %s5176_s9, %s5169_s21 }
  0x9b   : > { %p5173_p9 = pneg %p5172_p11  ;;  %p5179_p13 = por %p5178_p1, %p5177_p0 }
  0x9d   : > { %p5180_p6 = pnand %p5179_p13, %p5173_p9 }
  0x9f   : > { %5183 = shalt.err (!%p5180_p6)
}
  0xa0   : > { %s5324_s15 = smov 128   ;;  %s5325_s18 = smov 8  }
  0xa1   : > { %4832 = dma.hbm_to_vmem [thread:$0]  (!%p5556_p7), %s5550_s14, 256, %s5552_s19, %s274_s30, %s5324_s15, %s5324_s15, %s5325_s18  }
  0xa2   : > { %s4026_s17 = sshll.u32 %s5538_s2, 7  ;;  %s4240_s8 = sshll.u32 %s5308_s25, 11 }
  0xa3   : > { %s5597_s13 = scalar_lea.hbm %s7414_s1, %s4240_s8  ;;  %s300_s16 = scalar_lea.vmem [#allocation8], %s4026_s17 }
  0xa4   : > { %s307_s9 = sshll.u32 %s300_s16, 4  ;;  %s5603_s0 = scalar_lea.sflag [#allocation9], %s296_s28  ;;  %s5599_s9 = int_to_ptr.vmem [resolvable:$true] %s307_s9 }
  0xa5   : > { %s5184_s3 = scalar_lea.hbm %s5597_s13, 2048  ;;  %s5189_s19 = scalar_lea.hbm %s7414_s1, 4096 }
  0xa6   : > { %p5185_p2 = scmp.ne.s32.totalorder %s5597_s13, %s5184_s3  ;;  %p5190_p3 = scmp.lt.u32.totalorder %s5597_s13, %s7414_s1 }
  0xa7   : > { %p5191_p5 = scmp.lt.u32.totalorder %s5189_s19, %s5184_s3  ;;  %p5193_p9 = scmp.lt.u32.totalorder %s5184_s3, %s5597_s13 }
  0xa8   : > { %p5187_p4 = pnand %p5185_p2, %p5156_p12 }
  0xa9   : > { %p5192_p11 = por %p5191_p5, %p5190_p3 }
  0xaa   : > { %p5188_p8 = pneg %p5187_p4 }
  0xab   : > { %p5194_p0 = por %p5193_p9, %p5192_p11 }
  0xad   : > { %p5195_p1 = pnand %p5194_p0, %p5188_p8 }
  0xaf   : > { %5198 = shalt.err (!%p5195_p1)
}
  0xb0   : > { %s5199_s28 = scalar_lea.vmem %s5599_s9, 2048  ;;  %s5326_s17 = smov [#allocation8]  }
  0xb1   : > { %p5200_p13 = scmp.ne.s32.totalorder %s5599_s9, %s5199_s28  ;;  %s5204_s11 = sshll.u32 %s5326_s17, 4  ;;  %s5205_s11 = int_to_ptr.vmem [resolvable:$false] %s5204_s11 }
  0xb2   : > { %s5206_s21 = scalar_lea.vmem %s5205_s11, 4096  ;;  %p5207_p4 = scmp.lt.s32.totalorder %s5599_s9, %s5205_s11 }
  0xb3   : > { %p5202_p6 = pnand %p5200_p13, %p5156_p12  ;;  %p5208_p3 = scmp.lt.s32.totalorder %s5206_s21, %s5199_s28 }
  0xb5   : > { %p5203_p2 = pneg %p5202_p6  ;;  %p5209_p5 = por %p5208_p3, %p5207_p4 }
  0xb7   : > { %p5210_p11 = pnand %p5209_p5, %p5203_p2 }
  0xb9   : > { %5213 = shalt.err (!%p5210_p11)
}
  0xba   : > { %4835 = dma.hbm_to_vmem [thread:$0]  (!%p5556_p7), %s5597_s13, 2048, %s5599_s9, %s5603_s0, %s5324_s15, %s5324_s15, %s5325_s18  }
  0xbb   : > { %p7610_p12 = scmp.ne.s32.totalorder %s7601_s7, 0 }
  0xbd   : > { %319 = sbr.rel (%p7610_p12) target bundleno = 5829 (0x16c5), region = 44 }
  0xc4   : > { %s5635_s3 = sand.u32 1, %s5296_s22   ;;  %p7611_p8 = scmp.ne.s32.totalorder %s7598_s29, 0 }
  0xc5   : > { %s4030_s16 = sshll.u32 %s5635_s3, 4  ;;  %s322_s2 = scalar_lea.sflag [#allocation6], %s5635_s3 }
  0xc6   : > { %s5641_s20 = scalar_lea.vmem [#allocation5], %s4030_s16 }
  0xc7   : > { %5267 = dma.done.wait (%p7611_p8), %s322_s2, 256  }
  0xc8   : > { %5269 = vsyncadd (%p7611_p8), %s322_s2, 4294967040  ;;  %s330_s0 = sand.u32 1, %s5399_s27   ;;  %s4031_s7 = sshll.u32 %s5635_s3, 7 }
  0xc9   : > { %s331_s15 = scalar_lea.sflag [#allocation9], %s330_s0  ;;  %s5649_s18 = scalar_lea.vmem [#allocation8], %s4031_s7 }
  0xca   : > { %5271 = dma.done.wait (%p7611_p8), %s331_s15, 2048  }
  0xcb   : > { %5273 = vsyncadd (%p7611_p8), %s331_s15, 4294965248  ;;  %p7612_p7 = scmp.eq.s32.totalorder %s5399_s27, 0 }
  0xcd   : > { %5275 = dma.done.wait (%p7612_p7), [#allocation9], 4096   ;;  %p7613_p9 = pmov %p7612_p7 }
  0xce   : > { %p7614_p0 = pmov %p7612_p7 }
  0xcf   : > { %5277 = vsyncadd (%p7613_p9), [#allocation9], 4294963200 }
  0xd0   : > { %5279 = dma.done.wait (%p7614_p0), [#allocation12], 12288   ;;  %p7615_p1 = pmov %p7614_p0 }
  0xd1   : > { %p7616_p13 = pmov %p7614_p0 }
  0xd2   : > { %5281 = vsyncadd (%p7615_p1), [#allocation12], 4294955008 }
  0xd3   : > { %5283 = dma.done.wait (%p7616_p13), [#allocation15], 16   ;;  %p7617_p6 = pmov %p7614_p0 }
  0xd4   : > { %v5327_v0 = vmov 0   ;;  %v415_v1 = vld [vmem:[#allocation11] sm:$0xff]  ;;  %v417_v8 = vld [vmem:[#allocation11 + $0x10] sm:$0xff]  ;;  %v392_v12 = vld [vmem:[%s5649_s18 + $0x8] sm:$0xff]  ;;  %vm607_vm0 = vcmask 261120   ;;  %vm1987_vm1 = vcmask 523264  }
  0xd5   : > { %5285 = vsyncadd (%p7617_p6), [#allocation15], 4294967280  ;;  %664 = vmatprep.mubr.bf16.mxu0 %v5327_v0  ;;  %777 = vmatprep.mubr.bf16.mxu1 %v5327_v0  ;;  %v423_v2 = vld [vmem:[#allocation11 + $0x40] sm:$0xff]  ;;  %v425_v9 = vld [vmem:[#allocation11 + $0x50] sm:$0xff]  ;;  %vm5329_vm2 = vmmov 0   ;;  %s4241_s27 = sshll.u32 %s5304_s24, 8 }
  0xd6   : > { %v431_v3 = vld [vmem:[#allocation11 + $0x80] sm:$0xff]  ;;  %v4038_v4 = vcombine.high %v415_v1, %v423_v2  ;;  %v4037_v5 = vcombine.low %v415_v1, %v423_v2  ;;  %v4042_v13 = vcombine.high %v417_v8, %v425_v9  ;;  %v433_v14 = vld [vmem:[#allocation11 + $0x90] sm:$0xff]  ;;  %v4041_v17 = vcombine.low %v417_v8, %v425_v9  ;;  %v416_v18 = vld [vmem:[#allocation11 + $0x8] sm:$0xff]  ;;  %s383_s29 = scalar_lea.vmem [#allocation16], %s4030_s16  ;;  %s8065_s19 = sld [smem:[#allocation193_spill]] }
  0xd7   : > { %v439_v6 = vld [vmem:[#allocation11 + $0xc0] sm:$0xff]  ;;  %v441_v15 = vld [vmem:[#allocation11 + $0xd0] sm:$0xff]  ;;  %v424_v19 = vld [vmem:[#allocation11 + $0x48] sm:$0xff]  ;;  %s3867_s13 = sshll.u32 %s383_s29, 4  ;;  %s3852_s24 = scalar_lea.sflag [#allocation7], %s5635_s3  ;;  %s7362_s13 = int_to_ptr.vmem [resolvable:$true] %s3867_s13 }
  0xd8   : > { %v4054_v7 = vcombine.high %v431_v3, %v439_v6  ;;  %632 = vmatprep.subr.bf16.mxu0 %v4038_v4  ;;  %v4053_v10 = vcombine.low %v431_v3, %v439_v6  ;;  %v391_v11 = vld [vmem:[%s5649_s18] sm:$0xff]  ;;  %v4058_v20 = vcombine.high %v433_v14, %v441_v15  ;;  %v4040_v21 = vcombine.high %v416_v18, %v424_v19  ;;  %v432_v23 = vld [vmem:[#allocation11 + $0x88] sm:$0xff]  ;;  %v418_v28 = vld [vmem:[#allocation11 + $0x18] sm:$0xff]  ;;  %s5214_s8 = scalar_lea.vmem %s7362_s13, 256  ;;  %s5330_s28 = smov [#allocation16]  }
  0xd9   : > { %633 = vmatpush1.bf16.msra.mxu0 %v4037_v5  ;;  %v5671_v16 = vpack.c.bf16 %v392_v12, %v391_v11  ;;  %v4039_v22 = vcombine.low %v416_v18, %v424_v19  ;;  %v440_v24 = vld [vmem:[#allocation11 + $0xc8] sm:$0xff]  ;;  %v5673_v25 = vld [vmem:[#allocation11 + $0x20] sm:$0xff]  ;;  %v426_v29 = vld [vmem:[#allocation11 + $0x58] sm:$0xff]  ;;  %v4057_v32 = vcombine.low %v433_v14, %v441_v15  ;;  %p5215_p2 = scmp.ne.s32.totalorder %s7362_s13, %s5214_s8  ;;  %s5218_s17 = sshll.u32 %s5330_s28, 4  ;;  %s5219_s17 = int_to_ptr.vmem [resolvable:$false] %s5218_s17 }
  0xda   : > { %634 = vmatprep.subr.bf16.mxu0 %v4054_v7  ;;  %v5675_v26 = vld [vmem:[#allocation11 + $0x60] sm:$0xff]  ;;  %v4056_v27 = vcombine.high %v432_v23, %v440_v24  ;;  %745 = vmatprep.subr.bf16.mxu1 %v4040_v21  ;;  %v393_v30 = vld [vmem:[%s5649_s18 + $0x10] sm:$0xff]  ;;  %v394_v31 = vld [vmem:[%s5649_s18 + $0x18] sm:$0xff]  ;;  %v4055_v34 = vcombine.low %v432_v23, %v440_v24  ;;  %v4044_v37 = vcombine.high %v418_v28, %v426_v29  ;;  %s5220_s11 = scalar_lea.vmem %s5219_s17, 512  ;;  %p5221_p5 = scmp.lt.s32.totalorder %s7362_s13, %s5219_s17 }
  0xdb   : > { %v4046_v33 = vcombine.high %v5673_v25, %v5675_v26  ;;  %746 = vmatpush1.bf16.msra.mxu1 %v4039_v22  ;;  %v434_v35 = vld [vmem:[#allocation11 + $0x98] sm:$0xff]  ;;  %v5684_v38 = vpack.c.bf16 %v394_v31, %v393_v30  ;;  %v4043_v39 = vcombine.low %v418_v28, %v426_v29  ;;  %v395_v40 = vld [vmem:[%s5649_s18 + $0x20] sm:$0xff]  ;;  %v396_v41 = vld [vmem:[%s5649_s18 + $0x28] sm:$0xff]  ;;  %v4045_v2 = vcombine.low %v5673_v25, %v5675_v26  ;;  %p5216_p4 = pnand %p5215_p2, %p5530_p10  ;;  %p5222_p11 = scmp.lt.s32.totalorder %s5220_s11, %s5214_s8 }
  0xdc   : > { %v442_v36 = vld [vmem:[#allocation11 + $0xd8] sm:$0xff]  ;;  %747 = vmatprep.subr.bf16.mxu1 %v4056_v27  ;;  %v5694_v44 = vpack.c.bf16 %v396_v41, %v395_v40  ;;  %v397_v45 = vld [vmem:[%s5649_s18 + $0x30] sm:$0xff]  ;;  %v399_v48 = vld [vmem:[%s5649_s18 + $0x40] sm:$0xff]  ;;  %s7360_s30 = scalar_lea.hbm %s8065_s19, %s4241_s27 }
  0xdd   : > { %635 = vmatpush1.bf16.msra.mxu0 %v4053_v10  ;;  %v4060_v42 = vcombine.high %v434_v35, %v442_v36  ;;  %v4059_v43 = vcombine.low %v434_v35, %v442_v36  ;;  %v398_v46 = vld [vmem:[%s5649_s18 + $0x38] sm:$0xff]  ;;  %v400_v49 = vld [vmem:[%s5649_s18 + $0x48] sm:$0xff]  ;;  %v401_v51 = vld [vmem:[%s5649_s18 + $0x50] sm:$0xff]  ;;  %p5217_p3 = pneg %p5216_p4  ;;  %p5223_p12 = por %p5222_p11, %p5221_p5 }
  0xde   : > { %858 = vmatprep.subr.bf16.mxu0 %v4042_v13  ;;  %v5704_v47 = vpack.c.bf16 %v398_v46, %v397_v45  ;;  %v5714_v50 = vpack.c.bf16 %v400_v49, %v399_v48  ;;  %v402_v52 = vld [vmem:[%s5649_s18 + $0x58] sm:$0xff]  ;;  %v403_v54 = vld [vmem:[%s5649_s18 + $0x60] sm:$0xff]  ;;  %v404_v55 = vld [vmem:[%s5649_s18 + $0x68] sm:$0xff] }
  0xdf   : > { %748 = vmatpush1.bf16.msra.mxu1 %v4055_v34  ;;  %v5724_v53 = vpack.c.bf16 %v402_v52, %v401_v51  ;;  %v5734_v56 = vpack.c.bf16 %v404_v55, %v403_v54  ;;  %v405_v57 = vld [vmem:[%s5649_s18 + $0x70] sm:$0xff]  ;;  %v406_v58 = vld [vmem:[%s5649_s18 + $0x78] sm:$0xff]  ;;  %v420_v60 = vld [vmem:[#allocation11 + $0x28] sm:$0xff]  ;;  %p5224_p8 = pnand %p5223_p12, %p5217_p3 }
  0xe0   : > { %4069 = vmatmul.mubr.msk.bf16.vlgmr.msra.gmra.mrb[0].mxu0 %vm607_vm0, %v5671_v16  ;;  %971 = vmatprep.subr.bf16.mxu1 %v4044_v37  ;;  %v5744_v59 = vpack.c.bf16 %v406_v58, %v405_v57  ;;  %v428_v61 = vld [vmem:[#allocation11 + $0x68] sm:$0xff]  ;;  %v435_v63 = vld [vmem:[#allocation11 + $0xa0] sm:$0xff]  ;;  %v421_v4 = vld [vmem:[#allocation11 + $0x30] sm:$0xff] }
  0xe1   : > { %859 = vmatpush1.bf16.msra.mxu0 %v4041_v17  ;;  %674 = vmatprep.mubr.bf16.mxu0 %v5327_v0  ;;  %v4048_v62 = vcombine.high %v420_v60, %v428_v61  ;;  %v443_v1 = vld [vmem:[#allocation11 + $0xe0] sm:$0xff]  ;;  %v429_v5 = vld [vmem:[#allocation11 + $0x70] sm:$0xff]  ;;  %v436_v8 = vld [vmem:[#allocation11 + $0xa8] sm:$0xff]  ;;  %v4047_v10 = vcombine.low %v420_v60, %v428_v61 }
  0xe2   : > { %860 = vmatprep.subr.bf16.mxu0 %v4058_v20  ;;  %4077 = vmatmul.mubr.msk.bf16.vlgmr.msra.gmra.mrb[0].mxu1 %vm607_vm0, %v5671_v16  ;;  %v4062_v3 = vcombine.high %v435_v63, %v443_v1  ;;  %v4061_v6 = vcombine.low %v435_v63, %v443_v1  ;;  %v4050_v7 = vcombine.high %v421_v4, %v429_v5  ;;  %v444_v9 = vld [vmem:[#allocation11 + $0xe8] sm:$0xff]  ;;  %v437_v13 = vld [vmem:[#allocation11 + $0xb0] sm:$0xff]  ;;  %v422_v17 = vld [vmem:[#allocation11 + $0x38] sm:$0xff] }
  0xe3   : > { %787 = vmatprep.mubr.bf16.mxu1 %v5327_v0  ;;  %972 = vmatpush1.bf16.msra.mxu1 %v4043_v39  ;;  %v4064_v11 = vcombine.high %v436_v8, %v444_v9  ;;  %v4063_v12 = vcombine.low %v436_v8, %v444_v9  ;;  %v445_v14 = vld [vmem:[#allocation11 + $0xf0] sm:$0xff]  ;;  %v4049_v15 = vcombine.low %v421_v4, %v429_v5  ;;  %v430_v18 = vld [vmem:[#allocation11 + $0x78] sm:$0xff]  ;;  %v1795_v21 = vld [vmem:[#allocation10] sm:$0xff] }
  0xe4   : > { %973 = vmatprep.subr.bf16.mxu1 %v4060_v42  ;;  %v4066_v19 = vcombine.high %v437_v13, %v445_v14  ;;  %v4052_v20 = vcombine.high %v422_v17, %v430_v18  ;;  %v1799_v22 = vld [vmem:[#allocation10 + $0x20] sm:$0xff]  ;;  %v4065_v23 = vcombine.low %v437_v13, %v445_v14  ;;  %v438_v25 = vld [vmem:[#allocation11 + $0xb8] sm:$0xff]  ;;  %v4051_v27 = vcombine.low %v422_v17, %v430_v18  ;;  %v1796_v30 = vld [vmem:[#allocation10 + $0x8] sm:$0xff] }
  0xe5   : > { %861 = vmatpush1.bf16.msra.mxu0 %v4057_v32  ;;  %v4134_v24 = vcombine.high %v1795_v21, %v1799_v22  ;;  %v446_v26 = vld [vmem:[#allocation11 + $0xf8] sm:$0xff]  ;;  %v1800_v31 = vld [vmem:[#allocation10 + $0x28] sm:$0xff]  ;;  %v1807_v34 = vld [vmem:[#allocation10 + $0x60] sm:$0xff]  ;;  %v4133_v35 = vcombine.low %v1795_v21, %v1799_v22 }
  0xe6   : > { %1084 = vmatprep.subr.bf16.mxu0 %v4046_v33  ;;  %v4068_v28 = vcombine.high %v438_v25, %v446_v26  ;;  %v4067_v29 = vcombine.low %v438_v25, %v446_v26  ;;  %v4136_v32 = vcombine.high %v1796_v30, %v1800_v31  ;;  %v1803_v33 = vld [vmem:[#allocation10 + $0x40] sm:$0xff]  ;;  %v1804_v46 = vld [vmem:[#allocation10 + $0x48] sm:$0xff]  ;;  %v5856_v51 = vld [vmem:[#allocation10 + $0x10] sm:$0xff]  ;;  %v4135_v54 = vcombine.low %v1796_v30, %v1800_v31 }
  0xe7   : > { %974 = vmatpush1.bf16.msra.mxu1 %v4059_v43  ;;  %v4142_v36 = vcombine.high %v1803_v33, %v1807_v34  ;;  %v1811_v37 = vld [vmem:[#allocation10 + $0x80] sm:$0xff]  ;;  %v4141_v40 = vcombine.low %v1803_v33, %v1807_v34  ;;  %v1808_v48 = vld [vmem:[#allocation10 + $0x68] sm:$0xff]  ;;  %v5858_v52 = vld [vmem:[#allocation10 + $0x30] sm:$0xff] }
  0xe8   : > { %4070 = vmatmul.mubr.msk.bf16.gmra.mrb[4].mxu0 %vm607_vm0, %v5684_v38  ;;  %1197 = vmatprep.subr.bf16.mxu1 %v4048_v62  ;;  %v1815_v39 = vld [vmem:[#allocation10 + $0xa0] sm:$0xff]  ;;  %v4144_v55 = vcombine.high %v1804_v46, %v1808_v48  ;;  %v1812_v58 = vld [vmem:[#allocation10 + $0x88] sm:$0xff]  ;;  %v4138_v61 = vcombine.high %v5856_v51, %v5858_v52  ;;  %v4143_v62 = vcombine.low %v1804_v46, %v1808_v48  ;;  %v5873_v5 = vld [vmem:[#allocation10 + $0x38] sm:$0xff] }
  0xe9   : > { %684 = vmatprep.mubr.bf16.mxu0 %v5327_v0  ;;  %v4150_v41 = vcombine.high %v1811_v37, %v1815_v39  ;;  %v1819_v42 = vld [vmem:[#allocation10 + $0xc0] sm:$0xff]  ;;  %v4149_v45 = vcombine.low %v1811_v37, %v1815_v39  ;;  %v1816_v60 = vld [vmem:[#allocation10 + $0xa8] sm:$0xff]  ;;  %v1805_v37 = vld [vmem:[#allocation10 + $0x50] sm:$0xff] }
  0xea   : > { %4078 = vmatmul.mubr.msk.bf16.gmra.mrb[4].mxu1 %vm607_vm0, %v5684_v38  ;;  %v1823_v43 = vld [vmem:[#allocation10 + $0xe0] sm:$0xff]  ;;  %v4152_v63 = vcombine.high %v1812_v58, %v1816_v60  ;;  %v1820_v1 = vld [vmem:[#allocation10 + $0xc8] sm:$0xff]  ;;  %v1809_v39 = vld [vmem:[#allocation10 + $0x70] sm:$0xff] }
  0xeb   : > { %797 = vmatprep.mubr.bf16.mxu1 %v5327_v0  ;;  %v4158_v49 = vcombine.high %v1819_v42, %v1823_v43  ;;  %v4157_v57 = vcombine.low %v1819_v42, %v1823_v43  ;;  %v4137_v43 = vcombine.low %v5856_v51, %v5858_v52  ;;  %v4146_v46 = vcombine.high %v1805_v37, %v1809_v39 }
  0xf0   : > { %4071 = vmatmul.mubr.msk.bf16.gmra.mrb[8].mxu0 %vm607_vm0, %v5694_v44 }
  0xf1   : > { %694 = vmatprep.mubr.bf16.mxu0 %v5327_v0 }
  0xf2   : > { %4079 = vmatmul.mubr.msk.bf16.gmra.mrb[8].mxu1 %vm607_vm0, %v5694_v44 }
  0xf3   : > { %807 = vmatprep.mubr.bf16.mxu1 %v5327_v0 }
  0xf8   : > { %4072 = vmatmul.mubr.msk.bf16.gmra.mrb[12].mxu0 %vm607_vm0, %v5704_v47 }
  0xf9   : > { %704 = vmatprep.mubr.bf16.mxu0 %v5327_v0 }
  0xfa   : > { %4080 = vmatmul.mubr.msk.bf16.gmra.mrb[12].mxu1 %vm607_vm0, %v5704_v47 }
  0xfb   : > { %817 = vmatprep.mubr.bf16.mxu1 %v5327_v0 }
 0x100   : > { %4073 = vmatmul.mubr.msk.bf16.gmra.mrb[16].mxu0 %vm607_vm0, %v5714_v50 }
 0x101   : > { %714 = vmatprep.mubr.bf16.mxu0 %v5327_v0 }
 0x102   : > { %4081 = vmatmul.mubr.msk.bf16.gmra.mrb[16].mxu1 %vm607_vm0, %v5714_v50 }
 0x103   : > { %827 = vmatprep.mubr.bf16.mxu1 %v5327_v0 }
 0x108   : > { %4074 = vmatmul.mubr.msk.bf16.gmra.mrb[20].mxu0 %vm607_vm0, %v5724_v53 }
 0x109   : > { %724 = vmatprep.mubr.bf16.mxu0 %v5327_v0 }
 0x10a   : > { %4082 = vmatmul.mubr.msk.bf16.gmra.mrb[20].mxu1 %vm607_vm0, %v5724_v53 }
 0x10b   : > { %837 = vmatprep.mubr.bf16.mxu1 %v5327_v0 }
 0x110   : > { %4075 = vmatmul.mubr.msk.bf16.gmra.mrb[24].mxu0 %vm607_vm0, %v5734_v56 }
 0x111   : > { %734 = vmatprep.mubr.bf16.mxu0 %v5327_v0 }
 0x112   : > { %4083 = vmatmul.mubr.msk.bf16.gmra.mrb[24].mxu1 %vm607_vm0, %v5734_v56 }
 0x113   : > { %847 = vmatprep.mubr.bf16.mxu1 %v5327_v0 }
 0x118   : > { %4076 = vmatmul.mubr.msk.bf16.gmra.mrb[28].mxu0 %vm607_vm0, %v5744_v59 }
 0x119   : > { %890 = vmatprep.mubr.bf16.mxu0 %v5327_v0 }
 0x11a   : > { %4084 = vmatmul.mubr.msk.bf16.gmra.mrb[28].mxu1 %vm607_vm0, %v5744_v59 }
 0x11b   : > { %1003 = vmatprep.mubr.bf16.mxu1 %v5327_v0 }
 0x120   : > { %4085 = vmatmul.mubr.msk.bf16.vlgmr.msra.gmra.mrb[32].mxu0 %vm607_vm0, %v5671_v16 }
 0x121   : > { %1085 = vmatpush1.bf16.msra.mxu0 %v4045_v2  ;;  %900 = vmatprep.mubr.bf16.mxu0 %v5327_v0  ;;  %v1824_v2 = vld [vmem:[#allocation10 + $0xe8] sm:$0xff] }
 0x122   : > { %1086 = vmatprep.subr.bf16.mxu0 %v4062_v3  ;;  %4093 = vmatmul.mubr.msk.bf16.vlgmr.msra.gmra.mrb[32].mxu1 %vm607_vm0, %v5671_v16  ;;  %v4151_v3 = vcombine.low %v1812_v58, %v1816_v60  ;;  %v4160_v4 = vcombine.high %v1820_v1, %v1824_v2  ;;  %v1825_v58 = vld [vmem:[#allocation10 + $0xf0] sm:$0xff] }
 0x123   : > { %1013 = vmatprep.mubr.bf16.mxu1 %v5327_v0  ;;  %1198 = vmatpush1.bf16.msra.mxu1 %v4047_v10 }
 0x124   : > { %1199 = vmatprep.subr.bf16.mxu1 %v4064_v11 }
 0x125   : > { %1087 = vmatpush1.bf16.msra.mxu0 %v4061_v6 }
 0x126   : > { %1310 = vmatprep.subr.bf16.mxu0 %v4050_v7  ;;  %v4159_v7 = vcombine.low %v1820_v1, %v1824_v2  ;;  %v1810_v1 = vld [vmem:[#allocation10 + $0x78] sm:$0xff] }
 0x127   : > { %1200 = vmatpush1.bf16.msra.mxu1 %v4063_v12 }
 0x128   : > { %4086 = vmatmul.mubr.msk.bf16.gmra.mrb[36].mxu0 %vm607_vm0, %v5684_v38  ;;  %1423 = vmatprep.subr.bf16.mxu1 %v4052_v20 }
 0x129   : > { %910 = vmatprep.mubr.bf16.mxu0 %v5327_v0 }
 0x12a   : > { %4094 = vmatmul.mubr.msk.bf16.gmra.mrb[36].mxu1 %vm607_vm0, %v5684_v38 }
 0x12b   : > { %1023 = vmatprep.mubr.bf16.mxu1 %v5327_v0 }
 0x130   : > { %4087 = vmatmul.mubr.msk.bf16.gmra.mrb[40].mxu0 %vm607_vm0, %v5694_v44 }
 0x131   : > { %920 = vmatprep.mubr.bf16.mxu0 %v5327_v0 }
 0x132   : > { %4095 = vmatmul.mubr.msk.bf16.gmra.mrb[40].mxu1 %vm607_vm0, %v5694_v44 }
 0x133   : > { %1033 = vmatprep.mubr.bf16.mxu1 %v5327_v0 }
 0x138   : > { %4088 = vmatmul.mubr.msk.bf16.gmra.mrb[44].mxu0 %vm607_vm0, %v5704_v47 }
 0x139   : > { %930 = vmatprep.mubr.bf16.mxu0 %v5327_v0 }
 0x13a   : > { %4096 = vmatmul.mubr.msk.bf16.gmra.mrb[44].mxu1 %vm607_vm0, %v5704_v47 }
 0x13b   : > { %1043 = vmatprep.mubr.bf16.mxu1 %v5327_v0 }
 0x140   : > { %4089 = vmatmul.mubr.msk.bf16.gmra.mrb[48].mxu0 %vm607_vm0, %v5714_v50 }
 0x141   : > { %940 = vmatprep.mubr.bf16.mxu0 %v5327_v0 }
 0x142   : > { %4097 = vmatmul.mubr.msk.bf16.gmra.mrb[48].mxu1 %vm607_vm0, %v5714_v50 }
 0x143   : > { %1053 = vmatprep.mubr.bf16.mxu1 %v5327_v0 }
 0x148   : > { %4090 = vmatmul.mubr.msk.bf16.gmra.mrb[52].mxu0 %vm607_vm0, %v5724_v53 }
 0x149   : > { %950 = vmatprep.mubr.bf16.mxu0 %v5327_v0 }
 0x14a   : > { %4098 = vmatmul.mubr.msk.bf16.gmra.mrb[52].mxu1 %vm607_vm0, %v5724_v53 }
 0x14b   : > { %1063 = vmatprep.mubr.bf16.mxu1 %v5327_v0 }
 0x150   : > { %4091 = vmatmul.mubr.msk.bf16.gmra.mrb[56].mxu0 %vm607_vm0, %v5734_v56 }
 0x151   : > { %960 = vmatprep.mubr.bf16.mxu0 %v5327_v0 }
 0x152   : > { %4099 = vmatmul.mubr.msk.bf16.gmra.mrb[56].mxu1 %vm607_vm0, %v5734_v56 }
 0x153   : > { %1073 = vmatprep.mubr.bf16.mxu1 %v5327_v0 }
 0x158   : > { %4092 = vmatmul.mubr.msk.bf16.gmra.mrb[60].mxu0 %vm607_vm0, %v5744_v59 }
 0x159   : > { %1116 = vmatprep.mubr.bf16.mxu0 %v5327_v0 }
 0x15a   : > { %4100 = vmatmul.mubr.msk.bf16.gmra.mrb[60].mxu1 %vm607_vm0, %v5744_v59 }
 0x15b   : > { %1229 = vmatprep.mubr.bf16.mxu1 %v5327_v0 }
 0x160   : > { %4101 = vmatmul.mubr.msk.bf16.vlgmr.msra.gmra.mrb[64].mxu0 %vm607_vm0, %v5671_v16 }
 0x161   : > { %1311 = vmatpush1.bf16.msra.mxu0 %v4049_v15  ;;  %1126 = vmatprep.mubr.bf16.mxu0 %v5327_v0 }
 0x162   : > { %1312 = vmatprep.subr.bf16.mxu0 %v4066_v19  ;;  %4109 = vmatmul.mubr.msk.bf16.vlgmr.msra.gmra.mrb[64].mxu1 %vm607_vm0, %v5671_v16 }
 0x163   : > { %1239 = vmatprep.mubr.bf16.mxu1 %v5327_v0  ;;  %1424 = vmatpush1.bf16.msra.mxu1 %v4051_v27 }
 0x164   : > { %1425 = vmatprep.subr.bf16.mxu1 %v4068_v28 }
 0x165   : > { %1313 = vmatpush1.bf16.msra.mxu0 %v4065_v23 }
 0x166   : > { %1991 = vmatprep.subr.bf16.mxu0 %v4134_v24 }
 0x167   : > { %1426 = vmatpush1.bf16.msra.mxu1 %v4067_v29 }
 0x168   : > { %4102 = vmatmul.mubr.msk.bf16.gmra.mrb[68].mxu0 %vm607_vm0, %v5684_v38  ;;  %2034 = vmatprep.subr.bf16.mxu1 %v4136_v32 }
 0x169   : > { %1136 = vmatprep.mubr.bf16.mxu0 %v5327_v0 }
 0x16a   : > { %4110 = vmatmul.mubr.msk.bf16.gmra.mrb[68].mxu1 %vm607_vm0, %v5684_v38 }
 0x16b   : > { %1249 = vmatprep.mubr.bf16.mxu1 %v5327_v0 }
 0x170   : > { %4103 = vmatmul.mubr.msk.bf16.gmra.mrb[72].mxu0 %vm607_vm0, %v5694_v44 }
 0x171   : > { %1146 = vmatprep.mubr.bf16.mxu0 %v5327_v0 }
 0x172   : > { %4111 = vmatmul.mubr.msk.bf16.gmra.mrb[72].mxu1 %vm607_vm0, %v5694_v44 }
 0x173   : > { %1259 = vmatprep.mubr.bf16.mxu1 %v5327_v0 }
 0x178   : > { %4104 = vmatmul.mubr.msk.bf16.gmra.mrb[76].mxu0 %vm607_vm0, %v5704_v47 }
 0x179   : > { %1156 = vmatprep.mubr.bf16.mxu0 %v5327_v0 }
 0x17a   : > { %4112 = vmatmul.mubr.msk.bf16.gmra.mrb[76].mxu1 %vm607_vm0, %v5704_v47 }
 0x17b   : > { %1269 = vmatprep.mubr.bf16.mxu1 %v5327_v0 }
 0x180   : > { %4105 = vmatmul.mubr.msk.bf16.gmra.mrb[80].mxu0 %vm607_vm0, %v5714_v50 }
 0x181   : > { %1166 = vmatprep.mubr.bf16.mxu0 %v5327_v0 }
 0x182   : > { %4113 = vmatmul.mubr.msk.bf16.gmra.mrb[80].mxu1 %vm607_vm0, %v5714_v50 }
 0x183   : > { %1279 = vmatprep.mubr.bf16.mxu1 %v5327_v0 }
 0x188   : > { %4106 = vmatmul.mubr.msk.bf16.gmra.mrb[84].mxu0 %vm607_vm0, %v5724_v53 }
 0x189   : > { %1176 = vmatprep.mubr.bf16.mxu0 %v5327_v0 }
 0x18a   : > { %4114 = vmatmul.mubr.msk.bf16.gmra.mrb[84].mxu1 %vm607_vm0, %v5724_v53 }
 0x18b   : > { %1289 = vmatprep.mubr.bf16.mxu1 %v5327_v0 }
 0x190   : > { %4107 = vmatmul.mubr.msk.bf16.gmra.mrb[88].mxu0 %vm607_vm0, %v5734_v56 }
 0x191   : > { %1186 = vmatprep.mubr.bf16.mxu0 %v5327_v0 }
 0x192   : > { %4115 = vmatmul.mubr.msk.bf16.gmra.mrb[88].mxu1 %vm607_vm0, %v5734_v56 }
 0x193   : > { %1299 = vmatprep.mubr.bf16.mxu1 %v5327_v0 }
 0x198   : > { %4108 = vmatmul.mubr.msk.bf16.gmra.mrb[92].mxu0 %vm607_vm0, %v5744_v59 }
 0x199   : > { %1342 = vmatprep.mubr.bf16.mxu0 %v5327_v0 }
 0x19a   : > { %4116 = vmatmul.mubr.msk.bf16.gmra.mrb[92].mxu1 %vm607_vm0, %v5744_v59 }
 0x19b   : > { %1455 = vmatprep.mubr.bf16.mxu1 %v5327_v0 }
 0x1a0   : > { %4117 = vmatmul.mubr.msk.bf16.vlgmr.msra.gmra.mrb[96].mxu0 %vm607_vm0, %v5671_v16 }
 0x1a1   : > { %1992 = vmatpush1.bf16.msra.mxu0 %v4133_v35  ;;  %1352 = vmatprep.mubr.bf16.mxu0 %v5327_v0  ;;  %v1793_v35 = vld [vmem:[%s5641_s20 + $0x8] sm:$0xff] }
 0x1a2   : > { %1993 = vmatprep.subr.bf16.mxu0 %v4142_v36  ;;  %4125 = vmatmul.mubr.msk.bf16.vlgmr.msra.gmra.mrb[96].mxu1 %vm607_vm0, %v5671_v16  ;;  %v5871_v16 = vld [vmem:[#allocation10 + $0x18] sm:$0xff] }
 0x1a3   : > { %1465 = vmatprep.mubr.bf16.mxu1 %v5327_v0  ;;  %2035 = vmatpush1.bf16.msra.mxu1 %v4135_v54  ;;  %v4140_v9 = vcombine.high %v5871_v16, %v5873_v5  ;;  %v1817_v54 = vld [vmem:[#allocation10 + $0xb0] sm:$0xff] }
 0x1a4   : > { %2036 = vmatprep.subr.bf16.mxu1 %v4144_v55  ;;  %v4145_v55 = vcombine.low %v1805_v37, %v1809_v39  ;;  %v1818_v37 = vld [vmem:[#allocation10 + $0xb8] sm:$0xff] }
 0x1a5   : > { %1994 = vmatpush1.bf16.msra.mxu0 %v4141_v40 }
 0x1a6   : > { %1995 = vmatprep.subr.bf16.mxu0 %v4150_v41 }
 0x1a7   : > { %2037 = vmatpush1.bf16.msra.mxu1 %v4143_v62 }
 0x1a8   : > { %4118 = vmatmul.mubr.msk.bf16.gmra.mrb[100].mxu0 %vm607_vm0, %v5684_v38  ;;  %2038 = vmatprep.subr.bf16.mxu1 %v4152_v63  ;;  %v1806_v63 = vld [vmem:[#allocation10 + $0x58] sm:$0xff] }
 0x1a9   : > { %1362 = vmatprep.mubr.bf16.mxu0 %v5327_v0  ;;  %1996 = vmatpush1.bf16.msra.mxu0 %v4149_v45 }
 0x1aa   : > { %1997 = vmatprep.subr.bf16.mxu0 %v4158_v49  ;;  %4126 = vmatmul.mubr.msk.bf16.gmra.mrb[100].mxu1 %vm607_vm0, %v5684_v38  ;;  %v1813_v49 = vld [vmem:[#allocation10 + $0x90] sm:$0xff] }
 0x1ab   : > { %1475 = vmatprep.mubr.bf16.mxu1 %v5327_v0  ;;  %2039 = vmatpush1.bf16.msra.mxu1 %v4151_v3  ;;  %v4154_v51 = vcombine.high %v1813_v49, %v1817_v54  ;;  %v4153_v62 = vcombine.low %v1813_v49, %v1817_v54  ;;  %v1826_v54 = vld [vmem:[#allocation10 + $0xf8] sm:$0xff] }
 0x1ac   : > { %2040 = vmatprep.subr.bf16.mxu1 %v4160_v4 }
 0x1ad   : > { %1998 = vmatpush1.bf16.msra.mxu0 %v4157_v57  ;;  %v1821_v57 = vld [vmem:[#allocation10 + $0xd0] sm:$0xff] }
 0x1ae   : > { %2077 = vmatprep.subr.bf16.mxu0 %v4138_v61 }
 0x1af   : > { %2041 = vmatpush1.bf16.msra.mxu1 %v4159_v7  ;;  %v4139_v7 = vcombine.low %v5871_v16, %v5873_v5  ;;  %v1822_v5 = vld [vmem:[#allocation10 + $0xd8] sm:$0xff] }
 0x1b0   : > { %4119 = vmatmul.mubr.msk.bf16.gmra.mrb[104].mxu0 %vm607_vm0, %v5694_v44  ;;  %2120 = vmatprep.subr.bf16.mxu1 %v4140_v9  ;;  %v4148_v9 = vcombine.high %v1806_v63, %v1810_v1 }
 0x1b1   : > { %1372 = vmatprep.mubr.bf16.mxu0 %v5327_v0 }
 0x1b2   : > { %4127 = vmatmul.mubr.msk.bf16.gmra.mrb[104].mxu1 %vm607_vm0, %v5694_v44 }
 0x1b3   : > { %v5877_v6 = vpop.f32.mrb[0].mxu0  ;;  %1485 = vmatprep.mubr.bf16.mxu1 %v5327_v0 }
 0x1b4   : > { %v5880_v8 = vpop.f32.mrb[1].mxu0 }
 0x1b5   : > { %v5884_v10 = vpop.f32.mrb[2].mxu0 }
 0x1b6   : > { %v1536_v11 = vpack.c.bf16 %v5884_v10, %v5877_v6  ;;  %v5888_v12 = vpop.f32.mrb[3].mxu0 }
 0x1b8   : > { %4120 = vmatmul.mubr.msk.bf16.gmra.mrb[108].mxu0 %vm607_vm0, %v5704_v47 }
 0x1b9   : > { %1382 = vmatprep.mubr.bf16.mxu0 %v5327_v0 }
 0x1ba   : > { %4128 = vmatmul.mubr.msk.bf16.gmra.mrb[108].mxu1 %vm607_vm0, %v5704_v47 }
 0x1bb   : > { %v5897_v13 = vpop.f32.mrb[4].mxu0  ;;  %1495 = vmatprep.mubr.bf16.mxu1 %v5327_v0 }
 0x1bc   : > { %v5900_v14 = vpop.f32.mrb[5].mxu0 }
 0x1bd   : > { %v5902_v15 = vpop.f32.mrb[6].mxu0 }
 0x1be   : > { %v1552_v17 = vpack.c.bf16 %v5902_v15, %v5897_v13  ;;  %v5906_v18 = vpop.f32.mrb[7].mxu0 }
 0x1c0   : > { %4121 = vmatmul.mubr.msk.bf16.gmra.mrb[112].mxu0 %vm607_vm0, %v5714_v50 }
 0x1c1   : > { %1392 = vmatprep.mubr.bf16.mxu0 %v5327_v0 }
 0x1c2   : > { %4129 = vmatmul.mubr.msk.bf16.gmra.mrb[112].mxu1 %vm607_vm0, %v5714_v50 }
 0x1c3   : > { %v5915_v44 = vpop.f32.mrb[8].mxu0  ;;  %1505 = vmatprep.mubr.bf16.mxu1 %v5327_v0 }
 0x1c4   : > { %v5918_v20 = vpop.f32.mrb[9].mxu0 }
 0x1c5   : > { %v5920_v21 = vpop.f32.mrb[10].mxu0 }
 0x1c6   : > { %v1568_v22 = vpack.c.bf16 %v5920_v21, %v5915_v44  ;;  %v5924_v23 = vpop.f32.mrb[11].mxu0 }
 0x1c8   : > { %4122 = vmatmul.mubr.msk.bf16.gmra.mrb[116].mxu0 %vm607_vm0, %v5724_v53 }
 0x1c9   : > { %1402 = vmatprep.mubr.bf16.mxu0 %v5327_v0 }
 0x1ca   : > { %4130 = vmatmul.mubr.msk.bf16.gmra.mrb[116].mxu1 %vm607_vm0, %v5724_v53  ;;  %v1792_v53 = vld [vmem:[%s5641_s20] sm:$0xff] }
 0x1cb   : > { %v5933_v47 = vpop.f32.mrb[12].mxu0  ;;  %1515 = vmatprep.mubr.bf16.mxu1 %v5327_v0  ;;  %v5976_v41 = vpack.c.bf16 %v1793_v35, %v1792_v53  ;;  %v4161_v53 = vcombine.low %v1821_v57, %v1825_v58  ;;  %v1814_v35 = vld [vmem:[#allocation10 + $0x98] sm:$0xff] }
 0x1cc   : > { %v5936_v25 = vpop.f32.mrb[13].mxu0  ;;  %v4156_v49 = vcombine.high %v1814_v35, %v1818_v37 }
 0x1cd   : > { %v5938_v26 = vpop.f32.mrb[14].mxu0 }
 0x1ce   : > { %v1584_v27 = vpack.c.bf16 %v5938_v26, %v5933_v47  ;;  %v5942_v28 = vpop.f32.mrb[15].mxu0 }
 0x1d0   : > { %4123 = vmatmul.mubr.msk.bf16.gmra.mrb[120].mxu0 %vm607_vm0, %v5734_v56 }
 0x1d1   : > { %1412 = vmatprep.mubr.bf16.mxu0 %v5327_v0 }
 0x1d2   : > { %4131 = vmatmul.mubr.msk.bf16.gmra.mrb[120].mxu1 %vm607_vm0, %v5734_v56 }
 0x1d3   : > { %v5951_v50 = vpop.f32.mrb[16].mxu0  ;;  %1525 = vmatprep.mubr.bf16.mxu1 %v5327_v0 }
 0x1d4   : > { %v5954_v30 = vpop.f32.mrb[17].mxu0 }
 0x1d5   : > { %v5956_v31 = vpop.f32.mrb[18].mxu0 }
 0x1d6   : > { %v1600_v32 = vpack.c.bf16 %v5956_v31, %v5951_v50  ;;  %v5960_v33 = vpop.f32.mrb[19].mxu0 }
 0x1d8   : > { %4124 = vmatmul.mubr.msk.bf16.gmra.mrb[124].mxu0 %vm607_vm0, %v5744_v59 }
 0x1d9   : > { %2023 = vmatprep.mubr.bf16.mxu0 %v5327_v0 }
 0x1da   : > { %4132 = vmatmul.mubr.msk.bf16.gmra.mrb[124].mxu1 %vm607_vm0, %v5744_v59  ;;  %v4162_v59 = vcombine.high %v1821_v57, %v1825_v58  ;;  %v7436_v57 = vmov 0.0   ;;  %v4155_v58 = vcombine.low %v1814_v35, %v1818_v37 }
 0x1db   : > { %v5971_v36 = vpop.f32.mrb[20].mxu0  ;;  %2066 = vmatprep.mubr.bf16.mxu1 %v5327_v0 }
 0x1dc   : > { %v5974_v40 = vpop.f32.mrb[21].mxu0 }
 0x1dd   : > { %v5978_v42 = vpop.f32.mrb[22].mxu0 }
 0x1de   : > { %v1616_v45 = vpack.c.bf16 %v5978_v42, %v5971_v36  ;;  %v5984_v56 = vpop.f32.mrb[23].mxu0 }
 0x1e0   : > { %4165 = vmatmul.mubr.msk.bf16.vlgmr.msra.gmra.mrb[128].mxu0 %vm1987_vm1, %v5976_v41 }
 0x1e1   : > { %2078 = vmatpush1.bf16.msra.mxu0 %v4137_v43  ;;  %2109 = vmatprep.mubr.bf16.mxu0 %v5327_v0  ;;  %v4147_v43 = vcombine.low %v1806_v63, %v1810_v1  ;;  %v4163_v1 = vcombine.low %v1822_v5, %v1826_v54 }
 0x1e2   : > { %2079 = vmatprep.subr.bf16.mxu0 %v4146_v46  ;;  %4166 = vmatmul.mubr.msk.bf16.vlgmr.msra.gmra.mrb[128].mxu1 %vm1987_vm1, %v5976_v41 }
 0x1e3   : > { %v5993_v52 = vpop.f32.mrb[24].mxu0  ;;  %2121 = vmatpush1.bf16.msra.mxu1 %v4139_v7  ;;  %2152 = vmatprep.mubr.bf16.mxu1 %v5327_v0 }
 0x1e4   : > { %v5996_v60 = vpop.f32.mrb[25].mxu0  ;;  %2122 = vmatprep.subr.bf16.mxu1 %v4148_v9 }
 0x1e5   : > { %2080 = vmatpush1.bf16.msra.mxu0 %v4145_v55  ;;  %v5998_v61 = vpop.f32.mrb[26].mxu0 }
 0x1e6   : > { %v1632_v2 = vpack.c.bf16 %v5998_v61, %v5993_v52  ;;  %v6002_v3 = vpop.f32.mrb[27].mxu0  ;;  %2081 = vmatprep.subr.bf16.mxu0 %v4154_v51 }
 0x1e7   : > { %2123 = vmatpush1.bf16.msra.mxu1 %v4147_v43 }
 0x1e8   : > { %2124 = vmatprep.subr.bf16.mxu1 %v4156_v49 }
 0x1e9   : > { %2082 = vmatpush1.bf16.msra.mxu0 %v4153_v62  ;;  %v4164_v62 = vcombine.high %v1822_v5, %v1826_v54 }
 0x1ea   : > { %2083 = vmatprep.subr.bf16.mxu0 %v4162_v59 }
 0x1eb   : > { %v6010_v39 = vpop.f32.mrb[28].mxu0  ;;  %2125 = vmatpush1.bf16.msra.mxu1 %v4155_v58 }
 0x1ec   : > { %v6013_v46 = vpop.f32.mrb[29].mxu0  ;;  %2126 = vmatprep.subr.bf16.mxu1 %v4164_v62 }
 0x1ed   : > { %2084 = vmatpush1.bf16.msra.mxu0 %v4161_v53  ;;  %v6015_v16 = vpop.f32.mrb[30].mxu0 }
 0x1ee   : > { %v1648_v55 = vpack.c.bf16 %v6015_v16, %v6010_v39  ;;  %v6019_v51 = vpop.f32.mrb[31].mxu0  ;;  %4474 = vmatprep.subr.bf16.mxu0 %v7436_v57 }
 0x1ef   : > { %2127 = vmatpush1.bf16.msra.mxu1 %v4163_v1 }
 0x1f0   : > { %4167 = vmatmul.mubr.msk.bf16.vlgmr.msra.gmra.mrb[132].mxu0 %vm1987_vm1, %v5976_v41  ;;  %4494 = vmatprep.subr.bf16.mxu1 %v7436_v57 }
 0x1f1   : > { %4490 = vmatprep.mubr.msk.bf16.mxu0 %vm5329_vm2, %v7436_v57 }
 0x1f2   : > { %4168 = vmatmul.mubr.msk.bf16.vlgmr.msra.gmra.mrb[132].mxu1 %vm1987_vm1, %v5976_v41 }
 0x1f3   : > { %v6026_v63 = vpop.f32.mrb[32].mxu0  ;;  %4510 = vmatprep.mubr.msk.bf16.mxu1 %vm5329_vm2, %v7436_v57 }
 0x1f4   : > { %7618 = vst [vmem:[#allocation25_spill] sm:$0xff] %v6026_v63  ;;  %v6028_v59 = vpop.f32.mrb[33].mxu0 }
 0x1f5   : > { %7619 = vst [vmem:[#allocation26_spill] sm:$0xff] %v6028_v59  ;;  %v6030_v7 = vpop.f32.mrb[34].mxu0 }
 0x1f6   : > { %7620 = vst [vmem:[#allocation27_spill] sm:$0xff] %v6030_v7  ;;  %4475 = vmatpush3.bf16.xpose.msra.mxu0 %v1536_v11  ;;  %v6037_v53 = vpop.f32.mrb[35].mxu0 }
 0x1f7   : > { %7621 = vst [vmem:[#allocation28_spill] sm:$0xff] %v6037_v53  ;;  %4476 = vmatprep.subr.bf16.mxu0 %v7436_v57 }
 0x1fb   : > { %v6045_v37 = vpop.f32.mrb[36].mxu0 }
 0x1fc   : > { %7622 = vst [vmem:[#allocation29_spill] sm:$0xff] %v6045_v37  ;;  %v6047_v43 = vpop.f32.mrb[37].mxu0 }
 0x1fd   : > { %7623 = vst [vmem:[#allocation30_spill] sm:$0xff] %v6047_v43  ;;  %v6049_v49 = vpop.f32.mrb[38].mxu0 }
 0x1fe   : > { %7624 = vst [vmem:[#allocation31_spill] sm:$0xff] %v6049_v49  ;;  %4477 = vmatpush3.bf16.xpose.msra.mxu0 %v1552_v17  ;;  %v6056_v10 = vpop.f32.mrb[39].mxu0 }
 0x1ff   : > { %7625 = vst [vmem:[#allocation32_spill] sm:$0xff] %v6056_v10  ;;  %4478 = vmatprep.subr.bf16.mxu0 %v7436_v57 }
 0x203   : > { %v6061_v41 = vpop.f32.mrb[40].mxu0 }
 0x204   : > { %7626 = vst [vmem:[#allocation33_spill] sm:$0xff] %v6061_v41  ;;  %v6063_v5 = vpop.f32.mrb[41].mxu0 }
 0x205   : > { %7627 = vst [vmem:[#allocation34_spill] sm:$0xff] %v6063_v5  ;;  %v6065_v54 = vpop.f32.mrb[42].mxu0 }
 0x206   : > { %7628 = vst [vmem:[#allocation35_spill] sm:$0xff] %v6065_v54  ;;  %4479 = vmatpush3.bf16.xpose.msra.mxu0 %v1568_v22  ;;  %v6072_v13 = vpop.f32.mrb[43].mxu0 }
 0x207   : > { %7629 = vst [vmem:[#allocation36_spill] sm:$0xff] %v6072_v13  ;;  %4480 = vmatprep.subr.bf16.mxu0 %v7436_v57 }
 0x20b   : > { %v6077_v17 = vpop.f32.mrb[44].mxu0 }
 0x20c   : > { %7630 = vst [vmem:[#allocation37_spill] sm:$0xff] %v6077_v17  ;;  %v6079_v62 = vpop.f32.mrb[45].mxu0 }
 0x20d   : > { %7631 = vst [vmem:[#allocation38_spill] sm:$0xff] %v6079_v62  ;;  %v6081_v1 = vpop.f32.mrb[46].mxu0 }
 0x20e   : > { %7632 = vst [vmem:[#allocation39_spill] sm:$0xff] %v6081_v1  ;;  %4481 = vmatpush3.bf16.xpose.msra.mxu0 %v1584_v27  ;;  %v6088_v44 = vpop.f32.mrb[47].mxu0 }
 0x20f   : > { %7633 = vst [vmem:[#allocation40_spill] sm:$0xff] %v6088_v44  ;;  %4482 = vmatprep.subr.bf16.mxu0 %v7436_v57 }
 0x213   : > { %v6093_v22 = vpop.f32.mrb[48].mxu0 }
 0x214   : > { %7634 = vst [vmem:[#allocation41_spill] sm:$0xff] %v6093_v22  ;;  %v6095_v15 = vpop.f32.mrb[49].mxu0 }
 0x215   : > { %7635 = vst [vmem:[#allocation42_spill] sm:$0xff] %v6095_v15  ;;  %v6097_v35 = vpop.f32.mrb[50].mxu0 }
 0x216   : > { %7636 = vst [vmem:[#allocation43_spill] sm:$0xff] %v6097_v35  ;;  %4483 = vmatpush3.bf16.xpose.msra.mxu0 %v1600_v32  ;;  %v6104_v47 = vpop.f32.mrb[51].mxu0 }
 0x217   : > { %7637 = vst [vmem:[#allocation44_spill] sm:$0xff] %v6104_v47  ;;  %4484 = vmatprep.subr.bf16.mxu0 %v7436_v57 }
 0x21b   : > { %v6109_v27 = vpop.f32.mrb[52].mxu0 }
 0x21c   : > { %7638 = vst [vmem:[#allocation45_spill] sm:$0xff] %v6109_v27  ;;  %v6111_v21 = vpop.f32.mrb[53].mxu0 }
 0x21d   : > { %7639 = vst [vmem:[#allocation46_spill] sm:$0xff] %v6111_v21  ;;  %v6113_v58 = vpop.f32.mrb[54].mxu0 }
 0x21e   : > { %7640 = vst [vmem:[#allocation47_spill] sm:$0xff] %v6113_v58  ;;  %4485 = vmatpush3.bf16.xpose.msra.mxu0 %v1616_v45  ;;  %v6120_v50 = vpop.f32.mrb[55].mxu0 }
 0x21f   : > { %7641 = vst [vmem:[#allocation48_spill] sm:$0xff] %v6120_v50  ;;  %4486 = vmatprep.subr.bf16.mxu0 %v7436_v57 }
 0x223   : > { %v6125_v32 = vpop.f32.mrb[56].mxu0 }
 0x224   : > { %7642 = vst [vmem:[#allocation49_spill] sm:$0xff] %v6125_v32  ;;  %v6127_v26 = vpop.f32.mrb[57].mxu0 }
 0x225   : > { %7643 = vst [vmem:[#allocation50_spill] sm:$0xff] %v6127_v26  ;;  %v6129_v6 = vpop.f32.mrb[58].mxu0 }
 0x226   : > { %7644 = vst [vmem:[#allocation51_spill] sm:$0xff] %v6129_v6  ;;  %4487 = vmatpush3.bf16.xpose.msra.mxu0 %v1632_v2  ;;  %v6136_v36 = vpop.f32.mrb[59].mxu0 }
 0x227   : > { %7645 = vst [vmem:[#allocation52_spill] sm:$0xff] %v6136_v36  ;;  %4488 = vmatprep.subr.bf16.mxu0 %v7436_v57 }
 0x22b   : > { %v6141_v45 = vpop.f32.mrb[60].mxu0 }
 0x22c   : > { %7646 = vst [vmem:[#allocation53_spill] sm:$0xff] %v6141_v45  ;;  %v6143_v31 = vpop.f32.mrb[61].mxu0 }
 0x22d   : > { %7647 = vst [vmem:[#allocation54_spill] sm:$0xff] %v6143_v31  ;;  %v6145_v9 = vpop.f32.mrb[62].mxu0 }
 0x22e   : > { %7648 = vst [vmem:[#allocation55_spill] sm:$0xff] %v6145_v9  ;;  %4489 = vmatpush3.bf16.xpose.msra.mxu0 %v1648_v55  ;;  %v6152_v52 = vpop.f32.mrb[63].mxu0 }
 0x22f   : > { %7649 = vst [vmem:[#allocation56_spill] sm:$0xff] %v6152_v52  ;;  %4534 = vmatprep.subr.bf16.mxu0 %v7436_v57 }
 0x233   : > { %v1118_v2 = vpop.f32.mrb[64].mxu0 }
 0x234   : > { %v6157_v42 = vpop.f32.mrb[65].mxu0 }
 0x235   : > { %v1122_v0 = vpop.f32.mrb[66].mxu0 }
 0x236   : > { %v1544_v4 = vpack.c.bf16 %v1122_v0, %v1118_v2  ;;  %v6159_v48 = vpop.f32.mrb[67].mxu0 }
 0x238   : > { %4495 = vmatpush3.bf16.msra.mxu1 %v1544_v4 }
 0x239   : > { %4496 = vmatprep.subr.bf16.mxu1 %v7436_v57 }
 0x23b   : > { %v1128_v39 = vpop.f32.mrb[68].mxu0 }
 0x23c   : > { %v6168_v16 = vpop.f32.mrb[69].mxu0 }
 0x23d   : > { %v1132_v55 = vpop.f32.mrb[70].mxu0 }
 0x23e   : > { %v1560_v0 = vpack.c.bf16 %v1132_v55, %v1128_v39  ;;  %v6170_v2 = vpop.f32.mrb[71].mxu0 }
 0x240   : > { %4497 = vmatpush3.bf16.msra.mxu1 %v1560_v0 }
 0x241   : > { %4498 = vmatprep.subr.bf16.mxu1 %v7436_v57 }
 0x243   : > { %v1138_v4 = vpop.f32.mrb[72].mxu0 }
 0x244   : > { %v6175_v34 = vpop.f32.mrb[73].mxu0 }
 0x245   : > { %v1142_v29 = vpop.f32.mrb[74].mxu0 }
 0x246   : > { %v1576_v24 = vpack.c.bf16 %v1142_v29, %v1138_v4  ;;  %v6177_v19 = vpop.f32.mrb[75].mxu0 }
 0x248   : > { %4499 = vmatpush3.bf16.msra.mxu1 %v1576_v24 }
 0x249   : > { %4500 = vmatprep.subr.bf16.mxu1 %v7436_v57 }
 0x24b   : > { %v1148_v39 = vpop.f32.mrb[76].mxu0 }
 0x24c   : > { %v6182_v55 = vpop.f32.mrb[77].mxu0 }
 0x24d   : > { %v1152_v61 = vpop.f32.mrb[78].mxu0 }
 0x24e   : > { %v1592_v0 = vpack.c.bf16 %v1152_v61, %v1148_v39  ;;  %v6184_v11 = vpop.f32.mrb[79].mxu0 }
 0x250   : > { %4501 = vmatpush3.bf16.msra.mxu1 %v1592_v0 }
 0x251   : > { %4502 = vmatprep.subr.bf16.mxu1 %v7436_v57 }
 0x253   : > { %v1158_v29 = vpop.f32.mrb[80].mxu0 }
 0x254   : > { %v6189_v4 = vpop.f32.mrb[81].mxu0 }
 0x255   : > { %v1162_v38 = vpop.f32.mrb[82].mxu0 }
 0x256   : > { %v1608_v24 = vpack.c.bf16 %v1162_v38, %v1158_v29  ;;  %v6191_v52 = vpop.f32.mrb[83].mxu0 }
 0x258   : > { %4503 = vmatpush3.bf16.msra.mxu1 %v1608_v24 }
 0x259   : > { %4504 = vmatprep.subr.bf16.mxu1 %v7436_v57 }
 0x25b   : > { %v1168_v61 = vpop.f32.mrb[84].mxu0 }
 0x25c   : > { %v6196_v39 = vpop.f32.mrb[85].mxu0 }
 0x25d   : > { %v1172_v31 = vpop.f32.mrb[86].mxu0 }
 0x25e   : > { %v1624_v0 = vpack.c.bf16 %v1172_v31, %v1168_v61  ;;  %v6198_v36 = vpop.f32.mrb[87].mxu0 }
 0x260   : > { %4505 = vmatpush3.bf16.msra.mxu1 %v1624_v0 }
 0x261   : > { %4506 = vmatprep.subr.bf16.mxu1 %v7436_v57 }
 0x263   : > { %v1178_v38 = vpop.f32.mrb[88].mxu0 }
 0x264   : > { %v6203_v29 = vpop.f32.mrb[89].mxu0 }
 0x265   : > { %v1182_v26 = vpop.f32.mrb[90].mxu0 }
 0x266   : > { %v1640_v24 = vpack.c.bf16 %v1182_v26, %v1178_v38  ;;  %v6205_v50 = vpop.f32.mrb[91].mxu0 }
 0x268   : > { %4507 = vmatpush3.bf16.msra.mxu1 %v1640_v24 }
 0x269   : > { %4508 = vmatprep.subr.bf16.mxu1 %v7436_v57 }
 0x26b   : > { %v1188_v31 = vpop.f32.mrb[92].mxu0 }
 0x26c   : > { %v6210_v61 = vpop.f32.mrb[93].mxu0 }
 0x26d   : > { %v1192_v21 = vpop.f32.mrb[94].mxu0 }
 0x26e   : > { %v1656_v0 = vpack.c.bf16 %v1192_v21, %v1188_v31  ;;  %v6212_v47 = vpop.f32.mrb[95].mxu0 }
 0x270   : > { %4509 = vmatpush3.bf16.msra.mxu1 %v1656_v0 }
 0x271   : > { %4514 = vmatprep.subr.bf16.mxu1 %v7436_v57 }
 0x273   : > { %v6217_v26 = vpop.f32.mrb[96].mxu0 }
 0x274   : > { %7650 = vst [vmem:[#allocation57_spill] sm:$0xff] %v6217_v26  ;;  %v6219_v38 = vpop.f32.mrb[97].mxu0 }
 0x275   : > { %7651 = vst [vmem:[#allocation58_spill] sm:$0xff] %v6219_v38  ;;  %v6221_v24 = vpop.f32.mrb[98].mxu0 }
 0x276   : > { %7652 = vst [vmem:[#allocation59_spill] sm:$0xff] %v6221_v24  ;;  %v6225_v44 = vpop.f32.mrb[99].mxu0 }
 0x277   : > { %7653 = vst [vmem:[#allocation60_spill] sm:$0xff] %v6225_v44 }
 0x27b   : > { %v6229_v31 = vpop.f32.mrb[100].mxu0 }
 0x27c   : > { %7654 = vst [vmem:[#allocation61_spill] sm:$0xff] %v6229_v31  ;;  %v6231_v62 = vpop.f32.mrb[101].mxu0 }
 0x27d   : > { %7655 = vst [vmem:[#allocation62_spill] sm:$0xff] %v6231_v62  ;;  %v6233_v0 = vpop.f32.mrb[102].mxu0 }
 0x27e   : > { %7656 = vst [vmem:[#allocation63_spill] sm:$0xff] %v6233_v0  ;;  %v6237_v5 = vpop.f32.mrb[103].mxu0 }
 0x27f   : > { %7657 = vst [vmem:[#allocation64_spill] sm:$0xff] %v6237_v5 }
 0x283   : > { %v6241_v15 = vpop.f32.mrb[104].mxu0 }
 0x284   : > { %7658 = vst [vmem:[#allocation65_spill] sm:$0xff] %v6241_v15  ;;  %v6243_v43 = vpop.f32.mrb[105].mxu0 }
 0x285   : > { %7659 = vst [vmem:[#allocation66_spill] sm:$0xff] %v6243_v43  ;;  %v6245_v10 = vpop.f32.mrb[106].mxu0 }
 0x286   : > { %7660 = vst [vmem:[#allocation67_spill] sm:$0xff] %v6245_v10  ;;  %v6249_v59 = vpop.f32.mrb[107].mxu0 }
 0x287   : > { %7661 = vst [vmem:[#allocation68_spill] sm:$0xff] %v6249_v59 }
 0x28b   : > { %v6253_v57 = vpop.f32.mrb[108].mxu0 }
 0x28c   : > { %7662 = vst [vmem:[#allocation69_spill] sm:$0xff] %v6253_v57  ;;  %v6255_v38 = vpop.f32.mrb[109].mxu0 }
 0x28d   : > { %7663 = vst [vmem:[#allocation70_spill] sm:$0xff] %v6255_v38  ;;  %v6257_v44 = vpop.f32.mrb[110].mxu0 }
 0x28e   : > { %7664 = vst [vmem:[#allocation71_spill] sm:$0xff] %v6257_v44  ;;  %v6261_v62 = vpop.f32.mrb[111].mxu0 }
 0x28f   : > { %7665 = vst [vmem:[#allocation72_spill] sm:$0xff] %v6261_v62  ;;  %v7683_v62 = vmov 0.0  }
 0x293   : > { %v6265_v21 = vpop.f32.mrb[112].mxu0 }
 0x294   : > { %7666 = vst [vmem:[#allocation73_spill] sm:$0xff] %v6265_v21  ;;  %v6267_v45 = vpop.f32.mrb[113].mxu0 }
 0x295   : > { %7667 = vst [vmem:[#allocation74_spill] sm:$0xff] %v6267_v45  ;;  %v6269_v9 = vpop.f32.mrb[114].mxu0 }
 0x296   : > { %7668 = vst [vmem:[#allocation75_spill] sm:$0xff] %v6269_v9  ;;  %v6273_v43 = vpop.f32.mrb[115].mxu0 }
 0x297   : > { %7669 = vst [vmem:[#allocation76_spill] sm:$0xff] %v6273_v43 }
 0x29b   : > { %v6277_v13 = vpop.f32.mrb[116].mxu0 }
 0x29c   : > { %7670 = vst [vmem:[#allocation77_spill] sm:$0xff] %v6277_v13  ;;  %v6279_v32 = vpop.f32.mrb[117].mxu0 }
 0x29d   : > { %7671 = vst [vmem:[#allocation78_spill] sm:$0xff] %v6279_v32  ;;  %v6281_v6 = vpop.f32.mrb[118].mxu0 }
 0x29e   : > { %7672 = vst [vmem:[#allocation79_spill] sm:$0xff] %v6281_v6  ;;  %v6285_v38 = vpop.f32.mrb[119].mxu0 }
 0x29f   : > { %7673 = vst [vmem:[#allocation80_spill] sm:$0xff] %v6285_v38  ;;  %v7684_v38 = vpack.c.bf16 %v6170_v2, %v6168_v16  ;;  %v7693_v2 = vpack.c.bf16 %v6205_v50, %v6203_v29 }
 0x2a3   : > { %v6289_v53 = vpop.f32.mrb[120].mxu0 }
 0x2a4   : > { %7674 = vst [vmem:[#allocation81_spill] sm:$0xff] %v6289_v53  ;;  %v6291_v27 = vpop.f32.mrb[121].mxu0 }
 0x2a5   : > { %7675 = vst [vmem:[#allocation82_spill] sm:$0xff] %v6291_v27  ;;  %v6293_v58 = vpop.f32.mrb[122].mxu0 }
 0x2a6   : > { %7676 = vst [vmem:[#allocation83_spill] sm:$0xff] %v6293_v58  ;;  %v6297_v45 = vpop.f32.mrb[123].mxu0 }
 0x2a7   : > { %7677 = vst [vmem:[#allocation84_spill] sm:$0xff] %v6297_v45  ;;  %v7682_v45 = vpack.c.bf16 %v6159_v48, %v6157_v42 }
 0x2ab   : > { %v6301_v5 = vpop.f32.mrb[124].mxu0 }
 0x2ac   : > { %7678 = vst [vmem:[#allocation85_spill] sm:$0xff] %v6301_v5  ;;  %v6303_v22 = vpop.f32.mrb[125].mxu0 }
 0x2ad   : > { %7679 = vst [vmem:[#allocation86_spill] sm:$0xff] %v6303_v22  ;;  %v6305_v35 = vpop.f32.mrb[126].mxu0 }
 0x2ae   : > { %7680 = vst [vmem:[#allocation87_spill] sm:$0xff] %v6305_v35  ;;  %v6309_v32 = vpop.f32.mrb[127].mxu0 }
 0x2af   : > { %7681 = vst [vmem:[#allocation88_spill] sm:$0xff] %v6309_v32 }
 0x2b3   : > { %v2025_v59 = vpop.f32.mrb[128].mxu0 }
 0x2b4   : > { %v6313_v17 = vpop.f32.mrb[129].mxu0 }
 0x2b5   : > { %v2029_v1 = vpop.f32.mrb[130].mxu0 }
 0x2b6   : > { %v2163_v41 = vpack.c.bf16 %v2029_v1, %v2025_v59  ;;  %v6315_v43 = vpop.f32.mrb[131].mxu0  ;;  %v7685_v59 = vpack.c.bf16 %v6177_v19, %v6175_v34  ;;  %v7688_v1 = vpack.c.bf16 %v6184_v11, %v6182_v55  ;;  %v7691_v34 = vpack.c.bf16 %v6191_v52, %v6189_v4 }
 0x2b7   : > { %v7692_v11 = vpack.c.bf16 %v6198_v36, %v6196_v39  ;;  %v7694_v55 = vpack.c.bf16 %v6212_v47, %v6210_v61  ;;  %v2179_v52 = vlaneseq  ;;  %v6378_v61 = vpop.f32.mrb[0].mxu1 }
 0x2b8   : > { %4491 = vmatmul.mubr.bf16.vlgmr.msra.gmra.mrb[136].mxu0 %v2163_v41 }
 0x2b9   : > { %4535 = vmatpush3.bf16.msra.mxu0 %v7682_v45  ;;  %4550 = vmatprep.mubr.msk.bf16.mxu0 %vm5329_vm2, %v7683_v62  ;;  %v6365_v4 = vand.u32 127, %v2179_v52 }
 0x2ba   : > { %4536 = vmatprep.subr.bf16.mxu0 %v7683_v62 }
 0x2bb   : > { %vm2239_vm3 = vcmp.lt.s32.totalorder %v6365_v4, 8 }
 0x2bd   : > { %4537 = vmatpush3.bf16.msra.mxu0 %v7684_v38 }
 0x2be   : > { %4538 = vmatprep.subr.bf16.mxu0 %v7683_v62 }
 0x2c1   : > { %4539 = vmatpush3.bf16.msra.mxu0 %v7685_v59  ;;  %v6380_v59 = vpop.f32.mrb[1].mxu1 }
 0x2c2   : > { %4540 = vmatprep.subr.bf16.mxu0 %v7683_v62  ;;  %7695 = vst [vmem:[#allocation93_spill] sm:$0xff] %v6380_v59 }
 0x2c3   : > { %v6333_v41 = vpop.f32.mrb[132].mxu0 }
 0x2c4   : > { %7686 = vst [vmem:[#allocation89_spill] sm:$0xff] %v6333_v41  ;;  %v6335_v48 = vpop.f32.mrb[133].mxu0 }
 0x2c5   : > { %7687 = vst [vmem:[#allocation90_spill] sm:$0xff] %v6335_v48  ;;  %4541 = vmatpush3.bf16.msra.mxu0 %v7688_v1  ;;  %v6340_v42 = vpop.f32.mrb[134].mxu0  ;;  %v6382_v1 = vpop.f32.mrb[2].mxu1 }
 0x2c6   : > { %7689 = vst [vmem:[#allocation91_spill] sm:$0xff] %v6340_v42  ;;  %4542 = vmatprep.subr.bf16.mxu0 %v7683_v62  ;;  %v6345_v16 = vpop.f32.mrb[135].mxu0 }
 0x2c7   : > { %7690 = vst [vmem:[#allocation92_spill] sm:$0xff] %v6345_v16 }
 0x2c9   : > { %4543 = vmatpush3.bf16.msra.mxu0 %v7691_v34 }
 0x2ca   : > { %4544 = vmatprep.subr.bf16.mxu0 %v7683_v62 }
 0x2cd   : > { %4545 = vmatpush3.bf16.msra.mxu0 %v7692_v11  ;;  %v6386_v11 = vpop.f32.mrb[3].mxu1 }
 0x2ce   : > { %4546 = vmatprep.subr.bf16.mxu0 %v7683_v62  ;;  %7696 = vst [vmem:[#allocation94_spill] sm:$0xff] %v6386_v11 }
 0x2d1   : > { %4547 = vmatpush3.bf16.msra.mxu0 %v7693_v2 }
 0x2d2   : > { %4548 = vmatprep.subr.bf16.mxu0 %v7683_v62 }
 0x2d5   : > { %4549 = vmatpush3.bf16.msra.mxu0 %v7694_v55  ;;  %v6390_v55 = vpop.f32.mrb[4].mxu1 }
 0x2d6   : > { %4554 = vmatprep.subr.bf16.mxu0 %v7683_v62  ;;  %v6392_v52 = vpop.f32.mrb[5].mxu1 }
 0x2d7   : > { %7697 = vst [vmem:[#allocation95_spill] sm:$0xff] %v6392_v52 }
 0x38b   : > { %v2232_v36 = vpop.f32.mrb[136].mxu0 }
 0x38c   : > { %v4492_v39 = vpop.f32.mrb[137].mxu0  ;;  %v6370_v38 = vsel %vm2239_vm3, %v2232_v36, -1e+30  ;;  %v6394_v36 = vpop.f32.mrb[6].mxu1 }
 0x38d   : > { %2242 = vmax.xlane.f32.xlu0 %v6370_v38  ;;  %v2235_v50 = vpop.f32.mrb[138].mxu0 }
 0x38e   : > { %v4493_v29 = vpop.f32.mrb[139].mxu0  ;;  %v6375_v47 = vsel %vm2239_vm3, %v2235_v50, -1e+30  ;;  %v6398_v50 = vpop.f32.mrb[7].mxu1 }
 0x38f   : > { %7698 = vst [vmem:[#allocation96_spill] sm:$0xff] %v6398_v50  ;;  %v6402_v19 = vpop.f32.mrb[8].mxu1 }
 0x390   : > { %v6404_v45 = vpop.f32.mrb[9].mxu1 }
 0x391   : > { %2244 = vmax.xlane.f32.xlu0 %v6375_v47  ;;  %7699 = vst [vmem:[#allocation97_spill] sm:$0xff] %v6404_v45  ;;  %v6406_v34 = vpop.f32.mrb[10].mxu1 }
 0x392   : > { %v6410_v27 = vpop.f32.mrb[11].mxu1 }
 0x393   : > { %7700 = vst [vmem:[#allocation98_spill] sm:$0xff] %v6410_v27  ;;  %v6414_v39 = vpop.f32.mrb[12].mxu1 }
 0x394   : > { %v6416_v16 = vpop.f32.mrb[13].mxu1 }
 0x395   : > { %7701 = vst [vmem:[#allocation99_spill] sm:$0xff] %v6416_v16  ;;  %v6418_v22 = vpop.f32.mrb[14].mxu1 }
 0x396   : > { %v6422_v32 = vpop.f32.mrb[15].mxu1 }
 0x397   : > { %7702 = vst [vmem:[#allocation100_spill] sm:$0xff] %v6422_v32  ;;  %v6426_v2 = vpop.f32.mrb[16].mxu1 }
 0x398   : > { %v6428_v42 = vpop.f32.mrb[17].mxu1 }
 0x399   : > { %7703 = vst [vmem:[#allocation101_spill] sm:$0xff] %v6428_v42  ;;  %v6430_v54 = vpop.f32.mrb[18].mxu1 }
 0x39a   : > { %v6434_v37 = vpop.f32.mrb[19].mxu1 }
 0x39b   : > { %7704 = vst [vmem:[#allocation102_spill] sm:$0xff] %v6434_v37  ;;  %v6438_v29 = vpop.f32.mrb[20].mxu1 }
 0x39c   : > { %7705 = vst [vmem:[#allocation103_spill] sm:$0xff] %v6438_v29  ;;  %v6440_v63 = vpop.f32.mrb[21].mxu1 }
 0x39d   : > { %7706 = vst [vmem:[#allocation104_spill] sm:$0xff] %v6440_v63  ;;  %v6442_v7 = vpop.f32.mrb[22].mxu1 }
 0x39e   : > { %v6446_v5 = vpop.f32.mrb[23].mxu1 }
 0x39f   : > { %7707 = vst [vmem:[#allocation105_spill] sm:$0xff] %v6446_v5  ;;  %v6450_v48 = vpop.f32.mrb[24].mxu1 }
 0x3a0   : > { %7708 = vst [vmem:[#allocation106_spill] sm:$0xff] %v6450_v48  ;;  %v6452_v53 = vpop.f32.mrb[25].mxu1 }
 0x3a1   : > { %7709 = vst [vmem:[#allocation107_spill] sm:$0xff] %v6452_v53  ;;  %v6454_v58 = vpop.f32.mrb[26].mxu1 }
 0x3a2   : > { %7710 = vst [vmem:[#allocation108_spill] sm:$0xff] %v6454_v58  ;;  %v6458_v13 = vpop.f32.mrb[27].mxu1 }
 0x3a3   : > { %7711 = vst [vmem:[#allocation109_spill] sm:$0xff] %v6458_v13  ;;  %v6462_v41 = vpop.f32.mrb[28].mxu1 }
 0x3a4   : > { %7712 = vst [vmem:[#allocation110_spill] sm:$0xff] %v6462_v41  ;;  %v6464_v21 = vpop.f32.mrb[29].mxu1 }
 0x3a5   : > { %7713 = vst [vmem:[#allocation111_spill] sm:$0xff] %v6464_v21  ;;  %v6466_v9 = vpop.f32.mrb[30].mxu1 }
 0x3a6   : > { %7714 = vst [vmem:[#allocation112_spill] sm:$0xff] %v6466_v9  ;;  %v6470_v57 = vpop.f32.mrb[31].mxu1 }
 0x3a7   : > { %7715 = vst [vmem:[#allocation113_spill] sm:$0xff] %v6470_v57  ;;  %v6474_v49 = vpop.f32.mrb[32].mxu1 }
 0x3a8   : > { %7716 = vst [vmem:[#allocation114_spill] sm:$0xff] %v6474_v49  ;;  %v6476_v15 = vpop.f32.mrb[33].mxu1 }
 0x3a9   : > { %7717 = vst [vmem:[#allocation115_spill] sm:$0xff] %v6476_v15  ;;  %v6478_v10 = vpop.f32.mrb[34].mxu1 }
 0x3aa   : > { %7718 = vst [vmem:[#allocation116_spill] sm:$0xff] %v6478_v10  ;;  %v6482_v31 = vpop.f32.mrb[35].mxu1 }
 0x3ab   : > { %7719 = vst [vmem:[#allocation117_spill] sm:$0xff] %v6482_v31  ;;  %v6486_v35 = vpop.f32.mrb[36].mxu1 }
 0x3ac   : > { %7720 = vst [vmem:[#allocation118_spill] sm:$0xff] %v6486_v35  ;;  %v6488_v26 = vpop.f32.mrb[37].mxu1 }
 0x3ad   : > { %7721 = vst [vmem:[#allocation119_spill] sm:$0xff] %v6488_v26  ;;  %v6490_v24 = vpop.f32.mrb[38].mxu1 }
 0x3ae   : > { %7722 = vst [vmem:[#allocation120_spill] sm:$0xff] %v6490_v24  ;;  %v6494_v21 = vpop.f32.mrb[39].mxu1 }
 0x3af   : > { %7723 = vst [vmem:[#allocation121_spill] sm:$0xff] %v6494_v21  ;;  %v6498_v6 = vpop.f32.mrb[40].mxu1 }
 0x3b0   : > { %7724 = vst [vmem:[#allocation122_spill] sm:$0xff] %v6498_v6  ;;  %v6508_v57 = vpop.f32.mrb[41].mxu1 }
 0x3b1   : > { %7725 = vst [vmem:[#allocation123_spill] sm:$0xff] %v6508_v57  ;;  %v6510_v26 = vpop.f32.mrb[42].mxu1 }
 0x3b2   : > { %7726 = vst [vmem:[#allocation124_spill] sm:$0xff] %v6510_v26 }
 0x41a   : > { %v2243_v49 = vpop.xlane.xlu0 %2242 }
 0x41b   : > { %v2246_v10 = vsub.f32 %v6370_v38, %v2243_v49 }
 0x41d   : > { %v2248_v0 = vmul.f32 1.442695, %v2246_v10  ;;  %v6514_v10 = vpop.f32.mrb[43].mxu1 }
 0x41e   : > { %v2245_v15 = vpop.xlane.xlu0 %2244  ;;  %7727 = vst [vmem:[#allocation125_spill] sm:$0xff] %v6514_v10 }
 0x41f   : > { %4978 = vpow2.f32 %v2248_v0  ;;  %v2247_v31 = vsub.f32 %v6375_v47, %v2245_v15  ;;  %v6518_v15 = vpop.f32.mrb[44].mxu1 }
 0x420   : > { %7728 = vst [vmem:[#allocation126_spill] sm:$0xff] %v6518_v15 }
 0x421   : > { %v2250_v53 = vmul.f32 1.442695, %v2247_v31  ;;  %v6520_v31 = vpop.f32.mrb[45].mxu1 }
 0x422   : > { %7729 = vst [vmem:[#allocation127_spill] sm:$0xff] %v6520_v31  ;;  %v6522_v0 = vpop.f32.mrb[46].mxu1 }
 0x423   : > { %4980 = vpow2.f32 %v2250_v53  ;;  %7730 = vst [vmem:[#allocation128_spill] sm:$0xff] %v6522_v0  ;;  %v6526_v47 = vpop.f32.mrb[47].mxu1 }
 0x424   : > { %7731 = vst [vmem:[#allocation129_spill] sm:$0xff] %v6526_v47  ;;  %v6530_v49 = vpop.f32.mrb[48].mxu1 }
 0x425   : > { %7732 = vst [vmem:[#allocation130_spill] sm:$0xff] %v6530_v49  ;;  %v6532_v6 = vpop.f32.mrb[49].mxu1 }
 0x426   : > { %7733 = vst [vmem:[#allocation131_spill] sm:$0xff] %v6532_v6  ;;  %v6534_v26 = vpop.f32.mrb[50].mxu1 }
 0x427   : > { %7734 = vst [vmem:[#allocation132_spill] sm:$0xff] %v6534_v26  ;;  %v6538_v57 = vpop.f32.mrb[51].mxu1 }
 0x428   : > { %7735 = vst [vmem:[#allocation133_spill] sm:$0xff] %v6538_v57  ;;  %v6542_v38 = vpop.f32.mrb[52].mxu1 }
 0x429   : > { %v6502_v13 = vpop.eup %4978  ;;  %7736 = vst [vmem:[#allocation134_spill] sm:$0xff] %v6542_v38  ;;  %v6544_v15 = vpop.f32.mrb[53].mxu1 }
 0x42a   : > { %2252 = vadd.xlane.f32.xlu1 %v6502_v13  ;;  %7737 = vst [vmem:[#allocation135_spill] sm:$0xff] %v6544_v15  ;;  %v6546_v0 = vpop.f32.mrb[54].mxu1 }
 0x42b   : > { %7738 = vst [vmem:[#allocation136_spill] sm:$0xff] %v6546_v0  ;;  %v6550_v31 = vpop.f32.mrb[55].mxu1 }
 0x42c   : > { %7739 = vst [vmem:[#allocation137_spill] sm:$0xff] %v6550_v31  ;;  %v6554_v53 = vpop.f32.mrb[56].mxu1 }
 0x42d   : > { %v6505_v44 = vpop.eup %4980  ;;  %7740 = vst [vmem:[#allocation138_spill] sm:$0xff] %v6554_v53  ;;  %v6556_v49 = vpop.f32.mrb[57].mxu1 }
 0x42e   : > { %2254 = vadd.xlane.f32.xlu1 %v6505_v44  ;;  %7741 = vst [vmem:[#allocation139_spill] sm:$0xff] %v6556_v49  ;;  %v6558_v26 = vpop.f32.mrb[58].mxu1 }
 0x42f   : > { %7742 = vst [vmem:[#allocation140_spill] sm:$0xff] %v6558_v26  ;;  %v6562_v6 = vpop.f32.mrb[59].mxu1 }
 0x430   : > { %7743 = vst [vmem:[#allocation141_spill] sm:$0xff] %v6562_v6  ;;  %v6566_v21 = vpop.f32.mrb[60].mxu1 }
 0x431   : > { %7744 = vst [vmem:[#allocation142_spill] sm:$0xff] %v6566_v21  ;;  %v6568_v38 = vpop.f32.mrb[61].mxu1 }
 0x432   : > { %7745 = vst [vmem:[#allocation143_spill] sm:$0xff] %v6568_v38  ;;  %v6570_v0 = vpop.f32.mrb[62].mxu1 }
 0x433   : > { %7746 = vst [vmem:[#allocation144_spill] sm:$0xff] %v6570_v0  ;;  %v6574_v15 = vpop.f32.mrb[63].mxu1 }
 0x434   : > { %7747 = vst [vmem:[#allocation145_spill] sm:$0xff] %v6574_v15  ;;  %v6578_v10 = vpop.f32.mrb[64].mxu1 }
 0x435   : > { %v6580_v53 = vpop.f32.mrb[65].mxu1 }
 0x436   : > { %7748 = vst [vmem:[#allocation146_spill] sm:$0xff] %v6580_v53  ;;  %v6582_v26 = vpop.f32.mrb[66].mxu1 }
 0x437   : > { %v6586_v49 = vpop.f32.mrb[67].mxu1 }
 0x438   : > { %7749 = vst [vmem:[#allocation147_spill] sm:$0xff] %v6586_v49  ;;  %v6590_v47 = vpop.f32.mrb[68].mxu1 }
 0x439   : > { %v6592_v21 = vpop.f32.mrb[69].mxu1 }
 0x43a   : > { %7750 = vst [vmem:[#allocation148_spill] sm:$0xff] %v6592_v21  ;;  %v6594_v0 = vpop.f32.mrb[70].mxu1 }
 0x43b   : > { %v6598_v38 = vpop.f32.mrb[71].mxu1 }
 0x43c   : > { %7751 = vst [vmem:[#allocation149_spill] sm:$0xff] %v6598_v38  ;;  %v6602_v57 = vpop.f32.mrb[72].mxu1 }
 0x43d   : > { %v6604_v35 = vpop.f32.mrb[73].mxu1 }
 0x43e   : > { %7752 = vst [vmem:[#allocation150_spill] sm:$0xff] %v6604_v35  ;;  %v6606_v24 = vpop.f32.mrb[74].mxu1 }
 0x43f   : > { %v6610_v63 = vpop.f32.mrb[75].mxu1 }
 0x440   : > { %7753 = vst [vmem:[#allocation151_spill] sm:$0xff] %v6610_v63  ;;  %v6614_v31 = vpop.f32.mrb[76].mxu1 }
 0x441   : > { %v6616_v42 = vpop.f32.mrb[77].mxu1 }
 0x442   : > { %7754 = vst [vmem:[#allocation152_spill] sm:$0xff] %v6616_v42  ;;  %v6618_v37 = vpop.f32.mrb[78].mxu1 }
 0x443   : > { %v6622_v16 = vpop.f32.mrb[79].mxu1 }
 0x444   : > { %7755 = vst [vmem:[#allocation153_spill] sm:$0xff] %v6622_v16  ;;  %v6626_v6 = vpop.f32.mrb[80].mxu1 }
 0x445   : > { %v6628_v45 = vpop.f32.mrb[81].mxu1 }
 0x446   : > { %7756 = vst [vmem:[#allocation154_spill] sm:$0xff] %v6628_v45  ;;  %v6630_v27 = vpop.f32.mrb[82].mxu1 }
 0x447   : > { %v6634_v52 = vpop.f32.mrb[83].mxu1 }
 0x448   : > { %7757 = vst [vmem:[#allocation155_spill] sm:$0xff] %v6634_v52  ;;  %v6638_v15 = vpop.f32.mrb[84].mxu1 }
 0x449   : > { %v6640_v59 = vpop.f32.mrb[85].mxu1 }
 0x44a   : > { %7758 = vst [vmem:[#allocation156_spill] sm:$0xff] %v6640_v59  ;;  %v6642_v11 = vpop.f32.mrb[86].mxu1 }
 0x44b   : > { %v6646_v42 = vpop.f32.mrb[87].mxu1 }
 0x44c   : > { %7759 = vst [vmem:[#allocation157_spill] sm:$0xff] %v6646_v42  ;;  %v6650_v5 = vpop.f32.mrb[88].mxu1 }
 0x44d   : > { %v6652_v35 = vpop.f32.mrb[89].mxu1 }
 0x44e   : > { %7760 = vst [vmem:[#allocation158_spill] sm:$0xff] %v6652_v35  ;;  %v6654_v63 = vpop.f32.mrb[90].mxu1 }
 0x44f   : > { %v6658_v45 = vpop.f32.mrb[91].mxu1 }
 0x450   : > { %7761 = vst [vmem:[#allocation159_spill] sm:$0xff] %v6658_v45  ;;  %v6662_v32 = vpop.f32.mrb[92].mxu1 }
 0x451   : > { %v6664_v21 = vpop.f32.mrb[93].mxu1 }
 0x452   : > { %7762 = vst [vmem:[#allocation160_spill] sm:$0xff] %v6664_v21  ;;  %v6666_v38 = vpop.f32.mrb[94].mxu1 }
 0x453   : > { %v6670_v59 = vpop.f32.mrb[95].mxu1 }
 0x454   : > { %7763 = vst [vmem:[#allocation161_spill] sm:$0xff] %v6670_v59  ;;  %v6674_v50 = vpop.f32.mrb[96].mxu1 }
 0x455   : > { %7764 = vst [vmem:[#allocation162_spill] sm:$0xff] %v6674_v50  ;;  %v6676_v53 = vpop.f32.mrb[97].mxu1 }
 0x456   : > { %7765 = vst [vmem:[#allocation163_spill] sm:$0xff] %v6676_v53  ;;  %v6678_v49 = vpop.f32.mrb[98].mxu1 }
 0x457   : > { %7766 = vst [vmem:[#allocation164_spill] sm:$0xff] %v6678_v49  ;;  %v6682_v35 = vpop.f32.mrb[99].mxu1 }
 0x458   : > { %7767 = vst [vmem:[#allocation165_spill] sm:$0xff] %v6682_v35  ;;  %v6686_v16 = vpop.f32.mrb[100].mxu1 }
 0x459   : > { %7768 = vst [vmem:[#allocation166_spill] sm:$0xff] %v6686_v16  ;;  %v6688_v41 = vpop.f32.mrb[101].mxu1 }
 0x45a   : > { %7769 = vst [vmem:[#allocation167_spill] sm:$0xff] %v6688_v41  ;;  %v6690_v9 = vpop.f32.mrb[102].mxu1 }
 0x45b   : > { %7770 = vst [vmem:[#allocation168_spill] sm:$0xff] %v6690_v9  ;;  %v6694_v21 = vpop.f32.mrb[103].mxu1 }
 0x45c   : > { %7771 = vst [vmem:[#allocation169_spill] sm:$0xff] %v6694_v21  ;;  %v6698_v52 = vpop.f32.mrb[104].mxu1 }
 0x45d   : > { %7772 = vst [vmem:[#allocation170_spill] sm:$0xff] %v6698_v52  ;;  %v6700_v50 = vpop.f32.mrb[105].mxu1 }
 0x45e   : > { %7773 = vst [vmem:[#allocation171_spill] sm:$0xff] %v6700_v50  ;;  %v6702_v49 = vpop.f32.mrb[106].mxu1 }
 0x45f   : > { %7774 = vst [vmem:[#allocation172_spill] sm:$0xff] %v6702_v49  ;;  %v6706_v53 = vpop.f32.mrb[107].mxu1 }
 0x460   : > { %7775 = vst [vmem:[#allocation173_spill] sm:$0xff] %v6706_v53  ;;  %v6710_v42 = vpop.f32.mrb[108].mxu1 }
 0x461   : > { %7776 = vst [vmem:[#allocation174_spill] sm:$0xff] %v6710_v42  ;;  %v6712_v16 = vpop.f32.mrb[109].mxu1 }
 0x462   : > { %7777 = vst [vmem:[#allocation175_spill] sm:$0xff] %v6712_v16  ;;  %v6714_v9 = vpop.f32.mrb[110].mxu1 }
 0x463   : > { %7778 = vst [vmem:[#allocation176_spill] sm:$0xff] %v6714_v9  ;;  %v6718_v41 = vpop.f32.mrb[111].mxu1 }
 0x464   : > { %7779 = vst [vmem:[#allocation177_spill] sm:$0xff] %v6718_v41  ;;  %v6722_v52 = vpop.f32.mrb[112].mxu1 }
 0x465   : > { %7780 = vst [vmem:[#allocation178_spill] sm:$0xff] %v6722_v52  ;;  %v6724_v49 = vpop.f32.mrb[113].mxu1 }
 0x466   : > { %7781 = vst [vmem:[#allocation179_spill] sm:$0xff] %v6724_v49  ;;  %v6726_v35 = vpop.f32.mrb[114].mxu1 }
 0x467   : > { %7782 = vst [vmem:[#allocation180_spill] sm:$0xff] %v6726_v35  ;;  %v6730_v53 = vpop.f32.mrb[115].mxu1 }
 0x468   : > { %7783 = vst [vmem:[#allocation181_spill] sm:$0xff] %v6730_v53  ;;  %v6734_v42 = vpop.f32.mrb[116].mxu1  ;;  %v7796_v53 = vpack.c.bf16 %v5960_v33, %v5954_v30  ;;  %v7803_v30 = vpack.c.bf16 %v6606_v24, %v6602_v57  ;;  %v7804_v33 = vpack.c.bf16 %v6618_v37, %v6614_v31 }
 0x469   : > { %7784 = vst [vmem:[#allocation182_spill] sm:$0xff] %v6734_v42  ;;  %v6736_v45 = vpop.f32.mrb[117].mxu1 }
 0x46a   : > { %7785 = vst [vmem:[#allocation183_spill] sm:$0xff] %v6736_v45  ;;  %v6738_v16 = vpop.f32.mrb[118].mxu1 }
 0x46b   : > { %7786 = vst [vmem:[#allocation184_spill] sm:$0xff] %v6738_v16 }
 0x4b7   : > { %v2253_v21 = vpop.xlane.xlu1 %2252 }
 0x4b8   : > { %4982 = vrcp.f32 %v2253_v21  ;;  %v6742_v21 = vpop.f32.mrb[119].mxu1 }
 0x4b9   : > { %7787 = vst [vmem:[#allocation185_spill] sm:$0xff] %v6742_v21  ;;  %v6746_v52 = vpop.f32.mrb[120].mxu1 }
 0x4ba   : > { %7788 = vst [vmem:[#allocation186_spill] sm:$0xff] %v6746_v52  ;;  %v6748_v35 = vpop.f32.mrb[121].mxu1 }
 0x4bb   : > { %v2255_v48 = vpop.xlane.xlu1 %2254  ;;  %7789 = vst [vmem:[#allocation187_spill] sm:$0xff] %v6748_v35  ;;  %v6750_v59 = vpop.f32.mrb[122].mxu1 }
 0x4bc   : > { %4984 = vrcp.f32 %v2255_v48  ;;  %7790 = vst [vmem:[#allocation188_spill] sm:$0xff] %v6750_v59  ;;  %v6754_v49 = vpop.f32.mrb[123].mxu1 }
 0x4bd   : > { %7791 = vst [vmem:[#allocation189_spill] sm:$0xff] %v6754_v49  ;;  %v6758_v41 = vpop.f32.mrb[124].mxu1 }
 0x4be   : > { %v6760_v16 = vpop.f32.mrb[125].mxu1 }
 0x4bf   : > { %v6762_v50 = vpop.f32.mrb[126].mxu1 }
 0x4c0   : > { %v6766_v9 = vpop.f32.mrb[127].mxu1 }
 0x4c1   : > { %v6772_v35 = vpop.f32.mrb[128].mxu1 }
 0x4c2   : > { %v4983_v42 = vpop.eup %4982  ;;  %v6774_v49 = vpop.f32.mrb[129].mxu1 }
 0x4c3   : > { %v2258_v48 = vmul.f32 %v4983_v42, %v6502_v13  ;;  %v6776_v58 = vpop.f32.mrb[130].mxu1  ;;  %v7792_v42 = vpack.c.bf16 %v5888_v12, %v5880_v8  ;;  %v7793_v8 = vpack.c.bf16 %v5906_v18, %v5900_v14  ;;  %v7794_v12 = vpack.c.bf16 %v5924_v23, %v5918_v20 }
 0x4c4   : > { %v2165_v29 = vpack.c.bf16 %v6776_v58, %v6772_v35  ;;  %v6780_v21 = vpop.f32.mrb[131].mxu1  ;;  %v7797_v14 = vpack.c.bf16 %v5984_v56, %v5974_v40  ;;  %v7798_v18 = vpack.c.bf16 %v6002_v3, %v5996_v60  ;;  %v7799_v20 = vpack.c.bf16 %v6019_v51, %v6013_v46  ;;  %v7831_v35 = vld [vmem:[#allocation153_spill] sm:$0xff]  ;;  %v7832_v58 = vld [vmem:[#allocation152_spill] sm:$0xff] }
 0x4c5   : > { %v2166_v13 = vpack.c.bf16 %v6780_v21, %v6774_v49  ;;  %v7800_v23 = vpack.c.bf16 %v6315_v43, %v6313_v17  ;;  %v7805_v40 = vpack.c.bf16 %v6630_v27, %v6626_v6  ;;  %v7806_v56 = vpack.c.bf16 %v6642_v11, %v6638_v15  ;;  %v7879_v49 = vld [vmem:[#allocation71_spill] sm:$0xff]  ;;  %v7880_v21 = vld [vmem:[#allocation69_spill] sm:$0xff] }
 0x4c6   : > { %v4985_v45 = vpop.eup %4984  ;;  %v7807_v60 = vpack.c.bf16 %v6654_v63, %v6650_v5  ;;  %v7808_v3 = vpack.c.bf16 %v6666_v38, %v6662_v32 }
 0x4c7   : > { %v2259_v52 = vmul.f32 %v4985_v45, %v6505_v44  ;;  %v6784_v44 = vpop.f32.mrb[132].mxu1 }
 0x4c8   : > { %v6791_v45 = vpop.f32.mrb[133].mxu1 }
 0x4c9   : > { %v2260_v59 = vpack.c.bf16 %v2259_v52, %v2258_v48  ;;  %v6794_v52 = vpop.f32.mrb[134].mxu1 }
 0x4ca   : > { %v6798_v48 = vpop.f32.mrb[135].mxu1 }
 0x4cb   : > { %4511 = vmatmul.mubr.bf16.vlgmr.msra.gmra.mrb[136].mxu1 %v2260_v59  ;;  %v2169_v59 = vpack.c.bf16 %v6794_v52, %v6784_v44  ;;  %v8027_v44 = vld [vmem:[#allocation177_spill] sm:$0xff]  ;;  %v8028_v52 = vld [vmem:[#allocation175_spill] sm:$0xff] }
 0x4cc   : > { %4515 = vmatpush3.bf16.xpose.msra.mxu1 %v7792_v42  ;;  %4530 = vmatprep.mubr.msk.bf16.mxu1 %vm5329_vm2, %v7683_v62  ;;  %v7795_v42 = vpack.c.bf16 %v5942_v28, %v5936_v25  ;;  %v7801_v25 = vpack.c.bf16 %v6582_v26, %v6578_v10  ;;  %v7802_v28 = vpack.c.bf16 %v6594_v0, %v6590_v47 }
 0x4cd   : > { %4516 = vmatprep.subr.bf16.mxu1 %v7683_v62 }
 0x4d4   : > { %4517 = vmatpush3.bf16.xpose.msra.mxu1 %v7793_v8 }
 0x4d5   : > { %4518 = vmatprep.subr.bf16.mxu1 %v7683_v62 }
 0x4dc   : > { %4519 = vmatpush3.bf16.xpose.msra.mxu1 %v7794_v12 }
 0x4dd   : > { %4520 = vmatprep.subr.bf16.mxu1 %v7683_v62 }
 0x4e4   : > { %4521 = vmatpush3.bf16.xpose.msra.mxu1 %v7795_v42 }
 0x4e5   : > { %4522 = vmatprep.subr.bf16.mxu1 %v7683_v62 }
 0x4ec   : > { %4523 = vmatpush3.bf16.xpose.msra.mxu1 %v7796_v53 }
 0x4ed   : > { %4524 = vmatprep.subr.bf16.mxu1 %v7683_v62 }
 0x4f4   : > { %4525 = vmatpush3.bf16.xpose.msra.mxu1 %v7797_v14 }
 0x4f5   : > { %4526 = vmatprep.subr.bf16.mxu1 %v7683_v62 }
 0x4fc   : > { %4527 = vmatpush3.bf16.xpose.msra.mxu1 %v7798_v18 }
 0x4fd   : > { %4528 = vmatprep.subr.bf16.mxu1 %v7683_v62 }
 0x504   : > { %4529 = vmatpush3.bf16.xpose.msra.mxu1 %v7799_v20  ;;  %v7809_v20 = vpack.c.bf16 %v6382_v1, %v6378_v61  ;;  %v7812_v61 = vpack.c.bf16 %v6418_v22, %v6414_v39  ;;  %v7813_v1 = vpack.c.bf16 %v6430_v54, %v6426_v2  ;;  %v7819_v22 = vld [vmem:[#allocation112_spill] sm:$0xff]  ;;  %v7820_v39 = vld [vmem:[#allocation110_spill] sm:$0xff] }
 0x505   : > { %4574 = vmatprep.subr.bf16.mxu1 %v7683_v62  ;;  %v7823_v54 = vld [vmem:[#allocation146_spill] sm:$0xff] }
 0x50b   : > { %4531 = vmatmul.mubr.bf16.vlgmr.msra.gmra.mrb[140].mxu1 %v7800_v23  ;;  %v7810_v23 = vpack.c.bf16 %v6394_v36, %v6390_v55  ;;  %v7814_v55 = vld [vmem:[#allocation103_spill] sm:$0xff] }
 0x50c   : > { %4575 = vmatpush3.bf16.msra.mxu1 %v7801_v25  ;;  %4590 = vmatprep.mubr.msk.bf16.mxu1 %vm5329_vm2, %v7683_v62  ;;  %v7811_v25 = vpack.c.bf16 %v6406_v34, %v6402_v19  ;;  %v7815_v36 = vpack.c.bf16 %v6442_v7, %v7814_v55  ;;  %v7816_v19 = vld [vmem:[#allocation108_spill] sm:$0xff]  ;;  %v7817_v34 = vld [vmem:[#allocation106_spill] sm:$0xff]  ;;  %v7822_v7 = vld [vmem:[#allocation147_spill] sm:$0xff] }
 0x50d   : > { %4576 = vmatprep.subr.bf16.mxu1 %v7683_v62  ;;  %v7824_v2 = vpack.c.bf16 %v7822_v7, %v7823_v54 }
 0x510   : > { %4577 = vmatpush3.bf16.msra.mxu1 %v7802_v28  ;;  %v7818_v28 = vpack.c.bf16 %v7816_v19, %v7817_v34 }
 0x511   : > { %4578 = vmatprep.subr.bf16.mxu1 %v7683_v62 }
 0x514   : > { %4579 = vmatpush3.bf16.msra.mxu1 %v7803_v30  ;;  %v7821_v30 = vpack.c.bf16 %v7819_v22, %v7820_v39 }
 0x515   : > { %4580 = vmatprep.subr.bf16.mxu1 %v7683_v62 }
 0x518   : > { %4581 = vmatpush3.bf16.msra.mxu1 %v7804_v33  ;;  %v7825_v33 = vld [vmem:[#allocation149_spill] sm:$0xff] }
 0x519   : > { %4582 = vmatprep.subr.bf16.mxu1 %v7683_v62 }
 0x51c   : > { %4583 = vmatpush3.bf16.msra.mxu1 %v7805_v40  ;;  %v7826_v40 = vld [vmem:[#allocation148_spill] sm:$0xff] }
 0x51d   : > { %4584 = vmatprep.subr.bf16.mxu1 %v7683_v62 }
 0x520   : > { %4585 = vmatpush3.bf16.msra.mxu1 %v7806_v56  ;;  %v7827_v56 = vpack.c.bf16 %v7825_v33, %v7826_v40  ;;  %v7846_v33 = vld [vmem:[#allocation94_spill] sm:$0xff]  ;;  %v7847_v40 = vld [vmem:[#allocation93_spill] sm:$0xff] }
 0x521   : > { %4586 = vmatprep.subr.bf16.mxu1 %v7683_v62 }
 0x524   : > { %4587 = vmatpush3.bf16.msra.mxu1 %v7807_v60  ;;  %v7828_v60 = vld [vmem:[#allocation151_spill] sm:$0xff] }
 0x525   : > { %4588 = vmatprep.subr.bf16.mxu1 %v7683_v62 }
 0x528   : > { %4589 = vmatpush3.bf16.msra.mxu1 %v7808_v3  ;;  %v7829_v3 = vld [vmem:[#allocation150_spill] sm:$0xff] }
 0x529   : > { %4594 = vmatprep.subr.bf16.mxu1 %v7683_v62 }
 0x59e   : > { %v6867_v46 = vpop.f32.mrb[136].mxu1 }
 0x59f   : > { %v4512_v51 = vpop.f32.mrb[137].mxu1 }
 0x5a0   : > { %v6869_v57 = vpop.f32.mrb[138].mxu1  ;;  %v7830_v51 = vpack.c.bf16 %v7828_v60, %v7829_v3  ;;  %v7849_v60 = vld [vmem:[#allocation96_spill] sm:$0xff]  ;;  %v7850_v3 = vld [vmem:[#allocation95_spill] sm:$0xff] }
 0x5a1   : > { %v2302_v37 = vpack.c.bf16 %v6869_v57, %v6867_v46  ;;  %v4513_v43 = vpop.f32.mrb[139].mxu1  ;;  %v4956_v46 = vld [vmem:[#allocation13 + $0x168] sm:$0xff]  }
 0x5a2   : > { %v7834_v43 = vld [vmem:[#allocation155_spill] sm:$0xff]  ;;  %v4957_v57 = vld [vmem:[#allocation13 + $0x128] sm:$0xff]  }
 0x5de   : > { %v2355_v6 = vpop.f32.mrb[140].mxu1 }
 0x5df   : > { %v4532_v63 = vpop.f32.mrb[141].mxu1  ;;  %v2362_v5 = vsel %vm2239_vm3, %v2355_v6, -1e+30  ;;  %v7835_v6 = vld [vmem:[#allocation154_spill] sm:$0xff] }
 0x5e0   : > { %2364 = vmax.xlane.f32.xlu0 %v2362_v5  ;;  %v2358_v17 = vpop.f32.mrb[142].mxu1  ;;  %v7836_v63 = vpack.c.bf16 %v7834_v43, %v7835_v6  ;;  %v7855_v43 = vld [vmem:[#allocation100_spill] sm:$0xff]  ;;  %v7856_v6 = vld [vmem:[#allocation99_spill] sm:$0xff] }
 0x5e1   : > { %v4533_v27 = vpop.f32.mrb[143].mxu1  ;;  %v2363_v32 = vsel %vm2239_vm3, %v2358_v17, -1e+30  ;;  %v7838_v17 = vld [vmem:[#allocation156_spill] sm:$0xff] }
 0x5e2   : > { %2366 = vmax.xlane.f32.xlu1 %v2363_v32 }
 0x66d   : > { %v2365_v26 = vpop.xlane.xlu0 %2364 }
 0x66e   : > { %v2368_v24 = vsub.f32 %v2362_v5, %v2365_v26  ;;  %v7837_v5 = vld [vmem:[#allocation157_spill] sm:$0xff]  ;;  %v7841_v26 = vld [vmem:[#allocation158_spill] sm:$0xff] }
 0x66f   : > { %v2367_v11 = vpop.xlane.xlu1 %2366  ;;  %v7839_v27 = vpack.c.bf16 %v7837_v5, %v7838_v17  ;;  %v7858_v5 = vld [vmem:[#allocation102_spill] sm:$0xff]  ;;  %v7859_v17 = vld [vmem:[#allocation101_spill] sm:$0xff] }
 0x670   : > { %v2370_v10 = vmul.f32 1.442695, %v2368_v24  ;;  %v2369_v53 = vsub.f32 %v2363_v32, %v2367_v11  ;;  %v7840_v32 = vld [vmem:[#allocation159_spill] sm:$0xff]  ;;  %v7843_v11 = vld [vmem:[#allocation161_spill] sm:$0xff] }
 0x671   : > { %v7842_v24 = vpack.c.bf16 %v7840_v32, %v7841_v26  ;;  %v7861_v32 = vld [vmem:[#allocation105_spill] sm:$0xff]  ;;  %v7862_v26 = vld [vmem:[#allocation104_spill] sm:$0xff] }
 0x672   : > { %4986 = vpow2.f32 %v2370_v10  ;;  %v2372_v15 = vmul.f32 1.442695, %v2369_v53  ;;  %v7844_v10 = vld [vmem:[#allocation160_spill] sm:$0xff] }
 0x673   : > { %v7845_v53 = vpack.c.bf16 %v7843_v11, %v7844_v10  ;;  %v7864_v11 = vld [vmem:[#allocation109_spill] sm:$0xff]  ;;  %v7865_v10 = vld [vmem:[#allocation107_spill] sm:$0xff] }
 0x674   : > { %4988 = vpow2.f32 %v2372_v15 }
 0x67c   : > { %v4987_v31 = vpop.eup %4986 }
 0x67d   : > { %2374 = vadd.xlane.f32.xlu0 %v4987_v31 }
 0x67e   : > { %v4989_v0 = vpop.eup %4988 }
 0x67f   : > { %2376 = vadd.xlane.f32.xlu1 %v4989_v0 }
 0x70a   : > { %v2375_v38 = vpop.xlane.xlu0 %2374 }
 0x70b   : > { %4990 = vrcp.f32 %v2375_v38 }
 0x70c   : > { %v2377_v47 = vpop.xlane.xlu1 %2376 }
 0x70d   : > { %4992 = vrcp.f32 %v2377_v47 }
 0x715   : > { %v4991_v8 = vpop.eup %4990 }
 0x716   : > { %v2380_v42 = vmul.f32 %v4991_v8, %v4987_v31 }
 0x717   : > { %v4993_v12 = vpop.eup %4992 }
 0x718   : > { %v2381_v14 = vmul.f32 %v4993_v12, %v4989_v0 }
 0x71a   : > { %v2382_v18 = vpack.c.bf16 %v2381_v14, %v2380_v42 }
 0x71c   : > { %4551 = vmatmul.mubr.bf16.vlgmr.msra.gmra.mrb[140].mxu0 %v2382_v18 }
 0x71d   : > { %4555 = vmatpush3.bf16.xpose.msra.mxu0 %v7809_v20  ;;  %4570 = vmatprep.mubr.msk.bf16.mxu0 %vm5329_vm2, %v7683_v62 }
 0x71e   : > { %4556 = vmatprep.subr.bf16.mxu0 %v7683_v62 }
 0x725   : > { %4557 = vmatpush3.bf16.xpose.msra.mxu0 %v7810_v23 }
 0x726   : > { %4558 = vmatprep.subr.bf16.mxu0 %v7683_v62 }
 0x72d   : > { %4559 = vmatpush3.bf16.xpose.msra.mxu0 %v7811_v25 }
 0x72e   : > { %4560 = vmatprep.subr.bf16.mxu0 %v7683_v62 }
 0x735   : > { %4561 = vmatpush3.bf16.xpose.msra.mxu0 %v7812_v61 }
 0x736   : > { %4562 = vmatprep.subr.bf16.mxu0 %v7683_v62 }
 0x73d   : > { %4563 = vmatpush3.bf16.xpose.msra.mxu0 %v7813_v1 }
 0x73e   : > { %4564 = vmatprep.subr.bf16.mxu0 %v7683_v62 }
 0x745   : > { %4565 = vmatpush3.bf16.xpose.msra.mxu0 %v7815_v36 }
 0x746   : > { %4566 = vmatprep.subr.bf16.mxu0 %v7683_v62 }
 0x74d   : > { %4567 = vmatpush3.bf16.xpose.msra.mxu0 %v7818_v28 }
 0x74e   : > { %4568 = vmatprep.subr.bf16.mxu0 %v7683_v62 }
 0x755   : > { %4569 = vmatpush3.bf16.xpose.msra.mxu0 %v7821_v30 }
 0x756   : > { %4614 = vmatprep.subr.bf16.mxu0 %v7683_v62 }
 0x75c   : > { %4571 = vmatmul.mubr.bf16.vlgmr.msra.gmra.mrb[144].mxu0 %v2165_v29  ;;  %v7833_v29 = vpack.c.bf16 %v7831_v35, %v7832_v58  ;;  %v7852_v35 = vld [vmem:[#allocation98_spill] sm:$0xff]  ;;  %v7853_v58 = vld [vmem:[#allocation97_spill] sm:$0xff] }
 0x75d   : > { %4615 = vmatpush3.bf16.msra.mxu0 %v7824_v2  ;;  %4630 = vmatprep.mubr.msk.bf16.mxu0 %vm5329_vm2, %v7683_v62 }
 0x75e   : > { %4616 = vmatprep.subr.bf16.mxu0 %v7683_v62 }
 0x761   : > { %4617 = vmatpush3.bf16.msra.mxu0 %v7827_v56  ;;  %v7848_v56 = vpack.c.bf16 %v7846_v33, %v7847_v40 }
 0x762   : > { %4618 = vmatprep.subr.bf16.mxu0 %v7683_v62 }
 0x765   : > { %4619 = vmatpush3.bf16.msra.mxu0 %v7830_v51  ;;  %v7851_v51 = vpack.c.bf16 %v7849_v60, %v7850_v3 }
 0x766   : > { %4620 = vmatprep.subr.bf16.mxu0 %v7683_v62 }
 0x769   : > { %4621 = vmatpush3.bf16.msra.mxu0 %v7833_v29  ;;  %v7854_v29 = vpack.c.bf16 %v7852_v35, %v7853_v58 }
 0x76a   : > { %4622 = vmatprep.subr.bf16.mxu0 %v7683_v62 }
 0x76d   : > { %4623 = vmatpush3.bf16.msra.mxu0 %v7836_v63  ;;  %v7857_v63 = vpack.c.bf16 %v7855_v43, %v7856_v6 }
 0x76e   : > { %4624 = vmatprep.subr.bf16.mxu0 %v7683_v62 }
 0x771   : > { %4625 = vmatpush3.bf16.msra.mxu0 %v7839_v27  ;;  %v7860_v27 = vpack.c.bf16 %v7858_v5, %v7859_v17 }
 0x772   : > { %4626 = vmatprep.subr.bf16.mxu0 %v7683_v62 }
 0x775   : > { %4627 = vmatpush3.bf16.msra.mxu0 %v7842_v24  ;;  %v7863_v24 = vpack.c.bf16 %v7861_v32, %v7862_v26 }
 0x776   : > { %4628 = vmatprep.subr.bf16.mxu0 %v7683_v62 }
 0x779   : > { %4629 = vmatpush3.bf16.msra.mxu0 %v7845_v53  ;;  %v7866_v53 = vpack.c.bf16 %v7864_v11, %v7865_v10 }
 0x77a   : > { %4634 = vmatprep.subr.bf16.mxu0 %v7683_v62 }
 0x7ef   : > { %v6948_v15 = vpop.f32.mrb[140].mxu0 }
 0x7f0   : > { %v4552_v31 = vpop.f32.mrb[141].mxu0 }
 0x7f1   : > { %v6950_v0 = vpop.f32.mrb[142].mxu0  ;;  %v7867_v31 = vld [vmem:[#allocation113_spill] sm:$0xff] }
 0x7f2   : > { %v2424_v38 = vpack.c.bf16 %v6950_v0, %v6948_v15  ;;  %v4553_v47 = vpop.f32.mrb[143].mxu0  ;;  %v4942_v15 = vld [vmem:[#allocation13 + $0x70] sm:$0xff]  }
 0x7f3   : > { %v7868_v47 = vld [vmem:[#allocation111_spill] sm:$0xff] }
 0x7f4   : > { %v4943_v0 = vld [vmem:[#allocation13 + $0x30] sm:$0xff]  }
 0x82f   : > { %v2477_v8 = vpop.f32.mrb[144].mxu0 }
 0x830   : > { %v4572_v12 = vpop.f32.mrb[145].mxu0  ;;  %v2484_v42 = vsel %vm2239_vm3, %v2477_v8, -1e+30  ;;  %v7869_v8 = vpack.c.bf16 %v7867_v31, %v7868_v47 }
 0x831   : > { %2486 = vmax.xlane.f32.xlu0 %v2484_v42  ;;  %v2480_v14 = vpop.f32.mrb[146].mxu0  ;;  %v7870_v12 = vld [vmem:[#allocation59_spill] sm:$0xff] }
 0x832   : > { %v4573_v18 = vpop.f32.mrb[147].mxu0  ;;  %v2485_v20 = vsel %vm2239_vm3, %v2480_v14, -1e+30 }
 0x833   : > { %2488 = vmax.xlane.f32.xlu1 %v2485_v20  ;;  %v7873_v18 = vld [vmem:[#allocation63_spill] sm:$0xff] }
 0x8be   : > { %v2487_v23 = vpop.xlane.xlu0 %2486 }
 0x8bf   : > { %v2490_v25 = vsub.f32 %v2484_v42, %v2487_v23  ;;  %v7871_v42 = vld [vmem:[#allocation57_spill] sm:$0xff] }
 0x8c0   : > { %v2489_v61 = vpop.xlane.xlu1 %2488  ;;  %v7872_v14 = vpack.c.bf16 %v7870_v12, %v7871_v42 }
 0x8c1   : > { %v2492_v1 = vmul.f32 1.442695, %v2490_v25  ;;  %v2491_v55 = vsub.f32 %v2485_v20, %v2489_v61  ;;  %v7874_v20 = vld [vmem:[#allocation61_spill] sm:$0xff]  ;;  %v7876_v25 = vld [vmem:[#allocation67_spill] sm:$0xff] }
 0x8c2   : > { %v7875_v23 = vpack.c.bf16 %v7873_v18, %v7874_v20  ;;  %v7877_v61 = vld [vmem:[#allocation65_spill] sm:$0xff]  ;;  %v7894_v18 = vld [vmem:[#allocation27_spill] sm:$0xff] }
 0x8c3   : > { %4994 = vpow2.f32 %v2492_v1  ;;  %v2494_v36 = vmul.f32 1.442695, %v2491_v55  ;;  %v7878_v1 = vpack.c.bf16 %v7876_v25, %v7877_v61  ;;  %v7882_v55 = vld [vmem:[#allocation75_spill] sm:$0xff]  ;;  %v7895_v20 = vld [vmem:[#allocation25_spill] sm:$0xff] }
 0x8c4   : > { %v7897_v25 = vld [vmem:[#allocation31_spill] sm:$0xff]  ;;  %v7898_v61 = vld [vmem:[#allocation29_spill] sm:$0xff] }
 0x8c5   : > { %4996 = vpow2.f32 %v2494_v36  ;;  %v7883_v36 = vld [vmem:[#allocation73_spill] sm:$0xff] }
 0x8cd   : > { %v4995_v19 = vpop.eup %4994 }
 0x8ce   : > { %2496 = vadd.xlane.f32.xlu0 %v4995_v19 }
 0x8cf   : > { %v4997_v34 = vpop.eup %4996 }
 0x8d0   : > { %2498 = vadd.xlane.f32.xlu1 %v4997_v34 }
 0x95b   : > { %v2497_v28 = vpop.xlane.xlu0 %2496 }
 0x95c   : > { %4998 = vrcp.f32 %v2497_v28  ;;  %v7886_v28 = vld [vmem:[#allocation77_spill] sm:$0xff] }
 0x95d   : > { %v2499_v22 = vpop.xlane.xlu1 %2498 }
 0x95e   : > { %5000 = vrcp.f32 %v2499_v22 }
 0x966   : > { %v4999_v39 = vpop.eup %4998 }
 0x967   : > { %v2502_v7 = vmul.f32 %v4999_v39, %v4995_v19  ;;  %v7884_v19 = vpack.c.bf16 %v7882_v55, %v7883_v36  ;;  %v7888_v39 = vld [vmem:[#allocation83_spill] sm:$0xff]  ;;  %v7904_v36 = vld [vmem:[#allocation37_spill] sm:$0xff] }
 0x968   : > { %v5001_v30 = vpop.eup %5000  ;;  %v7903_v55 = vld [vmem:[#allocation39_spill] sm:$0xff] }
 0x969   : > { %v2503_v54 = vmul.f32 %v5001_v30, %v4997_v34  ;;  %v7885_v34 = vld [vmem:[#allocation79_spill] sm:$0xff]  ;;  %v7889_v30 = vld [vmem:[#allocation81_spill] sm:$0xff] }
 0x96a   : > { %v7887_v22 = vpack.c.bf16 %v7885_v34, %v7886_v28  ;;  %v7906_v34 = vld [vmem:[#allocation43_spill] sm:$0xff]  ;;  %v7907_v28 = vld [vmem:[#allocation41_spill] sm:$0xff] }
 0x96b   : > { %v2504_v2 = vpack.c.bf16 %v2503_v54, %v2502_v7  ;;  %v7890_v7 = vpack.c.bf16 %v7888_v39, %v7889_v30  ;;  %v7891_v54 = vld [vmem:[#allocation87_spill] sm:$0xff]  ;;  %v7910_v30 = vld [vmem:[#allocation45_spill] sm:$0xff] }
 0x96c   : > { %v7909_v39 = vld [vmem:[#allocation47_spill] sm:$0xff] }
 0x96d   : > { %4591 = vmatmul.mubr.bf16.vlgmr.msra.gmra.mrb[144].mxu1 %v2504_v2  ;;  %v7892_v2 = vld [vmem:[#allocation85_spill] sm:$0xff] }
 0x96e   : > { %4595 = vmatpush3.bf16.xpose.msra.mxu1 %v7848_v56  ;;  %4610 = vmatprep.mubr.msk.bf16.mxu1 %vm5329_vm2, %v7683_v62  ;;  %v7893_v33 = vpack.c.bf16 %v7891_v54, %v7892_v2  ;;  %v7912_v54 = vld [vmem:[#allocation51_spill] sm:$0xff]  ;;  %v7913_v2 = vld [vmem:[#allocation49_spill] sm:$0xff] }
 0x96f   : > { %4596 = vmatprep.subr.bf16.mxu1 %v7683_v62 }
 0x976   : > { %4597 = vmatpush3.bf16.xpose.msra.mxu1 %v7851_v51 }
 0x977   : > { %4598 = vmatprep.subr.bf16.mxu1 %v7683_v62 }
 0x97e   : > { %4599 = vmatpush3.bf16.xpose.msra.mxu1 %v7854_v29 }
 0x97f   : > { %4600 = vmatprep.subr.bf16.mxu1 %v7683_v62 }
 0x986   : > { %4601 = vmatpush3.bf16.xpose.msra.mxu1 %v7857_v63 }
 0x987   : > { %4602 = vmatprep.subr.bf16.mxu1 %v7683_v62 }
 0x98e   : > { %4603 = vmatpush3.bf16.xpose.msra.mxu1 %v7860_v27 }
 0x98f   : > { %4604 = vmatprep.subr.bf16.mxu1 %v7683_v62 }
 0x996   : > { %4605 = vmatpush3.bf16.xpose.msra.mxu1 %v7863_v24 }
 0x997   : > { %4606 = vmatprep.subr.bf16.mxu1 %v7683_v62 }
 0x99e   : > { %4607 = vmatpush3.bf16.xpose.msra.mxu1 %v7866_v53 }
 0x99f   : > { %4608 = vmatprep.subr.bf16.mxu1 %v7683_v62 }
 0x9a6   : > { %4609 = vmatpush3.bf16.xpose.msra.mxu1 %v7869_v8 }
 0x9a7   : > { %4654 = vmatprep.subr.bf16.mxu1 %v7683_v62 }
 0x9ad   : > { %4611 = vmatmul.mubr.bf16.vlgmr.msra.gmra.mrb[148].mxu1 %v2166_v13  ;;  %v7881_v13 = vpack.c.bf16 %v7879_v49, %v7880_v21  ;;  %v7900_v49 = vld [vmem:[#allocation35_spill] sm:$0xff]  ;;  %v7901_v21 = vld [vmem:[#allocation33_spill] sm:$0xff] }
 0x9ae   : > { %4655 = vmatpush3.bf16.msra.mxu1 %v7872_v14  ;;  %4670 = vmatprep.mubr.msk.bf16.mxu1 %vm5329_vm2, %v7683_v62 }
 0x9af   : > { %4656 = vmatprep.subr.bf16.mxu1 %v7683_v62 }
 0x9b2   : > { %4657 = vmatpush3.bf16.msra.mxu1 %v7875_v23  ;;  %v7896_v23 = vpack.c.bf16 %v7894_v18, %v7895_v20  ;;  %v7939_v20 = vld [vmem:[#allocation84_spill] sm:$0xff] }
 0x9b3   : > { %4658 = vmatprep.subr.bf16.mxu1 %v7683_v62 }
 0x9b6   : > { %4659 = vmatpush3.bf16.msra.mxu1 %v7878_v1  ;;  %v7899_v1 = vpack.c.bf16 %v7897_v25, %v7898_v61  ;;  %v7942_v61 = vld [vmem:[#allocation88_spill] sm:$0xff] }
 0x9b7   : > { %4660 = vmatprep.subr.bf16.mxu1 %v7683_v62 }
 0x9ba   : > { %4661 = vmatpush3.bf16.msra.mxu1 %v7881_v13  ;;  %v7902_v13 = vpack.c.bf16 %v7900_v49, %v7901_v21 }
 0x9bb   : > { %4662 = vmatprep.subr.bf16.mxu1 %v7683_v62 }
 0x9be   : > { %4663 = vmatpush3.bf16.msra.mxu1 %v7884_v19  ;;  %v7905_v19 = vpack.c.bf16 %v7903_v55, %v7904_v36 }
 0x9bf   : > { %4664 = vmatprep.subr.bf16.mxu1 %v7683_v62 }
 0x9c2   : > { %4665 = vmatpush3.bf16.msra.mxu1 %v7887_v22  ;;  %v7908_v22 = vpack.c.bf16 %v7906_v34, %v7907_v28 }
 0x9c3   : > { %4666 = vmatprep.subr.bf16.mxu1 %v7683_v62 }
 0x9c6   : > { %4667 = vmatpush3.bf16.msra.mxu1 %v7890_v7  ;;  %v7911_v7 = vpack.c.bf16 %v7909_v39, %v7910_v30 }
 0x9c7   : > { %4668 = vmatprep.subr.bf16.mxu1 %v7683_v62 }
 0x9ca   : > { %4669 = vmatpush3.bf16.msra.mxu1 %v7893_v33  ;;  %v7914_v33 = vpack.c.bf16 %v7912_v54, %v7913_v2 }
 0x9cb   : > { %4674 = vmatprep.subr.bf16.mxu1 %v7683_v62 }
 0xa40   : > { %v7029_v40 = vpop.f32.mrb[144].mxu1 }
 0xa41   : > { %v4592_v56 = vpop.f32.mrb[145].mxu1 }
 0xa42   : > { %v7031_v60 = vpop.f32.mrb[146].mxu1  ;;  %v7915_v56 = vld [vmem:[#allocation55_spill] sm:$0xff] }
 0xa43   : > { %v2546_v3 = vpack.c.bf16 %v7031_v60, %v7029_v40  ;;  %v4593_v51 = vpop.f32.mrb[147].mxu1 }
 0xa44   : > { %v7916_v51 = vld [vmem:[#allocation53_spill] sm:$0xff] }
 0xa80   : > { %v2599_v35 = vpop.f32.mrb[148].mxu1 }
 0xa81   : > { %v4612_v58 = vpop.f32.mrb[149].mxu1  ;;  %v2606_v29 = vsel %vm2239_vm3, %v2599_v35, -1e+30  ;;  %v7917_v35 = vpack.c.bf16 %v7915_v56, %v7916_v51 }
 0xa82   : > { %2608 = vmax.xlane.f32.xlu0 %v2606_v29  ;;  %v2602_v43 = vpop.f32.mrb[150].mxu1  ;;  %v7918_v58 = vld [vmem:[#allocation91_spill] sm:$0xff] }
 0xa83   : > { %v4613_v6 = vpop.f32.mrb[151].mxu1  ;;  %v2607_v63 = vsel %vm2239_vm3, %v2602_v43, -1e+30 }
 0xa84   : > { %2610 = vmax.xlane.f32.xlu1 %v2607_v63  ;;  %v7921_v6 = vld [vmem:[#allocation60_spill] sm:$0xff] }
 0xb0f   : > { %v2609_v5 = vpop.xlane.xlu0 %2608 }
 0xb10   : > { %v2612_v17 = vsub.f32 %v2606_v29, %v2609_v5  ;;  %v7919_v29 = vld [vmem:[#allocation89_spill] sm:$0xff] }
 0xb11   : > { %v2611_v27 = vpop.xlane.xlu1 %2610  ;;  %v7920_v43 = vpack.c.bf16 %v7918_v58, %v7919_v29 }
 0xb12   : > { %v2614_v32 = vmul.f32 1.442695, %v2612_v17  ;;  %v2613_v26 = vsub.f32 %v2607_v63, %v2611_v27  ;;  %v7922_v63 = vld [vmem:[#allocation58_spill] sm:$0xff]  ;;  %v7924_v17 = vld [vmem:[#allocation64_spill] sm:$0xff] }
 0xb13   : > { %v7923_v5 = vpack.c.bf16 %v7921_v6, %v7922_v63  ;;  %v7925_v27 = vld [vmem:[#allocation62_spill] sm:$0xff] }
 0xb14   : > { %5002 = vpow2.f32 %v2614_v32  ;;  %v2616_v24 = vmul.f32 1.442695, %v2613_v26  ;;  %v7926_v32 = vpack.c.bf16 %v7924_v17, %v7925_v27  ;;  %v7927_v26 = vld [vmem:[#allocation68_spill] sm:$0xff] }
 0xb16   : > { %5004 = vpow2.f32 %v2616_v24  ;;  %v7928_v24 = vld [vmem:[#allocation66_spill] sm:$0xff] }
 0xb1e   : > { %v5003_v11 = vpop.eup %5002 }
 0xb1f   : > { %2618 = vadd.xlane.f32.xlu0 %v5003_v11 }
 0xb20   : > { %v5005_v10 = vpop.eup %5004 }
 0xb21   : > { %2620 = vadd.xlane.f32.xlu1 %v5005_v10 }
 0xbac   : > { %v2619_v53 = vpop.xlane.xlu0 %2618 }
 0xbad   : > { %5006 = vrcp.f32 %v2619_v53  ;;  %v7931_v53 = vld [vmem:[#allocation70_spill] sm:$0xff] }
 0xbae   : > { %v2621_v31 = vpop.xlane.xlu1 %2620 }
 0xbaf   : > { %5008 = vrcp.f32 %v2621_v31 }
 0xbb7   : > { %v5007_v47 = vpop.eup %5006 }
 0xbb8   : > { %v2624_v12 = vmul.f32 %v5007_v47, %v5003_v11  ;;  %v7929_v11 = vpack.c.bf16 %v7927_v26, %v7928_v24  ;;  %v7933_v47 = vld [vmem:[#allocation76_spill] sm:$0xff]  ;;  %v7946_v24 = vld [vmem:[#allocation26_spill] sm:$0xff] }
 0xbb9   : > { %v5009_v8 = vpop.eup %5008  ;;  %v7945_v26 = vld [vmem:[#allocation28_spill] sm:$0xff] }
 0xbba   : > { %v2625_v42 = vmul.f32 %v5009_v8, %v5005_v10  ;;  %v7930_v10 = vld [vmem:[#allocation72_spill] sm:$0xff]  ;;  %v7934_v8 = vld [vmem:[#allocation74_spill] sm:$0xff] }
 0xbbb   : > { %v7932_v31 = vpack.c.bf16 %v7930_v10, %v7931_v53  ;;  %v7948_v10 = vld [vmem:[#allocation32_spill] sm:$0xff]  ;;  %v7949_v53 = vld [vmem:[#allocation30_spill] sm:$0xff] }
 0xbbc   : > { %v2626_v14 = vpack.c.bf16 %v2625_v42, %v2624_v12  ;;  %v7935_v12 = vpack.c.bf16 %v7933_v47, %v7934_v8  ;;  %v7936_v42 = vld [vmem:[#allocation80_spill] sm:$0xff]  ;;  %v7952_v8 = vld [vmem:[#allocation34_spill] sm:$0xff] }
 0xbbd   : > { %v7951_v47 = vld [vmem:[#allocation36_spill] sm:$0xff] }
 0xbbe   : > { %4631 = vmatmul.mubr.bf16.vlgmr.msra.gmra.mrb[148].mxu0 %v2626_v14  ;;  %v7937_v14 = vld [vmem:[#allocation78_spill] sm:$0xff] }
 0xbbf   : > { %4635 = vmatpush3.bf16.xpose.msra.mxu0 %v7896_v23  ;;  %4650 = vmatprep.mubr.msk.bf16.mxu0 %vm5329_vm2, %v7683_v62  ;;  %v7938_v18 = vpack.c.bf16 %v7936_v42, %v7937_v14  ;;  %v7940_v23 = vld [vmem:[#allocation82_spill] sm:$0xff]  ;;  %v7954_v42 = vld [vmem:[#allocation40_spill] sm:$0xff] }
 0xbc0   : > { %4636 = vmatprep.subr.bf16.mxu0 %v7683_v62  ;;  %v7941_v25 = vpack.c.bf16 %v7939_v20, %v7940_v23  ;;  %v7955_v14 = vld [vmem:[#allocation38_spill] sm:$0xff]  ;;  %v7957_v20 = vld [vmem:[#allocation44_spill] sm:$0xff] }
 0xbc1   : > { %v7958_v23 = vld [vmem:[#allocation42_spill] sm:$0xff] }
 0xbc7   : > { %4637 = vmatpush3.bf16.xpose.msra.mxu0 %v7899_v1  ;;  %v7943_v1 = vld [vmem:[#allocation86_spill] sm:$0xff] }
 0xbc8   : > { %4638 = vmatprep.subr.bf16.mxu0 %v7683_v62  ;;  %v7944_v49 = vpack.c.bf16 %v7942_v61, %v7943_v1  ;;  %v7960_v61 = vld [vmem:[#allocation48_spill] sm:$0xff]  ;;  %v7961_v1 = vld [vmem:[#allocation46_spill] sm:$0xff] }
 0xbcf   : > { %4639 = vmatpush3.bf16.xpose.msra.mxu0 %v7902_v13 }
 0xbd0   : > { %4640 = vmatprep.subr.bf16.mxu0 %v7683_v62 }
 0xbd7   : > { %4641 = vmatpush3.bf16.xpose.msra.mxu0 %v7905_v19 }
 0xbd8   : > { %4642 = vmatprep.subr.bf16.mxu0 %v7683_v62 }
 0xbdf   : > { %4643 = vmatpush3.bf16.xpose.msra.mxu0 %v7908_v22 }
 0xbe0   : > { %4644 = vmatprep.subr.bf16.mxu0 %v7683_v62 }
 0xbe7   : > { %4645 = vmatpush3.bf16.xpose.msra.mxu0 %v7911_v7 }
 0xbe8   : > { %4646 = vmatprep.subr.bf16.mxu0 %v7683_v62 }
 0xbef   : > { %4647 = vmatpush3.bf16.xpose.msra.mxu0 %v7914_v33 }
 0xbf0   : > { %4648 = vmatprep.subr.bf16.mxu0 %v7683_v62 }
 0xbf7   : > { %4649 = vmatpush3.bf16.xpose.msra.mxu0 %v7917_v35 }
 0xbf8   : > { %4694 = vmatprep.subr.bf16.mxu0 %v7683_v62 }
 0xbfe   : > { %4651 = vmatmul.mubr.bf16.vlgmr.msra.gmra.mrb[152].mxu0 %v7920_v43 }
 0xbff   : > { %4695 = vmatpush3.bf16.msra.mxu0 %v7923_v5  ;;  %4710 = vmatprep.mubr.msk.bf16.mxu0 %vm5329_vm2, %v7683_v62 }
 0xc00   : > { %4696 = vmatprep.subr.bf16.mxu0 %v7683_v62 }
 0xc03   : > { %4697 = vmatpush3.bf16.msra.mxu0 %v7926_v32 }
 0xc04   : > { %4698 = vmatprep.subr.bf16.mxu0 %v7683_v62 }
 0xc07   : > { %4699 = vmatpush3.bf16.msra.mxu0 %v7929_v11  ;;  %v7947_v11 = vpack.c.bf16 %v7945_v26, %v7946_v24  ;;  %v7987_v24 = vld [vmem:[#allocation184_spill] sm:$0xff] }
 0xc08   : > { %4700 = vmatprep.subr.bf16.mxu0 %v7683_v62 }
 0xc0b   : > { %4701 = vmatpush3.bf16.msra.mxu0 %v7932_v31  ;;  %v7950_v31 = vpack.c.bf16 %v7948_v10, %v7949_v53  ;;  %v7990_v53 = vld [vmem:[#allocation188_spill] sm:$0xff] }
 0xc0c   : > { %4702 = vmatprep.subr.bf16.mxu0 %v7683_v62 }
 0xc0f   : > { %4703 = vmatpush3.bf16.msra.mxu0 %v7935_v12  ;;  %v7953_v12 = vpack.c.bf16 %v7951_v47, %v7952_v8  ;;  %v7993_v8 = vpack.c.bf16 %v6762_v50, %v6758_v41 }
 0xc10   : > { %4704 = vmatprep.subr.bf16.mxu0 %v7683_v62 }
 0xc13   : > { %4705 = vmatpush3.bf16.msra.mxu0 %v7938_v18  ;;  %v7956_v18 = vpack.c.bf16 %v7954_v42, %v7955_v14 }
 0xc14   : > { %4706 = vmatprep.subr.bf16.mxu0 %v7683_v62 }
 0xc17   : > { %4707 = vmatpush3.bf16.msra.mxu0 %v7941_v25  ;;  %v7959_v25 = vpack.c.bf16 %v7957_v20, %v7958_v23 }
 0xc18   : > { %4708 = vmatprep.subr.bf16.mxu0 %v7683_v62 }
 0xc1b   : > { %4709 = vmatpush3.bf16.msra.mxu0 %v7944_v49  ;;  %v7962_v49 = vpack.c.bf16 %v7960_v61, %v7961_v1 }
 0xc1c   : > { %4714 = vmatprep.subr.bf16.mxu0 %v7683_v62 }
 0xc91   : > { %v7110_v21 = vpop.f32.mrb[148].mxu0 }
 0xc92   : > { %v4632_v13 = vpop.f32.mrb[149].mxu0 }
 0xc93   : > { %v7112_v55 = vpop.f32.mrb[150].mxu0  ;;  %v7963_v13 = vld [vmem:[#allocation52_spill] sm:$0xff] }
 0xc94   : > { %v2668_v36 = vpack.c.bf16 %v7112_v55, %v7110_v21  ;;  %v4633_v19 = vpop.f32.mrb[151].mxu0  ;;  %v4926_v21 = vld [vmem:[#allocation13 + $0xf0] sm:$0xff]  }
 0xc95   : > { %v7964_v19 = vld [vmem:[#allocation50_spill] sm:$0xff] }
 0xc96   : > { %v4927_v55 = vld [vmem:[#allocation13 + $0xb0] sm:$0xff]  }
 0xcd1   : > { %v2721_v34 = vpop.f32.mrb[152].mxu0 }
 0xcd2   : > { %v4652_v28 = vpop.f32.mrb[153].mxu0  ;;  %v2728_v22 = vsel %vm2239_vm3, %v2721_v34, -1e+30  ;;  %v7965_v34 = vpack.c.bf16 %v7963_v13, %v7964_v19 }
 0xcd3   : > { %2730 = vmax.xlane.f32.xlu0 %v2728_v22  ;;  %v2724_v39 = vpop.f32.mrb[154].mxu0  ;;  %v7966_v28 = vld [vmem:[#allocation56_spill] sm:$0xff] }
 0xcd4   : > { %v4653_v30 = vpop.f32.mrb[155].mxu0  ;;  %v2729_v7 = vsel %vm2239_vm3, %v2724_v39, -1e+30 }
 0xcd5   : > { %2732 = vmax.xlane.f32.xlu1 %v2729_v7  ;;  %v7969_v30 = vld [vmem:[#allocation92_spill] sm:$0xff] }
 0xd60   : > { %v2731_v54 = vpop.xlane.xlu0 %2730 }
 0xd61   : > { %v2734_v2 = vsub.f32 %v2728_v22, %v2731_v54  ;;  %v7967_v22 = vld [vmem:[#allocation54_spill] sm:$0xff] }
 0xd62   : > { %v2733_v33 = vpop.xlane.xlu1 %2732  ;;  %v7968_v39 = vpack.c.bf16 %v7966_v28, %v7967_v22 }
 0xd63   : > { %v2736_v56 = vmul.f32 1.442695, %v2734_v2  ;;  %v2735_v51 = vsub.f32 %v2729_v7, %v2733_v33  ;;  %v7970_v7 = vld [vmem:[#allocation90_spill] sm:$0xff]  ;;  %v7972_v2 = vld [vmem:[#allocation164_spill] sm:$0xff] }
 0xd64   : > { %v7971_v54 = vpack.c.bf16 %v7969_v30, %v7970_v7  ;;  %v7973_v33 = vld [vmem:[#allocation162_spill] sm:$0xff] }
 0xd65   : > { %5010 = vpow2.f32 %v2736_v56  ;;  %v2738_v35 = vmul.f32 1.442695, %v2735_v51  ;;  %v7974_v56 = vpack.c.bf16 %v7972_v2, %v7973_v33  ;;  %v7975_v51 = vld [vmem:[#allocation168_spill] sm:$0xff] }
 0xd67   : > { %5012 = vpow2.f32 %v2738_v35  ;;  %v7976_v35 = vld [vmem:[#allocation166_spill] sm:$0xff] }
 0xd6f   : > { %v5011_v58 = vpop.eup %5010 }
 0xd70   : > { %2740 = vadd.xlane.f32.xlu0 %v5011_v58 }
 0xd71   : > { %v5013_v29 = vpop.eup %5012 }
 0xd72   : > { %2742 = vadd.xlane.f32.xlu1 %v5013_v29 }
 0xdfd   : > { %v2741_v43 = vpop.xlane.xlu0 %2740 }
 0xdfe   : > { %5014 = vrcp.f32 %v2741_v43  ;;  %v7979_v43 = vld [vmem:[#allocation170_spill] sm:$0xff] }
 0xdff   : > { %v2743_v6 = vpop.xlane.xlu1 %2742 }
 0xe00   : > { %5016 = vrcp.f32 %v2743_v6 }
 0xe08   : > { %v5015_v63 = vpop.eup %5014 }
 0xe09   : > { %v2746_v17 = vmul.f32 %v5015_v63, %v5011_v58  ;;  %v7977_v58 = vpack.c.bf16 %v7975_v51, %v7976_v35  ;;  %v7981_v63 = vld [vmem:[#allocation176_spill] sm:$0xff] }
 0xe0a   : > { %v5017_v5 = vpop.eup %5016 }
 0xe0b   : > { %v2747_v27 = vmul.f32 %v5017_v5, %v5013_v29  ;;  %v7978_v29 = vld [vmem:[#allocation172_spill] sm:$0xff]  ;;  %v7982_v5 = vld [vmem:[#allocation174_spill] sm:$0xff] }
 0xe0c   : > { %v7980_v6 = vpack.c.bf16 %v7978_v29, %v7979_v43  ;;  %v7995_v29 = vld [vmem:[#allocation114_spill] sm:$0xff] }
 0xe0d   : > { %v2748_v32 = vpack.c.bf16 %v2747_v27, %v2746_v17  ;;  %v7983_v17 = vpack.c.bf16 %v7981_v63, %v7982_v5  ;;  %v7984_v27 = vld [vmem:[#allocation180_spill] sm:$0xff]  ;;  %v7998_v63 = vld [vmem:[#allocation118_spill] sm:$0xff] }
 0xe0f   : > { %4671 = vmatmul.mubr.bf16.vlgmr.msra.gmra.mrb[152].mxu1 %v2748_v32  ;;  %v7985_v32 = vld [vmem:[#allocation178_spill] sm:$0xff] }
 0xe10   : > { %4675 = vmatpush3.bf16.xpose.msra.mxu1 %v7947_v11  ;;  %4690 = vmatprep.mubr.msk.bf16.mxu1 %vm5329_vm2, %v7683_v62  ;;  %v7986_v26 = vpack.c.bf16 %v7984_v27, %v7985_v32  ;;  %v7988_v11 = vld [vmem:[#allocation182_spill] sm:$0xff] }
 0xe11   : > { %4676 = vmatprep.subr.bf16.mxu1 %v7683_v62  ;;  %v7989_v10 = vpack.c.bf16 %v7987_v24, %v7988_v11  ;;  %v8001_v27 = vld [vmem:[#allocation122_spill] sm:$0xff] }
 0xe12   : > { %v8004_v24 = vld [vmem:[#allocation126_spill] sm:$0xff] }
 0xe18   : > { %4677 = vmatpush3.bf16.xpose.msra.mxu1 %v7950_v31  ;;  %v7991_v31 = vld [vmem:[#allocation186_spill] sm:$0xff] }
 0xe19   : > { %4678 = vmatprep.subr.bf16.mxu1 %v7683_v62  ;;  %v7992_v47 = vpack.c.bf16 %v7990_v53, %v7991_v31  ;;  %v8007_v53 = vld [vmem:[#allocation130_spill] sm:$0xff] }
 0xe20   : > { %4679 = vmatpush3.bf16.xpose.msra.mxu1 %v7953_v12 }
 0xe21   : > { %4680 = vmatprep.subr.bf16.mxu1 %v7683_v62 }
 0xe28   : > { %4681 = vmatpush3.bf16.xpose.msra.mxu1 %v7956_v18 }
 0xe29   : > { %4682 = vmatprep.subr.bf16.mxu1 %v7683_v62 }
 0xe30   : > { %4683 = vmatpush3.bf16.xpose.msra.mxu1 %v7959_v25 }
 0xe31   : > { %4684 = vmatprep.subr.bf16.mxu1 %v7683_v62 }
 0xe38   : > { %4685 = vmatpush3.bf16.xpose.msra.mxu1 %v7962_v49 }
 0xe39   : > { %4686 = vmatprep.subr.bf16.mxu1 %v7683_v62 }
 0xe40   : > { %4687 = vmatpush3.bf16.xpose.msra.mxu1 %v7965_v34 }
 0xe41   : > { %4688 = vmatprep.subr.bf16.mxu1 %v7683_v62 }
 0xe48   : > { %4689 = vmatpush3.bf16.xpose.msra.mxu1 %v7968_v39 }
 0xe49   : > { %4734 = vmatprep.subr.bf16.mxu1 %v7683_v62 }
 0xe4f   : > { %4691 = vmatmul.mubr.bf16.vlgmr.msra.gmra.mrb[156].mxu1 %v7971_v54 }
 0xe50   : > { %4735 = vmatpush3.bf16.msra.mxu1 %v7974_v56  ;;  %4750 = vmatprep.mubr.msk.bf16.mxu1 %vm5329_vm2, %v7683_v62 }
 0xe51   : > { %4736 = vmatprep.subr.bf16.mxu1 %v7683_v62 }
 0xe54   : > { %4737 = vmatpush3.bf16.msra.mxu1 %v7977_v58  ;;  %v7994_v58 = vld [vmem:[#allocation116_spill] sm:$0xff] }
 0xe55   : > { %4738 = vmatprep.subr.bf16.mxu1 %v7683_v62  ;;  %v7996_v43 = vpack.c.bf16 %v7994_v58, %v7995_v29  ;;  %v8037_v58 = vld [vmem:[#allocation187_spill] sm:$0xff] }
 0xe58   : > { %4739 = vmatpush3.bf16.msra.mxu1 %v7980_v6  ;;  %v7997_v6 = vld [vmem:[#allocation120_spill] sm:$0xff] }
 0xe59   : > { %4740 = vmatprep.subr.bf16.mxu1 %v7683_v62  ;;  %v7999_v5 = vpack.c.bf16 %v7997_v6, %v7998_v63 }
 0xe5c   : > { %4741 = vmatpush3.bf16.msra.mxu1 %v7983_v17  ;;  %v8000_v17 = vld [vmem:[#allocation124_spill] sm:$0xff] }
 0xe5d   : > { %4742 = vmatprep.subr.bf16.mxu1 %v7683_v62  ;;  %v8002_v32 = vpack.c.bf16 %v8000_v17, %v8001_v27 }
 0xe60   : > { %4743 = vmatpush3.bf16.msra.mxu1 %v7986_v26  ;;  %v8003_v26 = vld [vmem:[#allocation128_spill] sm:$0xff] }
 0xe61   : > { %4744 = vmatprep.subr.bf16.mxu1 %v7683_v62  ;;  %v8005_v11 = vpack.c.bf16 %v8003_v26, %v8004_v24 }
 0xe64   : > { %4745 = vmatpush3.bf16.msra.mxu1 %v7989_v10  ;;  %v8006_v10 = vld [vmem:[#allocation132_spill] sm:$0xff] }
 0xe65   : > { %4746 = vmatprep.subr.bf16.mxu1 %v7683_v62  ;;  %v8008_v31 = vpack.c.bf16 %v8006_v10, %v8007_v53 }
 0xe68   : > { %4747 = vmatpush3.bf16.msra.mxu1 %v7992_v47  ;;  %v8009_v47 = vld [vmem:[#allocation136_spill] sm:$0xff] }
 0xe69   : > { %4748 = vmatprep.subr.bf16.mxu1 %v7683_v62 }
 0xe6c   : > { %4749 = vmatpush3.bf16.msra.mxu1 %v7993_v8  ;;  %v8010_v8 = vld [vmem:[#allocation134_spill] sm:$0xff] }
 0xe6d   : > { %4754 = vmatprep.subr.bf16.mxu1 %v7683_v62 }
 0xee2   : > { %v7191_v12 = vpop.f32.mrb[152].mxu1 }
 0xee3   : > { %v4672_v42 = vpop.f32.mrb[153].mxu1 }
 0xee4   : > { %v7193_v14 = vpop.f32.mrb[154].mxu1  ;;  %v8011_v42 = vpack.c.bf16 %v8009_v47, %v8010_v8 }
 0xee5   : > { %v2790_v18 = vpack.c.bf16 %v7193_v14, %v7191_v12  ;;  %v4673_v20 = vpop.f32.mrb[155].mxu1 }
 0xee6   : > { %v8012_v20 = vld [vmem:[#allocation140_spill] sm:$0xff] }
 0xf22   : > { %v2843_v23 = vpop.f32.mrb[156].mxu1 }
 0xf23   : > { %v4692_v25 = vpop.f32.mrb[157].mxu1  ;;  %v2850_v61 = vsel %vm2239_vm3, %v2843_v23, -1e+30  ;;  %v8013_v23 = vld [vmem:[#allocation138_spill] sm:$0xff] }
 0xf24   : > { %2852 = vmax.xlane.f32.xlu0 %v2850_v61  ;;  %v2846_v1 = vpop.f32.mrb[158].mxu1  ;;  %v8014_v25 = vpack.c.bf16 %v8012_v20, %v8013_v23 }
 0xf25   : > { %v4693_v41 = vpop.f32.mrb[159].mxu1  ;;  %v2851_v50 = vsel %vm2239_vm3, %v2846_v1, -1e+30  ;;  %v8016_v1 = vld [vmem:[#allocation142_spill] sm:$0xff] }
 0xf26   : > { %2854 = vmax.xlane.f32.xlu1 %v2851_v50 }
 0xfb1   : > { %v2853_v49 = vpop.xlane.xlu0 %2852 }
 0xfb2   : > { %v2856_v13 = vsub.f32 %v2850_v61, %v2853_v49  ;;  %v8015_v61 = vld [vmem:[#allocation144_spill] sm:$0xff]  ;;  %v8019_v49 = vld [vmem:[#allocation163_spill] sm:$0xff] }
 0xfb3   : > { %v2855_v19 = vpop.xlane.xlu1 %2854  ;;  %v8017_v41 = vpack.c.bf16 %v8015_v61, %v8016_v1 }
 0xfb4   : > { %v2858_v34 = vmul.f32 1.442695, %v2856_v13  ;;  %v2857_v28 = vsub.f32 %v2851_v50, %v2855_v19  ;;  %v8018_v50 = vld [vmem:[#allocation165_spill] sm:$0xff] }
 0xfb5   : > { %v8020_v13 = vpack.c.bf16 %v8018_v50, %v8019_v49  ;;  %v8021_v19 = vld [vmem:[#allocation169_spill] sm:$0xff] }
 0xfb6   : > { %5018 = vpow2.f32 %v2858_v34  ;;  %v2860_v22 = vmul.f32 1.442695, %v2857_v28  ;;  %v8022_v34 = vld [vmem:[#allocation167_spill] sm:$0xff] }
 0xfb7   : > { %v8023_v28 = vpack.c.bf16 %v8021_v19, %v8022_v34  ;;  %v8040_v19 = vld [vmem:[#allocation117_spill] sm:$0xff]  ;;  %v8041_v34 = vld [vmem:[#allocation115_spill] sm:$0xff] }
 0xfb8   : > { %5020 = vpow2.f32 %v2860_v22  ;;  %v8024_v22 = vld [vmem:[#allocation173_spill] sm:$0xff] }
 0xfc0   : > { %v5019_v39 = vpop.eup %5018 }
 0xfc1   : > { %2862 = vadd.xlane.f32.xlu0 %v5019_v39 }
 0xfc2   : > { %v5021_v30 = vpop.eup %5020 }
 0xfc3   : > { %2864 = vadd.xlane.f32.xlu1 %v5021_v30 }
0x104e   : > { %v2863_v7 = vpop.xlane.xlu0 %2862 }
0x104f   : > { %5022 = vrcp.f32 %v2863_v7  ;;  %v8030_v7 = vld [vmem:[#allocation181_spill] sm:$0xff] }
0x1050   : > { %v2865_v54 = vpop.xlane.xlu1 %2864 }
0x1051   : > { %5024 = vrcp.f32 %v2865_v54  ;;  %v8031_v54 = vld [vmem:[#allocation179_spill] sm:$0xff] }
0x1059   : > { %v5023_v2 = vpop.eup %5022 }
0x105a   : > { %v2868_v56 = vmul.f32 %v5023_v2, %v5019_v39  ;;  %v8025_v39 = vld [vmem:[#allocation171_spill] sm:$0xff]  ;;  %v8032_v2 = vpack.c.bf16 %v8030_v7, %v8031_v54  ;;  %v8049_v7 = vld [vmem:[#allocation129_spill] sm:$0xff] }
0x105b   : > { %v5025_v33 = vpop.eup %5024  ;;  %v8050_v54 = vld [vmem:[#allocation127_spill] sm:$0xff] }
0x105c   : > { %v2869_v51 = vmul.f32 %v5025_v33, %v5021_v30  ;;  %v8026_v30 = vpack.c.bf16 %v8024_v22, %v8025_v39  ;;  %v8033_v33 = vld [vmem:[#allocation185_spill] sm:$0xff]  ;;  %v8044_v39 = vld [vmem:[#allocation119_spill] sm:$0xff] }
0x105d   : > { %v8043_v22 = vld [vmem:[#allocation121_spill] sm:$0xff] }
0x105e   : > { %v2870_v35 = vpack.c.bf16 %v2869_v51, %v2868_v56  ;;  %v8034_v56 = vld [vmem:[#allocation183_spill] sm:$0xff] }
0x105f   : > { %v8035_v51 = vpack.c.bf16 %v8033_v33, %v8034_v56  ;;  %v8052_v33 = vld [vmem:[#allocation133_spill] sm:$0xff]  ;;  %v8053_v56 = vld [vmem:[#allocation131_spill] sm:$0xff] }
0x1060   : > { %4711 = vmatmul.mubr.bf16.vlgmr.msra.gmra.mrb[156].mxu0 %v2870_v35  ;;  %v8036_v35 = vld [vmem:[#allocation189_spill] sm:$0xff] }
0x1061   : > { %4715 = vmatpush3.bf16.xpose.msra.mxu0 %v7996_v43  ;;  %4730 = vmatprep.mubr.msk.bf16.mxu0 %vm5329_vm2, %v7683_v62  ;;  %v8038_v29 = vpack.c.bf16 %v8036_v35, %v8037_v58  ;;  %v8039_v43 = vpack.c.bf16 %v6766_v9, %v6760_v16  ;;  %v8055_v35 = vld [vmem:[#allocation137_spill] sm:$0xff]  ;;  %v8056_v58 = vld [vmem:[#allocation135_spill] sm:$0xff] }
0x1062   : > { %4716 = vmatprep.subr.bf16.mxu0 %v7683_v62 }
0x1069   : > { %4717 = vmatpush3.bf16.xpose.msra.mxu0 %v7999_v5 }
0x106a   : > { %4718 = vmatprep.subr.bf16.mxu0 %v7683_v62 }
0x1071   : > { %4719 = vmatpush3.bf16.xpose.msra.mxu0 %v8002_v32 }
0x1072   : > { %4720 = vmatprep.subr.bf16.mxu0 %v7683_v62 }
0x1079   : > { %4721 = vmatpush3.bf16.xpose.msra.mxu0 %v8005_v11 }
0x107a   : > { %4722 = vmatprep.subr.bf16.mxu0 %v7683_v62 }
0x1081   : > { %4723 = vmatpush3.bf16.xpose.msra.mxu0 %v8008_v31 }
0x1082   : > { %4724 = vmatprep.subr.bf16.mxu0 %v7683_v62 }
0x1089   : > { %4725 = vmatpush3.bf16.xpose.msra.mxu0 %v8011_v42 }
0x108a   : > { %4726 = vmatprep.subr.bf16.mxu0 %v7683_v62 }
0x1091   : > { %4727 = vmatpush3.bf16.xpose.msra.mxu0 %v8014_v25 }
0x1092   : > { %4728 = vmatprep.subr.bf16.mxu0 %v7683_v62 }
0x1099   : > { %4729 = vmatpush3.bf16.xpose.msra.mxu0 %v8017_v41 }
0x109a   : > { %4774 = vmatprep.subr.bf16.mxu0 %v7683_v62 }
0x10a0   : > { %4731 = vmatmul.mubr.bf16.vlgmr.msra.gmra.mrb[160].mxu0 %v2169_v59  ;;  %v8029_v59 = vpack.c.bf16 %v8027_v44, %v8028_v52  ;;  %v8046_v44 = vld [vmem:[#allocation125_spill] sm:$0xff]  ;;  %v8047_v52 = vld [vmem:[#allocation123_spill] sm:$0xff] }
0x10a1   : > { %4775 = vmatpush3.bf16.msra.mxu0 %v8020_v13  ;;  %4790 = vmatprep.mubr.msk.bf16.mxu0 %vm5329_vm2, %v7683_v62 }
0x10a2   : > { %4776 = vmatprep.subr.bf16.mxu0 %v7683_v62 }
0x10a5   : > { %4777 = vmatpush3.bf16.msra.mxu0 %v8023_v28  ;;  %v8042_v28 = vpack.c.bf16 %v8040_v19, %v8041_v34 }
0x10a6   : > { %4778 = vmatprep.subr.bf16.mxu0 %v7683_v62 }
0x10a9   : > { %4779 = vmatpush3.bf16.msra.mxu0 %v8026_v30  ;;  %v8045_v30 = vpack.c.bf16 %v8043_v22, %v8044_v39 }
0x10aa   : > { %4780 = vmatprep.subr.bf16.mxu0 %v7683_v62 }
0x10ad   : > { %4781 = vmatpush3.bf16.msra.mxu0 %v8029_v59  ;;  %v8048_v59 = vpack.c.bf16 %v8046_v44, %v8047_v52 }
0x10ae   : > { %4782 = vmatprep.subr.bf16.mxu0 %v7683_v62 }
0x10b1   : > { %4783 = vmatpush3.bf16.msra.mxu0 %v8032_v2  ;;  %v8051_v2 = vpack.c.bf16 %v8049_v7, %v8050_v54 }
0x10b2   : > { %4784 = vmatprep.subr.bf16.mxu0 %v7683_v62 }
0x10b5   : > { %4785 = vmatpush3.bf16.msra.mxu0 %v8035_v51  ;;  %v8054_v51 = vpack.c.bf16 %v8052_v33, %v8053_v56 }
0x10b6   : > { %4786 = vmatprep.subr.bf16.mxu0 %v7683_v62 }
0x10b9   : > { %4787 = vmatpush3.bf16.msra.mxu0 %v8038_v29  ;;  %v8057_v29 = vpack.c.bf16 %v8055_v35, %v8056_v58  ;;  %v4962_v35 = vld [vmem:[#allocation13 + $0x1c0] sm:$0xff]  }
0x10ba   : > { %4788 = vmatprep.subr.bf16.mxu0 %v7683_v62  ;;  %v4963_v58 = vld [vmem:[#allocation13 + $0x180] sm:$0xff]  }
0x10bd   : > { %4789 = vmatpush3.bf16.msra.mxu0 %v8039_v43  ;;  %v8058_v43 = vld [vmem:[#allocation141_spill] sm:$0xff] }
0x1133   : > { %v7271_v6 = vpop.f32.mrb[156].mxu0 }
0x1134   : > { %v4712_v63 = vpop.f32.mrb[157].mxu0 }
0x1135   : > { %v7273_v5 = vpop.f32.mrb[158].mxu0  ;;  %v8059_v63 = vld [vmem:[#allocation139_spill] sm:$0xff] }
0x1136   : > { %v2912_v17 = vpack.c.bf16 %v7273_v5, %v7271_v6  ;;  %v4713_v27 = vpop.f32.mrb[159].mxu0  ;;  %v4959_v6 = vld [vmem:[#allocation13 + $0x130] sm:$0xff]   ;;  %v4960_v5 = vld [vmem:[#allocation13 + $0x178] sm:$0xff]  }
0x1137   : > { %v8060_v27 = vpack.c.bf16 %v8058_v43, %v8059_v63  ;;  %v4965_v43 = vld [vmem:[#allocation13 + $0x188] sm:$0xff]   ;;  %v4966_v63 = vld [vmem:[#allocation13 + $0x1d0] sm:$0xff]  }
0x1173   : > { %v2965_v32 = vpop.f32.mrb[160].mxu0 }
0x1174   : > { %v4732_v26 = vpop.f32.mrb[161].mxu0  ;;  %v2972_v24 = vsel %vm2239_vm3, %v2965_v32, -1e+30  ;;  %v4914_v32 = vld [vmem:[#allocation13 + $0xc0] sm:$0xff]  }
0x1175   : > { %2974 = vmax.xlane.f32.xlu0 %v2972_v24  ;;  %v2968_v11 = vpop.f32.mrb[162].mxu0  ;;  %v8061_v26 = vld [vmem:[#allocation145_spill] sm:$0xff] }
0x1176   : > { %v4733_v10 = vpop.f32.mrb[163].mxu0  ;;  %v2973_v9 = vsel %vm2239_vm3, %v2968_v11, -1e+30 }
0x1177   : > { %2976 = vmax.xlane.f32.xlu1 %v2973_v9  ;;  %v4915_v10 = vld [vmem:[#allocation13 + $0x80] sm:$0xff]  }
0x1202   : > { %v2975_v16 = vpop.xlane.xlu0 %2974 }
0x1203   : > { %v2978_v53 = vsub.f32 %v2972_v24, %v2975_v16  ;;  %v8062_v24 = vld [vmem:[#allocation143_spill] sm:$0xff]  ;;  %v8064_v16 = vpack.c.bf16 %v6798_v48, %v6791_v45  ;;  %v4924_v45 = vld [vmem:[#allocation13 + $0xe8] sm:$0xff]  }
0x1204   : > { %v2977_v31 = vpop.xlane.xlu1 %2976  ;;  %v8063_v11 = vpack.c.bf16 %v8061_v26, %v8062_v24  ;;  %v4925_v48 = vld [vmem:[#allocation13 + $0xa8] sm:$0xff]   ;;  %v4969_v26 = vld [vmem:[#allocation13 + $0x198] sm:$0xff]   ;;  %v4970_v24 = vld [vmem:[#allocation13 + $0x1e0] sm:$0xff]  }
0x1205   : > { %v2980_v47 = vmul.f32 1.442695, %v2978_v53  ;;  %v2979_v8 = vsub.f32 %v2973_v9, %v2977_v31  ;;  %v4916_v9 = vld [vmem:[#allocation13 + $0xc8] sm:$0xff]   ;;  %v4919_v31 = vld [vmem:[#allocation13 + $0x90] sm:$0xff]  }
0x1206   : > { %v4917_v53 = vld [vmem:[#allocation13 + $0x88] sm:$0xff]  }
0x1207   : > { %5026 = vpow2.f32 %v2980_v47  ;;  %v2982_v42 = vmul.f32 1.442695, %v2979_v8  ;;  %v4920_v47 = vld [vmem:[#allocation13 + $0xd8] sm:$0xff]  }
0x1208   : > { %v4921_v8 = vld [vmem:[#allocation13 + $0x98] sm:$0xff]  }
0x1209   : > { %5028 = vpow2.f32 %v2982_v42  ;;  %v4922_v42 = vld [vmem:[#allocation13 + $0xe0] sm:$0xff]  }
0x1211   : > { %v5027_v20 = vpop.eup %5026 }
0x1212   : > { %2984 = vadd.xlane.f32.xlu0 %v5027_v20 }
0x1213   : > { %v5029_v23 = vpop.eup %5028 }
0x1214   : > { %2986 = vadd.xlane.f32.xlu1 %v5029_v23 }
0x129f   : > { %v2985_v25 = vpop.xlane.xlu0 %2984 }
0x12a0   : > { %5030 = vrcp.f32 %v2985_v25 }
0x12a1   : > { %v2987_v61 = vpop.xlane.xlu1 %2986 }
0x12a2   : > { %5032 = vrcp.f32 %v2987_v61 }
0x12aa   : > { %v5031_v1 = vpop.eup %5030 }
0x12ab   : > { %v2990_v50 = vmul.f32 %v5031_v1, %v5027_v20  ;;  %v4923_v20 = vld [vmem:[#allocation13 + $0xa0] sm:$0xff]  }
0x12ac   : > { %v5033_v41 = vpop.eup %5032 }
0x12ad   : > { %v2991_v49 = vmul.f32 %v5033_v41, %v5029_v23  ;;  %v4929_v23 = vld [vmem:[#allocation13 + $0xb8] sm:$0xff]  }
0x12af   : > { %v2992_v13 = vpack.c.bf16 %v2991_v49, %v2990_v50 }
0x12b1   : > { %4751 = vmatmul.mubr.bf16.vlgmr.msra.gmra.mrb[160].mxu1 %v2992_v13 }
0x12b2   : > { %4755 = vmatpush3.bf16.xpose.msra.mxu1 %v8042_v28  ;;  %4770 = vmatprep.mubr.msk.bf16.mxu1 %vm5329_vm2, %v7683_v62 }
0x12b3   : > { %4756 = vmatprep.subr.bf16.mxu1 %v7683_v62 }
0x12ba   : > { %4757 = vmatpush3.bf16.xpose.msra.mxu1 %v8045_v30 }
0x12bb   : > { %4758 = vmatprep.subr.bf16.mxu1 %v7683_v62 }
0x12c2   : > { %4759 = vmatpush3.bf16.xpose.msra.mxu1 %v8048_v59 }
0x12c3   : > { %4760 = vmatprep.subr.bf16.mxu1 %v7683_v62 }
0x12ca   : > { %4761 = vmatpush3.bf16.xpose.msra.mxu1 %v8051_v2 }
0x12cb   : > { %4762 = vmatprep.subr.bf16.mxu1 %v7683_v62 }
0x12d2   : > { %4763 = vmatpush3.bf16.xpose.msra.mxu1 %v8054_v51  ;;  %v4930_v51 = vld [vmem:[#allocation13 + $0x40] sm:$0xff]  }
0x12d3   : > { %4764 = vmatprep.subr.bf16.mxu1 %v7683_v62  ;;  %4386 = vmatprep.subr.bf16.mxu0 %v4930_v51 }
0x12da   : > { %4765 = vmatpush3.bf16.xpose.msra.mxu1 %v8057_v29  ;;  %v4964_v29 = vld [vmem:[#allocation13 + $0x1c8] sm:$0xff]  }
0x12db   : > { %4766 = vmatprep.subr.bf16.mxu1 %v7683_v62 }
0x12e2   : > { %4767 = vmatpush3.bf16.xpose.msra.mxu1 %v8060_v27  ;;  %v4967_v27 = vld [vmem:[#allocation13 + $0x190] sm:$0xff]  }
0x12e3   : > { %4768 = vmatprep.subr.bf16.mxu1 %v7683_v62  ;;  %v4918_v62 = vld [vmem:[#allocation13 + $0xd0] sm:$0xff]  }
0x12ea   : > { %4769 = vmatpush3.bf16.xpose.msra.mxu1 %v8063_v11  ;;  %v4971_v11 = vld [vmem:[#allocation13 + $0x1a0] sm:$0xff]  }
0x12eb   : > { %4408 = vmatprep.subr.bf16.mxu1 %v4914_v32  ;;  %v4968_v32 = vld [vmem:[#allocation13 + $0x1d8] sm:$0xff]  }
0x12f1   : > { %4771 = vmatmul.mubr.bf16.vlgmr.msra.gmra.mrb[164].mxu1 %v8064_v16  ;;  %v4974_v16 = vld [vmem:[#allocation13 + $0x1f0] sm:$0xff]  }
0x12f2   : > { %4409 = vmatpush3.bf16.msra.mxu1 %v4915_v10  ;;  %3758 = vmatprep.mubr.bf16.mxu1 %v2668_v36  ;;  %v4928_v36 = vld [vmem:[#allocation13 + $0xf8] sm:$0xff]   ;;  %v4972_v10 = vld [vmem:[#allocation13 + $0x1e8] sm:$0xff]  }
0x12f3   : > { %4410 = vmatprep.subr.bf16.mxu1 %v4916_v9  ;;  %v4973_v9 = vld [vmem:[#allocation13 + $0x1a8] sm:$0xff]  }
0x12f6   : > { %4411 = vmatpush3.bf16.msra.mxu1 %v4917_v53  ;;  %v4975_v53 = vld [vmem:[#allocation13 + $0x1b0] sm:$0xff]  }
0x12f7   : > { %4412 = vmatprep.subr.bf16.mxu1 %v4918_v62 }
0x12fa   : > { %4413 = vmatpush3.bf16.msra.mxu1 %v4919_v31 }
0x12fb   : > { %4414 = vmatprep.subr.bf16.mxu1 %v4920_v47 }
0x12fe   : > { %4415 = vmatpush3.bf16.msra.mxu1 %v4921_v8 }
0x12ff   : > { %4416 = vmatprep.subr.bf16.mxu1 %v4922_v42 }
0x1302   : > { %4417 = vmatpush3.bf16.msra.mxu1 %v4923_v20 }
0x1303   : > { %4418 = vmatprep.subr.bf16.mxu1 %v4924_v45  ;;  %v4931_v45 = vld [vmem:[#allocation13] sm:$0xff]  }
0x1306   : > { %4419 = vmatpush3.bf16.msra.mxu1 %v4925_v48 }
0x1307   : > { %4420 = vmatprep.subr.bf16.mxu1 %v4926_v21  ;;  %v4932_v21 = vld [vmem:[#allocation13 + $0x48] sm:$0xff]  }
0x130a   : > { %4421 = vmatpush3.bf16.msra.mxu1 %v4927_v55  ;;  %v4933_v55 = vld [vmem:[#allocation13 + $0x8] sm:$0xff]  }
0x130b   : > { %4422 = vmatprep.subr.bf16.mxu1 %v4928_v36  ;;  %v4934_v36 = vld [vmem:[#allocation13 + $0x50] sm:$0xff]  }
0x130e   : > { %4423 = vmatpush3.bf16.msra.mxu1 %v4929_v23  ;;  %v4935_v23 = vld [vmem:[#allocation13 + $0x10] sm:$0xff]  }
0x130f   : > { %4452 = vmatprep.subr.bf16.mxu1 %v4962_v35 }
0x1311   : > { %3759 = vmatmul.mubr.bf16.vlgmr.msra.gmra.mrb[168].mxu1 %v2546_v3 }
0x1312   : > { %4453 = vmatpush3.bf16.msra.mxu1 %v4963_v58 }
0x1313   : > { %4454 = vmatprep.subr.bf16.mxu1 %v4964_v29 }
0x1316   : > { %4455 = vmatpush3.bf16.msra.mxu1 %v4965_v43 }
0x1317   : > { %4456 = vmatprep.subr.bf16.mxu1 %v4966_v63  ;;  %v4169_v63 = vld [vmem:[#allocation14] ss:$0 sm:$0xff] }
0x131a   : > { %4457 = vmatpush3.bf16.msra.mxu1 %v4967_v27 }
0x131b   : > { %4458 = vmatprep.subr.bf16.mxu1 %v4968_v32 }
0x131e   : > { %4459 = vmatpush3.bf16.msra.mxu1 %v4969_v26 }
0x131f   : > { %4460 = vmatprep.subr.bf16.mxu1 %v4970_v24 }
0x1322   : > { %4461 = vmatpush3.bf16.msra.mxu1 %v4971_v11 }
0x1323   : > { %4462 = vmatprep.subr.bf16.mxu1 %v4972_v10 }
0x1326   : > { %4463 = vmatpush3.bf16.msra.mxu1 %v4973_v9 }
0x1327   : > { %4464 = vmatprep.subr.bf16.mxu1 %v4974_v16 }
0x132a   : > { %4465 = vmatpush3.bf16.msra.mxu1 %v4975_v53 }
0x1384   : > { %v7323_v25 = vpop.f32.mrb[160].mxu1 }
0x1385   : > { %v4752_v61 = vpop.f32.mrb[161].mxu1 }
0x1386   : > { %v7325_v1 = vpop.f32.mrb[162].mxu1  ;;  %v4936_v61 = vld [vmem:[#allocation13 + $0x58] sm:$0xff]  }
0x1387   : > { %v3034_v41 = vpack.c.bf16 %v7325_v1, %v7323_v25  ;;  %v4753_v50 = vpop.f32.mrb[163].mxu1 }
0x1388   : > { %v4937_v50 = vld [vmem:[#allocation13 + $0x18] sm:$0xff]  }
0x13c4   : > { %v3087_v49 = vpop.f32.mrb[164].mxu1 }
0x13c5   : > { %v4772_v13 = vpop.f32.mrb[165].mxu1  ;;  %v3094_v19 = vsel %vm2239_vm3, %v3087_v49, -1e+30  ;;  %v4938_v49 = vld [vmem:[#allocation13 + $0x60] sm:$0xff]  }
0x13c6   : > { %3096 = vmax.xlane.f32.xlu0 %v3094_v19  ;;  %v3090_v34 = vpop.f32.mrb[166].mxu1  ;;  %v4939_v13 = vld [vmem:[#allocation13 + $0x20] sm:$0xff]  }
0x13c7   : > { %v4773_v28 = vpop.f32.mrb[167].mxu1  ;;  %v3095_v40 = vsel %vm2239_vm3, %v3090_v34, -1e+30  ;;  %v4941_v34 = vld [vmem:[#allocation13 + $0x28] sm:$0xff]  }
0x13c8   : > { %3098 = vmax.xlane.f32.xlu1 %v3095_v40  ;;  %v4945_v28 = vld [vmem:[#allocation13 + $0x38] sm:$0xff]  }
0x13e4   : > { %v4424_v60 = vpop.f32.mrb[168].mxu1 }
0x13e5   : > { %v4425_v3 = vpop.f32.mrb[169].mxu1 }
0x13e6   : > { %v7333_v22 = vadd.f32 %v4425_v3, %v4424_v60  ;;  %v4427_v39 = vpop.f32.mrb[170].mxu1  ;;  %v4947_v60 = vld [vmem:[#allocation13 + $0x100] sm:$0xff]   ;;  %v4948_v3 = vld [vmem:[#allocation13 + $0x148] sm:$0xff]  }
0x13e7   : > { %v4428_v30 = vpop.f32.mrb[171].mxu1 }
0x13e8   : > { %v7335_v44 = vadd.f32 %v4428_v30, %v4427_v39  ;;  %v4949_v39 = vld [vmem:[#allocation13 + $0x108] sm:$0xff]   ;;  %v4950_v30 = vld [vmem:[#allocation13 + $0x150] sm:$0xff]  }
0x1453   : > { %v3097_v52 = vpop.xlane.xlu0 %3096 }
0x1454   : > { %v3100_v59 = vsub.f32 %v3094_v19, %v3097_v52  ;;  %v4940_v19 = vld [vmem:[#allocation13 + $0x68] sm:$0xff]   ;;  %v4951_v52 = vld [vmem:[#allocation13 + $0x110] sm:$0xff]  }
0x1455   : > { %v3099_v7 = vpop.xlane.xlu1 %3098 }
0x1456   : > { %v3102_v54 = vmul.f32 1.442695, %v3100_v59  ;;  %v3101_v2 = vsub.f32 %v3095_v40, %v3099_v7  ;;  %v4946_v40 = vld [vmem:[#allocation13 + $0x140] sm:$0xff]   ;;  %v4952_v59 = vld [vmem:[#allocation13 + $0x158] sm:$0xff]  }
0x1457   : > { %v4953_v7 = vld [vmem:[#allocation13 + $0x118] sm:$0xff]  }
0x1458   : > { %5034 = vpow2.f32 %v3102_v54  ;;  %v3104_v33 = vmul.f32 1.442695, %v3101_v2  ;;  %v4954_v54 = vld [vmem:[#allocation13 + $0x160] sm:$0xff]  }
0x1459   : > { %v4955_v2 = vld [vmem:[#allocation13 + $0x120] sm:$0xff]  }
0x145a   : > { %5036 = vpow2.f32 %v3104_v33  ;;  %v4976_v33 = vld [vmem:[#allocation13 + $0x1f8] sm:$0xff]  }
0x145b   : > { %4466 = vmatprep.subr.bf16.mxu1 %v4976_v33 }
0x1462   : > { %v5035_v56 = vpop.eup %5034 }
0x1463   : > { %3106 = vadd.xlane.f32.xlu0 %v5035_v56 }
0x1464   : > { %v5037_v4 = vpop.eup %5036 }
0x1465   : > { %3108 = vadd.xlane.f32.xlu1 %v5037_v4 }
0x14f0   : > { %v3107_v62 = vpop.xlane.xlu0 %3106 }
0x14f1   : > { %5038 = vrcp.f32 %v3107_v62 }
0x14f2   : > { %v3109_v31 = vpop.xlane.xlu1 %3108 }
0x14f3   : > { %5040 = vrcp.f32 %v3109_v31 }
0x14fb   : > { %v5039_v47 = vpop.eup %5038 }
0x14fc   : > { %v3112_v42 = vmul.f32 %v5039_v47, %v5035_v56  ;;  %v4977_v56 = vld [vmem:[#allocation13 + $0x1b8] sm:$0xff]  }
0x14fd   : > { %v5041_v8 = vpop.eup %5040  ;;  %4467 = vmatpush3.bf16.msra.mxu1 %v4977_v56 }
0x14fe   : > { %v3113_v20 = vmul.f32 %v5041_v8, %v5037_v4 }
0x1500   : > { %v3114_v48 = vpack.c.bf16 %v3113_v20, %v3112_v42 }
0x1502   : > { %4791 = vmatmul.mubr.bf16.vlgmr.msra.gmra.mrb[164].mxu0 %v3114_v48 }
0x1503   : > { %4387 = vmatpush3.bf16.msra.mxu0 %v4931_v45  ;;  %3717 = vmatprep.mubr.bf16.mxu0 %v2424_v38  ;;  %v4944_v38 = vld [vmem:[#allocation13 + $0x78] sm:$0xff]  }
0x1504   : > { %4388 = vmatprep.subr.bf16.mxu0 %v4932_v21 }
0x1507   : > { %4389 = vmatpush3.bf16.msra.mxu0 %v4933_v55 }
0x1508   : > { %4390 = vmatprep.subr.bf16.mxu0 %v4934_v36 }
0x150b   : > { %4391 = vmatpush3.bf16.msra.mxu0 %v4935_v23 }
0x150c   : > { %4392 = vmatprep.subr.bf16.mxu0 %v4936_v61 }
0x150f   : > { %4393 = vmatpush3.bf16.msra.mxu0 %v4937_v50 }
0x1510   : > { %4394 = vmatprep.subr.bf16.mxu0 %v4938_v49 }
0x1513   : > { %4395 = vmatpush3.bf16.msra.mxu0 %v4939_v13 }
0x1514   : > { %4396 = vmatprep.subr.bf16.mxu0 %v4940_v19 }
0x1517   : > { %4397 = vmatpush3.bf16.msra.mxu0 %v4941_v34 }
0x1518   : > { %4398 = vmatprep.subr.bf16.mxu0 %v4942_v15 }
0x151b   : > { %4399 = vmatpush3.bf16.msra.mxu0 %v4943_v0 }
0x151c   : > { %4400 = vmatprep.subr.bf16.mxu0 %v4944_v38 }
0x151f   : > { %4401 = vmatpush3.bf16.msra.mxu0 %v4945_v28 }
0x1520   : > { %4430 = vmatprep.subr.bf16.mxu0 %v4946_v40 }
0x1522   : > { %3718 = vmatmul.mubr.bf16.vlgmr.msra.gmra.mrb[168].mxu0 %v2302_v37  ;;  %v4958_v37 = vld [vmem:[#allocation13 + $0x170] sm:$0xff]  }
0x1523   : > { %4431 = vmatpush3.bf16.msra.mxu0 %v4947_v60  ;;  %3799 = vmatprep.mubr.bf16.mxu0 %v2912_v17  ;;  %v4961_v17 = vld [vmem:[#allocation13 + $0x138] sm:$0xff]  }
0x1524   : > { %4432 = vmatprep.subr.bf16.mxu0 %v4948_v3 }
0x1527   : > { %4433 = vmatpush3.bf16.msra.mxu0 %v4949_v39 }
0x1528   : > { %4434 = vmatprep.subr.bf16.mxu0 %v4950_v30 }
0x152b   : > { %4435 = vmatpush3.bf16.msra.mxu0 %v4951_v52 }
0x152c   : > { %4436 = vmatprep.subr.bf16.mxu0 %v4952_v59 }
0x152f   : > { %4437 = vmatpush3.bf16.msra.mxu0 %v4953_v7 }
0x1530   : > { %4438 = vmatprep.subr.bf16.mxu0 %v4954_v54 }
0x1533   : > { %4439 = vmatpush3.bf16.msra.mxu0 %v4955_v2 }
0x1534   : > { %4440 = vmatprep.subr.bf16.mxu0 %v4956_v46 }
0x1537   : > { %4441 = vmatpush3.bf16.msra.mxu0 %v4957_v57 }
0x1538   : > { %4442 = vmatprep.subr.bf16.mxu0 %v4958_v37 }
0x153b   : > { %4443 = vmatpush3.bf16.msra.mxu0 %v4959_v6 }
0x153c   : > { %4444 = vmatprep.subr.bf16.mxu0 %v4960_v5 }
0x153f   : > { %4445 = vmatpush3.bf16.msra.mxu0 %v4961_v17 }
0x1542   : > { %3800 = vmatmul.mubr.bf16.vlgmr.msra.gmra.mrb[172].mxu0 %v2790_v18 }
0x15d5   : > { %v3149_v4 = vpop.f32.mrb[164].mxu0 }
0x15d6   : > { %v4792_v51 = vpop.f32.mrb[165].mxu0 }
0x15d7   : > { %v3152_v35 = vpop.f32.mrb[166].mxu0 }
0x15d8   : > { %v3156_v58 = vpack.c.bf16 %v3152_v35, %v3149_v4  ;;  %v4793_v29 = vpop.f32.mrb[167].mxu0 }
0x15da   : > { %3840 = vmatprep.mubr.bf16.mxu1 %v3156_v58 }
0x15db   : > { %3841 = vmatmul.mubr.bf16.vlgmr.msra.gmra.mrb[172].mxu1 %v3034_v41 }
0x15f5   : > { %v4402_v43 = vpop.f32.mrb[168].mxu0 }
0x15f6   : > { %v4403_v27 = vpop.f32.mrb[169].mxu0 }
0x15f7   : > { %v4404_v32 = vadd.f32 %v4403_v27, %v4402_v43  ;;  %v4405_v12 = vpop.f32.mrb[170].mxu0 }
0x15f8   : > { %v4406_v14 = vpop.f32.mrb[171].mxu0 }
0x15f9   : > { %v3720_v18 = vadd.f32 %v4404_v32, %v4169_v63  ;;  %v4407_v26 = vadd.f32 %v4406_v14, %v4405_v12 }
0x15fb   : > { %v3723_v24 = vadd.f32 %v4407_v26, %v4169_v63  ;;  %v3761_v11 = vadd.f32 %v7333_v22, %v3720_v18 }
0x15fd   : > { %v3764_v10 = vadd.f32 %v7335_v44, %v3723_v24 }
0x1615   : > { %v4446_v9 = vpop.f32.mrb[172].mxu0 }
0x1616   : > { %v4447_v16 = vpop.f32.mrb[173].mxu0 }
0x1617   : > { %v4448_v53 = vadd.f32 %v4447_v16, %v4446_v9  ;;  %v4449_v25 = vpop.f32.mrb[174].mxu0 }
0x1618   : > { %v4450_v1 = vpop.f32.mrb[175].mxu0 }
0x1619   : > { %v3802_v41 = vadd.f32 %v4448_v53, %v3761_v11  ;;  %v4451_v62 = vadd.f32 %v4450_v1, %v4449_v25 }
0x161b   : > { %v3805_v31 = vadd.f32 %v4451_v62, %v3764_v10 }
0x16ae   : > { %v4468_v47 = vpop.f32.mrb[172].mxu1 }
0x16af   : > { %v4469_v8 = vpop.f32.mrb[173].mxu1 }
0x16b0   : > { %v4470_v42 = vadd.f32 %v4469_v8, %v4468_v47  ;;  %v4471_v20 = vpop.f32.mrb[174].mxu1 }
0x16b1   : > { %v4472_v22 = vpop.f32.mrb[175].mxu1 }
0x16b2   : > { %v3843_v44 = vadd.f32 %v4470_v42, %v3802_v41  ;;  %v4473_v45 = vadd.f32 %v4472_v22, %v4471_v20 }
0x16b4   : > { %3849 = vst.msk [vmem:[%s383_s29] sm:$0xff] %vm1987_vm1, %v3843_v44  ;;  %v3846_v48 = vadd.f32 %v4473_v45, %v3805_v31 }
0x16b6   : > { %3850 = vst.msk [vmem:[%s383_s29 + $0x8] sm:$0xff] %vm1987_vm1, %v3846_v48 }
0x16b7   : > { %5227 = shalt.err (!%p5224_p8)
}
0x16b8   : > { %s5228_s21 = scalar_lea.hbm %s7360_s30, 256  ;;  %s5232_s20 = scalar_lea.hbm %s8065_s19, 512 }
0x16b9   : > { %p5229_p7 = scmp.ne.s32.totalorder %s7360_s30, %s5228_s21  ;;  %p5233_p1 = scmp.lt.u32.totalorder %s7360_s30, %s8065_s19 }
0x16ba   : > { %p5234_p13 = scmp.lt.u32.totalorder %s5232_s20, %s5228_s21  ;;  %p5236_p2 = scmp.lt.u32.totalorder %s5228_s21, %s7360_s30 }
0x16bb   : > { %p5230_p9 = pnand %p5229_p7, %p5530_p10 }
0x16bc   : > { %p5235_p6 = por %p5234_p13, %p5233_p1 }
0x16bd   : > { %p5231_p0 = pneg %p5230_p9 }
0x16be   : > { %p5237_p4 = por %p5236_p2, %p5235_p6 }
0x16c0   : > { %p5238_p3 = pnand %p5237_p4, %p5231_p0 }
0x16c2   : > { %5241 = shalt.err (!%p5238_p3)
}
0x16c3   : > { %s5331_s15 = smov 128   ;;  %s5332_s18 = smov 8  }
0x16c4   : > { %4814 = dma.vmem_to_hbm [thread:$0]  (%p5530_p10), %s7362_s13, 256, %s7360_s30, %s3852_s24, %s5331_s15, %s5331_s15, %s5332_s18  }
0x16c5 PF: > { %s8066_s27 = sld [smem:[#allocation23_spill]]  ;;  %s8067_s29 = sld [smem:[#allocation24_spill]] }
0x16c6   : > { %p8069_p11 = scmp.ge.s32.totalorder %s5312_s26, 2 }
0x16cb   : > { %s3882_s9 = sand.u32 1, %s8066_s27   ;;  %p8068_p5 = scmp.ne.s32.totalorder %s8067_s29, 0 }
0x16cc   : > { %s3883_s14 = scalar_lea.sflag [#allocation7], %s3882_s9 }
0x16cd   : > { %p4837_p12 = pnand %p8069_p11, %p8068_p5 }
0x16cf   : > { %5287 = dma.done.wait (!%p4837_p12), %s3883_s14, 256  }
0x16d0   : > { %5289 = vsyncadd (!%p4837_p12), %s3883_s14, 4294967040  ;;  %s27_s26 = sadd.s32 1, %s5312_s26   ;;  %s8070_s21 = smov %s5296_s22 }
0x16d1   : > { %p24_p8 = scmp.ge.s32.totalorder %s27_s26, 4   ;;  %s8071_s22 = smov %s5300_s23 }
0x16d2   : > { %s8072_s23 = smov %s5545_s6  ;;  %s8073_s24 = smov %s5308_s25 }
0x16d3   : > { %s8074_s25 = smov %s8076_s12  ;;  %26 = sbr.rel (!%p24_p8) target bundleno = 15 (0xf), region = 122 }
0x16da   :  { %3888 = vsyncpa [#allocation6], 1 }
0x16db   :  { %3890 = vsyncpa [#allocation6 + $0x1], 1 }
0x16dc   :  { %3891 = vsyncpa [#allocation9], 1 }
0x16dd   :  { %3893 = vsyncpa [#allocation9 + $0x1], 1 }
0x16de   :  { %3894 = vsyncpa [#allocation12], 1 }
0x16df   :  { %3895 = vsyncpa [#allocation15], 1 }
0x16e0   :  { %3896 = vsyncpa [#allocation7], 1 }
0x16e1   :  { %3898 = vsyncpa [#allocation7 + $0x1], 1 }

</bundles_post_ra>
